<compile_context>
chip_gen: v5e
topology: v5e:2x2
jax: 0.10.0
libtpu: 0.0.40
codegen_flags: <defaults>
</compile_context>

<pallas_src>
import functools
import math

import jax
import jax.numpy as jnp
from jax.experimental import pallas as pl
from jax.experimental.pallas import tpu as pltpu

# ----------------------------- small config (mirrors 'base' architecture, scaled down) ---
IMG_SIZE = 16
PATCH = 8
IN_CHANS = 3
V_WIDTH = 32          # vision_width (768 in real 'base')
V_DEPTH = 2           # 12 in real 'base'
V_HEADS = 4           # 12 in real 'base'
V_MLP = 4 * V_WIDTH

T_HIDDEN = 32         # BERT hidden (768 real)
T_LAYERS = 2
T_HEADS = 4
T_INTER = 64          # intermediate (3072 real)
VOCAB = 64
MAX_POS = 16
SEQ = 8
ENC_TOKEN_ID = 3      # stands in for tokenizer.enc_token_id

LN_EPS_VIT = 1e-6
LN_EPS_BERT = 1e-12

# Matmul operand dtype (accumulation always f32).  bf16 doubles MXU throughput and halves
# weight DMA/VMEM on v6e/v7x; use jnp.float32 for bit-level parity with the f32 reference.
MM_DTYPE = jnp.bfloat16


# =========================================================================================
# In-kernel helpers (values, not refs)
# =========================================================================================
def _gelu(x):
    # TODO(synk): PyTorch nn.GELU / BERT gelu are erf-based; tanh approximation used here.
    c = math.sqrt(2.0 / math.pi)
    return 0.5 * x * (1.0 + jnp.tanh(c * (x + 0.044715 * x * x * x)))


def _ln(x, g, b, eps):
    mean = jnp.mean(x, axis=-1, keepdims=True)
    var = jnp.mean((x - mean) ** 2, axis=-1, keepdims=True)
    return (x - mean) * jax.lax.rsqrt(var + eps) * g + b


def _mm(a, b):
    """a @ b with bf16 operands and f32 accumulation."""
    return jnp.dot(a.astype(MM_DTYPE), b.astype(MM_DTYPE),
                   preferred_element_type=jnp.float32)


def _mm_t(a, b):
    """a @ b.T with bf16 operands and f32 accumulation."""
    return jax.lax.dot_general(a.astype(MM_DTYPE), b.astype(MM_DTYPE),
                               (((1,), (1,)), ((), ())),
                               preferred_element_type=jnp.float32)


def _attention_core(q, k, v, bias, B, Tq, Tk, n_heads, dh):
    """Packed-projection multi-head attention on slabs.

    q: (B*Tq, H*dh), k/v: (B*Tk, H*dh) f32 values (projections already done on the full
    slab); bias: None or (B, 1, Tk) additive f32.  The softmax scale is pre-folded into
    the Q projection.  Batch loop only wraps the score/softmax/context so batches never
    attend to each other; heads loop only around the tiny (T,dh) matmuls; head contexts
    concatenate back to full width for a single output projection outside this helper.
    """
    ctx_rows = []
    for b in range(B):
        qb = q[b * Tq:(b + 1) * Tq]
        kb = k[b * Tk:(b + 1) * Tk]
        vb = v[b * Tk:(b + 1) * Tk]
        heads = []
        for h in range(n_heads):
            sl = slice(h * dh, (h + 1) * dh)
            s = _mm_t(qb[:, sl], kb[:, sl])                     # (Tq, Tk)
            if bias is not None:
                s = s + bias[b]                                 # (1, Tk) broadcast
            s = s - jnp.max(s, axis=-1, keepdims=True)
            p = jnp.exp(s)
            p = p * pl.reciprocal(jnp.sum(p, axis=-1, keepdims=True), approx=True)
            heads.append(_mm(p, vb[:, sl]))                     # (Tq, dh)
        ctx_rows.append(jnp.concatenate(heads, axis=-1))        # (Tq, H*dh)
    return jnp.concatenate(ctx_rows, axis=0)                    # (B*Tq, H*dh)


# =========================================================================================
# Fused Pallas kernels (one pallas_call per full transformer stack)
# =========================================================================================
def _vit_stack_kernel(x_ref,
                      ln1_g, ln1_b, wqkv, bqkv, wo, bo,
                      ln2_g, ln2_b, w1, b1, w2, b2,
                      norm_g, norm_b, o_ref, *, depth, n_heads, B, T, eps):
    """Full ViT encoder: `depth` pre-norm blocks + final LayerNorm, one grid step."""
    D = o_ref.shape[-1]
    dh = D // n_heads
    x = x_ref[...].astype(jnp.float32)                          # (B*T, D) slab
    for l in range(depth):
        # ---- pre-LN attention sublayer ----
        h = _ln(x, ln1_g[l], ln1_b[l], eps)
        qkv = _mm(h, wqkv[l]) + bqkv[l]                         # packed QKV, scale folded in
        q, k, v = qkv[:, :D], qkv[:, D:2 * D], qkv[:, 2 * D:]
        ctx = _attention_core(q, k, v, None, B, T, T, n_heads, dh)
        x = x + _mm(ctx, wo[l]) + bo[l]
        # ---- pre-LN MLP sublayer ----
        h = _ln(x, ln2_g[l], ln2_b[l], eps)
        h = _gelu(_mm(h, w1[l]) + b1[l])
        x = x + _mm(h, w2[l]) + b2[l]
    o_ref[...] = _ln(x, norm_g[...], norm_b[...], eps).astype(o_ref.dtype)


def _bert_stack_kernel(*refs, layers, n_heads, B, Tq, Tk, cross, eps):
    """Full BERT encoder: embedding LN + `layers` post-norm layers, one grid step."""
    refs = list(refs)
    o_ref = refs.pop()
    emb_ref = refs.pop(0)
    sbias_ref = refs.pop(0)
    if cross:
        enc_ref = refs.pop(0)
        cbias_ref = refs.pop(0)
    emb_ln_g = refs.pop(0)
    emb_ln_b = refs.pop(0)
    (s_ln_g, s_ln_b, s_wqkv, s_bqkv, s_wo, s_bo) = refs[:6]
    refs = refs[6:]
    if cross:
        (c_ln_g, c_ln_b, c_wq, c_bq, c_wkv, c_bkv, c_wo, c_bo) = refs[:8]
        refs = refs[8:]
    (m_ln_g, m_ln_b, m_w1, m_b1, m_w2, m_b2) = refs

    D = o_ref.shape[-1]
    dh = D // n_heads
    x = _ln(emb_ref[...].astype(jnp.float32), emb_ln_g[...], emb_ln_b[...], eps)
    sbias = sbias_ref[...].astype(jnp.float32)                  # (B, 1, Tq)
    if cross:
        enc = enc_ref[...].astype(jnp.float32)                  # (B*Tk, Dk)
        cbias = cbias_ref[...].astype(jnp.float32)              # (B, 1, Tk)

    for l in range(layers):
        # ---- post-LN self-attention ----
        qkv = _mm(x, s_wqkv[l]) + s_bqkv[l]
        q, k, v = qkv[:, :D], qkv[:, D:2 * D], qkv[:, 2 * D:]
        ctx = _attention_core(q, k, v, sbias, B, Tq, Tq, n_heads, dh)
        x = _ln(x + _mm(ctx, s_wo[l]) + s_bo[l], s_ln_g[l], s_ln_b[l], eps)
        # ---- post-LN cross-attention (multimodal) ----
        if cross:
            q = _mm(x, c_wq[l]) + c_bq[l]
            kv = _mm(enc, c_wkv[l]) + c_bkv[l]
            k, v = kv[:, :D], kv[:, D:]
            ctx = _attention_core(q, k, v, cbias, B, Tq, Tk, n_heads, dh)
            x = _ln(x + _mm(ctx, c_wo[l]) + c_bo[l], c_ln_g[l], c_ln_b[l], eps)
        # ---- post-LN MLP ----
        h = _gelu(_mm(x, m_w1[l]) + m_b1[l])
        x = _ln(x + _mm(h, m_w2[l]) + m_b2[l], m_ln_g[l], m_ln_b[l], eps)

    o_ref[...] = x.astype(o_ref.dtype)


def _full_spec(a):
    nd = a.ndim
    return pl.BlockSpec(a.shape, lambda i, _nd=nd: (0,) * _nd)


def vit_stack(x0, vp):
    """x0: (B, T, D) tokens (patch-embed + cls + pos already added).  One pallas_call."""
    B, T, D = x0.shape
    x2 = x0.reshape(B * T, D)
    weights = [vp[k] for k in ("ln1_g", "ln1_b", "wqkv", "bqkv", "wo", "bo",
                               "ln2_g", "ln2_b", "w1", "b1", "w2", "b2",
                               "norm_g", "norm_b")]
    kernel = functools.partial(_vit_stack_kernel, depth=V_DEPTH, n_heads=V_HEADS,
                               B=B, T=T, eps=LN_EPS_VIT)
    out = pl.pallas_call(
        kernel,
        out_shape=jax.ShapeDtypeStruct((B * T, D), jnp.float32),
        grid=(1,),
        in_specs=[_full_spec(x2)] + [_full_spec(w) for w in weights],
        out_specs=pl.BlockSpec((B * T, D), lambda i: (0, 0)),
        compiler_params=pltpu.CompilerParams(dimension_semantics=("arbitrary",)),
    )(x2, *weights)
    return out.reshape(B, T, D)


def bert_stack(emb, self_bias, bp, enc=None, cross_bias=None):
    """emb: (B, Tq, D) token+pos embeddings (pre-LN).  One pallas_call for all layers."""
    B, Tq, D = emb.shape
    cross = enc is not None
    inputs = [emb.reshape(B * Tq, D), self_bias]
    if cross:
        Tk = enc.shape[1]
        inputs += [enc.reshape(B * Tk, enc.shape[2]), cross_bias]
    else:
        Tk = Tq
    inputs += [bp["emb_ln_g"], bp["emb_ln_b"]]
    inputs += [bp[k] for k in ("s_ln_g", "s_ln_b", "s_wqkv", "s_bqkv", "s_wo", "s_bo")]
    if cross:
        inputs += [bp[k] for k in ("c_ln_g", "c_ln_b", "c_wq", "c_bq",
                                   "c_wkv", "c_bkv", "c_wo", "c_bo")]
    inputs += [bp[k] for k in ("m_ln_g", "m_ln_b", "m_w1", "m_b1", "m_w2", "m_b2")]

    kernel = functools.partial(_bert_stack_kernel, layers=T_LAYERS, n_heads=T_HEADS,
                               B=B, Tq=Tq, Tk=Tk, cross=cross, eps=LN_EPS_BERT)
    out = pl.pallas_call(
        kernel,
        out_shape=jax.ShapeDtypeStruct((B * Tq, D), jnp.float32),
        grid=(1,),
        in_specs=[_full_spec(a) for a in inputs],
        out_specs=pl.BlockSpec((B * Tq, D), lambda i: (0, 0)),
        compiler_params=pltpu.CompilerParams(dimension_semantics=("arbitrary",)),
    )(*inputs)
    return out.reshape(B, Tq, D)


# =========================================================================================
# Parameter init (deterministic, synthetic) + one-time packing for the fused kernels
# =========================================================================================
class KeyGen:
    def __init__(self, key):
        self.key = key

    def __call__(self):
        self.key, sub = jax.random.split(self.key)
        return sub


def _dense(kg, fan_in, fan_out):
    w = jax.random.normal(kg(), (fan_in, fan_out), jnp.float32) * 0.02
    b = jnp.zeros((fan_out,), jnp.float32)
    return w, b


def init_vit_params(kg):
    num_patches = (IMG_SIZE // PATCH) ** 2
    p = {}
    p["patch_w"], p["patch_b"] = _dense(kg, IN_CHANS * PATCH * PATCH, V_WIDTH)
    p["cls_token"] = jax.random.normal(kg(), (1, 1, V_WIDTH), jnp.float32) * 0.02
    p["pos_embed"] = jax.random.normal(kg(), (1, num_patches + 1, V_WIDTH), jnp.float32) * 0.02
    blocks = []
    for _ in range(V_DEPTH):
        b = {}
        b["ln1_g"] = jnp.ones((V_WIDTH,), jnp.float32)
        b["ln1_b"] = jnp.zeros((V_WIDTH,), jnp.float32)
        b["qkv_w"], b["qkv_b"] = _dense(kg, V_WIDTH, 3 * V_WIDTH)
        b["proj_w"], b["proj_b"] = _dense(kg, V_WIDTH, V_WIDTH)
        b["ln2_g"] = jnp.ones((V_WIDTH,), jnp.float32)
        b["ln2_b"] = jnp.zeros((V_WIDTH,), jnp.float32)
        b["fc1_w"], b["fc1_b"] = _dense(kg, V_WIDTH, V_MLP)
        b["fc2_w"], b["fc2_b"] = _dense(kg, V_MLP, V_WIDTH)
        blocks.append(b)
    p["blocks"] = blocks
    p["norm_g"] = jnp.ones((V_WIDTH,), jnp.float32)
    p["norm_b"] = jnp.zeros((V_WIDTH,), jnp.float32)
    return p


def _attn_params(kg, kv_dim):
    a = {}
    a["q_w"], a["q_b"] = _dense(kg, T_HIDDEN, T_HIDDEN)
    a["k_w"], a["k_b"] = _dense(kg, kv_dim, T_HIDDEN)
    a["v_w"], a["v_b"] = _dense(kg, kv_dim, T_HIDDEN)
    a["o_w"], a["o_b"] = _dense(kg, T_HIDDEN, T_HIDDEN)
    a["ln_g"] = jnp.ones((T_HIDDEN,), jnp.float32)
    a["ln_b"] = jnp.zeros((T_HIDDEN,), jnp.float32)
    return a


def init_bert_params(kg, encoder_width):
    p = {}
    p["word_emb"] = jax.random.normal(kg(), (VOCAB, T_HIDDEN), jnp.float32) * 0.02
    p["pos_emb"] = jax.random.normal(kg(), (MAX_POS, T_HIDDEN), jnp.float32) * 0.02
    p["emb_ln_g"] = jnp.ones((T_HIDDEN,), jnp.float32)
    p["emb_ln_b"] = jnp.zeros((T_HIDDEN,), jnp.float32)
    layers = []
    for _ in range(T_LAYERS):
        l = {}
        l["self"] = _attn_params(kg, T_HIDDEN)
        l["cross"] = _attn_params(kg, encoder_width)
        l["inter_w"], l["inter_b"] = _dense(kg, T_HIDDEN, T_INTER)
        l["out_w"], l["out_b"] = _dense(kg, T_INTER, T_HIDDEN)
        l["out_ln_g"] = jnp.ones((T_HIDDEN,), jnp.float32)
        l["out_ln_b"] = jnp.zeros((T_HIDDEN,), jnp.float32)
        layers.append(l)
    p["layers"] = layers
    return p


def _stackw(xs):
    """Stack matmul weights over layers and store as bf16 (operand dtype)."""
    return jnp.stack(xs, axis=0).astype(MM_DTYPE)


def _stackv(xs, width):
    """Stack bias / LN vectors over layers as (L, 1, width) f32 rows."""
    return jnp.stack([x.reshape(1, width) for x in xs], axis=0)


def prep_vit_params(p):
    """One-time packing: fold softmax scale into W_q, stack weights over layers."""
    D = V_WIDTH
    scale = 1.0 / math.sqrt(D // V_HEADS)
    blocks = p["blocks"]
    wqkv, bqkv = [], []
    for blk in blocks:
        w, b = blk["qkv_w"], blk["qkv_b"]
        wqkv.append(jnp.concatenate([w[:, :D] * scale, w[:, D:]], axis=1))
        bqkv.append(jnp.concatenate([b[:D] * scale, b[D:]], axis=0))
    return {
        # used on the XLA side (patch embed / cls / pos)
        "patch_w": p["patch_w"], "patch_b": p["patch_b"],
        "cls_token": p["cls_token"], "pos_embed": p["pos_embed"],
        # fused-kernel weights (layer-stacked)
        "ln1_g": _stackv([b["ln1_g"] for b in blocks], D),
        "ln1_b": _stackv([b["ln1_b"] for b in blocks], D),
        "wqkv": _stackw(wqkv),
        "bqkv": _stackv(bqkv, 3 * D),
        "wo": _stackw([b["proj_w"] for b in blocks]),
        "bo": _stackv([b["proj_b"] for b in blocks], D),
        "ln2_g": _stackv([b["ln2_g"] for b in blocks], D),
        "ln2_b": _stackv([b["ln2_b"] for b in blocks], D),
        "w1": _stackw([b["fc1_w"] for b in blocks]),
        "b1": _stackv([b["fc1_b"] for b in blocks], V_MLP),
        "w2": _stackw([b["fc2_w"] for b in blocks]),
        "b2": _stackv([b["fc2_b"] for b in blocks], D),
        "norm_g": p["norm_g"].reshape(1, D),
        "norm_b": p["norm_b"].reshape(1, D),
    }


def prep_bert_params(p):
    D = T_HIDDEN
    scale = 1.0 / math.sqrt(D // T_HEADS)
    layers = p["layers"]
    s_wqkv, s_bqkv, c_wq, c_bq, c_wkv, c_bkv = [], [], [], [], [], []
    for l in layers:
        sa, ca = l["self"], l["cross"]
        s_wqkv.append(jnp.concatenate([sa["q_w"] * scale, sa["k_w"], sa["v_w"]], axis=1))
        s_bqkv.append(jnp.concatenate([sa["q_b"] * scale, sa["k_b"], sa["v_b"]], axis=0))
        c_wq.append(ca["q_w"] * scale)
        c_bq.append(ca["q_b"] * scale)
        c_wkv.append(jnp.concatenate([ca["k_w"], ca["v_w"]], axis=1))
        c_bkv.append(jnp.concatenate([ca["k_b"], ca["v_b"]], axis=0))
    return {
        "word_emb": p["word_emb"], "pos_emb": p["pos_emb"],
        "emb_ln_g": p["emb_ln_g"].reshape(1, D), "emb_ln_b": p["emb_ln_b"].reshape(1, D),
        "s_ln_g": _stackv([l["self"]["ln_g"] for l in layers], D),
        "s_ln_b": _stackv([l["self"]["ln_b"] for l in layers], D),
        "s_wqkv": _stackw(s_wqkv),
        "s_bqkv": _stackv(s_bqkv, 3 * D),
        "s_wo": _stackw([l["self"]["o_w"] for l in layers]),
        "s_bo": _stackv([l["self"]["o_b"] for l in layers], D),
        "c_ln_g": _stackv([l["cross"]["ln_g"] for l in layers], D),
        "c_ln_b": _stackv([l["cross"]["ln_b"] for l in layers], D),
        "c_wq": _stackw(c_wq),
        "c_bq": _stackv(c_bq, D),
        "c_wkv": _stackw(c_wkv),
        "c_bkv": _stackv(c_bkv, 2 * D),
        "c_wo": _stackw([l["cross"]["o_w"] for l in layers]),
        "c_bo": _stackv([l["cross"]["o_b"] for l in layers], D),
        "m_ln_g": _stackv([l["out_ln_g"] for l in layers], D),
        "m_ln_b": _stackv([l["out_ln_b"] for l in layers], D),
        "m_w1": _stackw([l["inter_w"] for l in layers]),
        "m_b1": _stackv([l["inter_b"] for l in layers], T_INTER),
        "m_w2": _stackw([l["out_w"] for l in layers]),
        "m_b2": _stackv([l["out_b"] for l in layers], D),
    }


# =========================================================================================
# Model forward (embedding plumbing in XLA, one fused Pallas kernel per stack)
# =========================================================================================
def _make_bias(mask):
    # mask: (B, T) 1=keep 0=pad  ->  additive bias (B, 1, T), broadcast over heads in-kernel
    B, T = mask.shape
    return ((1.0 - mask.astype(jnp.float32)) * -10000.0).reshape(B, 1, T)


def vit_forward(vp, image):
    # image: (B, C, H, W) NCHW.  Patch extraction + embed matmul + cls/pos add are layout
    # plumbing and one tiny matmul; the whole transformer stack is ONE pallas_call.
    B, C, Hh, Ww = image.shape
    gh, gw = Hh // PATCH, Ww // PATCH
    x = image.reshape(B, C, gh, PATCH, gw, PATCH)
    x = x.transpose(0, 2, 4, 1, 3, 5).reshape(B, gh * gw, C * PATCH * PATCH)
    x = jnp.dot(x, vp["patch_w"]) + vp["patch_b"]
    cls = jnp.broadcast_to(vp["cls_token"], (B, 1, V_WIDTH))
    x = jnp.concatenate([cls, x], axis=1) + vp["pos_embed"]
    return vit_stack(x, vp)


def bert_forward(bp, input_ids, attention_mask,
                 encoder_hidden_states=None, encoder_attention_mask=None):
    B, T = input_ids.shape
    emb = jnp.take(bp["word_emb"], input_ids, axis=0) + bp["pos_emb"][:T][None]
    self_bias = _make_bias(attention_mask)
    if encoder_hidden_states is not None:
        cross_bias = _make_bias(encoder_attention_mask)
        return bert_stack(emb, self_bias, bp,
                          enc=encoder_hidden_states, cross_bias=cross_bias)
    return bert_stack(emb, self_bias, bp)


class BLIPBasePallas:
    """Pallas analogue of BLIP_Base (synthetic, deterministically-initialized weights)."""

    def __init__(self, key):
        kg = KeyGen(key)
        raw_vit = init_vit_params(kg)
        raw_bert = init_bert_params(kg, encoder_width=V_WIDTH)
        # All head-packing / QKV-concatenation / scale-folding / reshaping happens ONCE here.
        self.vit_params = prep_vit_params(raw_vit)
        self.bert_params = prep_bert_params(raw_bert)
        self._vit = jax.jit(vit_forward)
        self._bert_text = jax.jit(lambda bp, ids, mask: bert_forward(bp, ids, mask))
        self._bert_mm = jax.jit(
            lambda bp, ids, mask, enc, enc_mask: bert_forward(
                bp, ids, mask,
                encoder_hidden_states=enc, encoder_attention_mask=enc_mask))

    def forward(self, image, input_ids, attention_mask, mode):
        assert mode in ["image", "text", "multimodal"], \
            "mode parameter must be image, text, or multimodal"
        # TODO(synk): HF BertTokenizer has no Pallas/JAX equivalent; caller supplies token ids.
        if mode == "image":
            return self._vit(self.vit_params, image)
        elif mode == "text":
            return self._bert_text(self.bert_params, input_ids, attention_mask)
        else:  # multimodal
            image_embeds = self._vit(self.vit_params, image)
            image_atts = jnp.ones(image_embeds.shape[:-1], jnp.int32)
            input_ids = input_ids.at[:, 0].set(ENC_TOKEN_ID)
            return self._bert_mm(self.bert_params, input_ids, attention_mask,
                                 image_embeds, image_atts)


if __name__ == "__main__":
    root = jax.random.PRNGKey(0)
    model = BLIPBasePallas(jax.random.fold_in(root, 123))

    image = jax.random.normal(jax.random.fold_in(root, 1),
                              (2, IN_CHANS, IMG_SIZE, IMG_SIZE), jnp.float32)
    input_ids = jax.random.randint(jax.random.fold_in(root, 2), (2, SEQ), 0, VOCAB)
    attention_mask = jnp.ones((2, SEQ), jnp.int32)

    img_out = model.forward(image, input_ids, attention_mask, "image")        # (2, 5, 32)
    txt_out = model.forward(image, input_ids, attention_mask, "text")         # (2, 8, 32)
    mm_out = model.forward(image, input_ids, attention_mask, "multimodal")    # (2, 8, 32)

    jax.block_until_ready((img_out, txt_out, mm_out))
    assert img_out.shape == (2, (IMG_SIZE // PATCH) ** 2 + 1, V_WIDTH)
    assert txt_out.shape == (2, SEQ, T_HIDDEN)
    assert mm_out.shape == (2, SEQ, T_HIDDEN)
    assert bool(jnp.all(jnp.isfinite(img_out))) and bool(jnp.all(jnp.isfinite(txt_out))) \
        and bool(jnp.all(jnp.isfinite(mm_out)))
    print("KERNEL_OK")
</pallas_src>

<mosaic_0001>
module attributes {stable_mosaic.version = 11 : i64} {
  func.func @_vit_stack_kernel(%arg0: i32, %arg1: memref<10x32xf32, #tpu.memory_space<vmem>>, %arg2: memref<2x1x32xf32, #tpu.memory_space<vmem>>, %arg3: memref<2x1x32xf32, #tpu.memory_space<vmem>>, %arg4: memref<2x32x96xbf16, #tpu.memory_space<vmem>>, %arg5: memref<2x1x96xf32, #tpu.memory_space<vmem>>, %arg6: memref<2x32x32xbf16, #tpu.memory_space<vmem>>, %arg7: memref<2x1x32xf32, #tpu.memory_space<vmem>>, %arg8: memref<2x1x32xf32, #tpu.memory_space<vmem>>, %arg9: memref<2x1x32xf32, #tpu.memory_space<vmem>>, %arg10: memref<2x32x128xbf16, #tpu.memory_space<vmem>>, %arg11: memref<2x1x128xf32, #tpu.memory_space<vmem>>, %arg12: memref<2x128x32xbf16, #tpu.memory_space<vmem>>, %arg13: memref<2x1x32xf32, #tpu.memory_space<vmem>>, %arg14: memref<1x32xf32, #tpu.memory_space<vmem>>, %arg15: memref<1x32xf32, #tpu.memory_space<vmem>>, %arg16: memref<10x32xf32, #tpu.memory_space<vmem>>) attributes {dimension_semantics = [#tpu.dimension_semantics<arbitrary>], iteration_bounds = array<i64: 1>, scalar_prefetch = 0 : i64, scratch_operands = 0 : i64, tpu.core_type = #tpu.core_type<tc>, window_params = [{pipeline_mode = #tpu.pipeline_mode<synchronous>, transform_indices = @transform_0, window_bounds = array<i64: 10, 32>}, {pipeline_mode = #tpu.pipeline_mode<synchronous>, transform_indices = @transform_1, window_bounds = array<i64: 2, 1, 32>}, {pipeline_mode = #tpu.pipeline_mode<synchronous>, transform_indices = @transform_2, window_bounds = array<i64: 2, 1, 32>}, {pipeline_mode = #tpu.pipeline_mode<synchronous>, transform_indices = @transform_3, window_bounds = array<i64: 2, 32, 96>}, {pipeline_mode = #tpu.pipeline_mode<synchronous>, transform_indices = @transform_4, window_bounds = array<i64: 2, 1, 96>}, {pipeline_mode = #tpu.pipeline_mode<synchronous>, transform_indices = @transform_5, window_bounds = array<i64: 2, 32, 32>}, {pipeline_mode = #tpu.pipeline_mode<synchronous>, transform_indices = @transform_6, window_bounds = array<i64: 2, 1, 32>}, {pipeline_mode = #tpu.pipeline_mode<synchronous>, transform_indices = @transform_7, window_bounds = array<i64: 2, 1, 32>}, {pipeline_mode = #tpu.pipeline_mode<synchronous>, transform_indices = @transform_8, window_bounds = array<i64: 2, 1, 32>}, {pipeline_mode = #tpu.pipeline_mode<synchronous>, transform_indices = @transform_9, window_bounds = array<i64: 2, 32, 128>}, {pipeline_mode = #tpu.pipeline_mode<synchronous>, transform_indices = @transform_10, window_bounds = array<i64: 2, 1, 128>}, {pipeline_mode = #tpu.pipeline_mode<synchronous>, transform_indices = @transform_11, window_bounds = array<i64: 2, 128, 32>}, {pipeline_mode = #tpu.pipeline_mode<synchronous>, transform_indices = @transform_12, window_bounds = array<i64: 2, 1, 32>}, {pipeline_mode = #tpu.pipeline_mode<synchronous>, transform_indices = @transform_13, window_bounds = array<i64: 1, 32>}, {pipeline_mode = #tpu.pipeline_mode<synchronous>, transform_indices = @transform_14, window_bounds = array<i64: 1, 32>}, {pipeline_mode = #tpu.pipeline_mode<synchronous>, transform_indices = @transform_15, window_bounds = array<i64: 10, 32>}]} {
    %c0 = arith.constant 0 : index
    %c0_0 = arith.constant 0 : index
    %0 = vector.load %arg1[%c0, %c0_0] : memref<10x32xf32, #tpu.memory_space<vmem>>, vector<10x32xf32>
    %c0_1 = arith.constant 0 : index
    %c0_2 = arith.constant 0 : index
    %c0_3 = arith.constant 0 : index
    %1 = vector.load %arg2[%c0_1, %c0_2, %c0_3] : memref<2x1x32xf32, #tpu.memory_space<vmem>>, vector<1x1x32xf32>
    %2 = vector.shape_cast %1 : vector<1x1x32xf32> to vector<1x32xf32>
    %c0_4 = arith.constant 0 : index
    %c0_5 = arith.constant 0 : index
    %c0_6 = arith.constant 0 : index
    %3 = vector.load %arg3[%c0_4, %c0_5, %c0_6] : memref<2x1x32xf32, #tpu.memory_space<vmem>>, vector<1x1x32xf32>
    %4 = vector.shape_cast %3 : vector<1x1x32xf32> to vector<1x32xf32>
    %cst = arith.constant dense<0.000000e+00> : vector<10xf32>
    %5 = vector.multi_reduction <add>, %0, %cst [1] : vector<10x32xf32> to vector<10xf32>
    %6 = vector.shape_cast %5 : vector<10xf32> to vector<10x1xf32>
    %cst_7 = arith.constant 3.200000e+01 : f32
    %7 = vector.broadcast %cst_7 : f32 to vector<10x1xf32>
    %8 = arith.divf %6, %7 : vector<10x1xf32>
    %9 = vector.broadcast %8 : vector<10x1xf32> to vector<10x32xf32>
    %10 = arith.subf %0, %9 : vector<10x32xf32>
    %11 = arith.mulf %10, %10 : vector<10x32xf32>
    %cst_8 = arith.constant dense<0.000000e+00> : vector<10xf32>
    %12 = vector.multi_reduction <add>, %11, %cst_8 [1] : vector<10x32xf32> to vector<10xf32>
    %13 = vector.shape_cast %12 : vector<10xf32> to vector<10x1xf32>
    %cst_9 = arith.constant 3.200000e+01 : f32
    %14 = vector.broadcast %cst_9 : f32 to vector<10x1xf32>
    %15 = arith.divf %13, %14 : vector<10x1xf32>
    %16 = vector.broadcast %8 : vector<10x1xf32> to vector<10x32xf32>
    %17 = arith.subf %0, %16 : vector<10x32xf32>
    %cst_10 = arith.constant 9.99999997E-7 : f32
    %18 = vector.broadcast %cst_10 : f32 to vector<10x1xf32>
    %19 = arith.addf %15, %18 : vector<10x1xf32>
    %20 = math.rsqrt %19 : vector<10x1xf32>
    %21 = vector.broadcast %20 : vector<10x1xf32> to vector<10x32xf32>
    %22 = arith.mulf %17, %21 : vector<10x32xf32>
    %23 = vector.broadcast %2 : vector<1x32xf32> to vector<10x32xf32>
    %24 = arith.mulf %22, %23 : vector<10x32xf32>
    %25 = vector.broadcast %4 : vector<1x32xf32> to vector<10x32xf32>
    %26 = arith.addf %24, %25 : vector<10x32xf32>
    %c0_11 = arith.constant 0 : index
    %c0_12 = arith.constant 0 : index
    %c0_13 = arith.constant 0 : index
    %27 = vector.load %arg4[%c0_11, %c0_12, %c0_13] : memref<2x32x96xbf16, #tpu.memory_space<vmem>>, vector<1x32x96xbf16>
    %28 = vector.shape_cast %27 : vector<1x32x96xbf16> to vector<32x96xbf16>
    %29 = arith.truncf %26 : vector<10x32xf32> to vector<10x32xbf16>
    %cst_14 = arith.constant dense<0.000000e+00> : vector<10x96xf32>
    %30 = tpu.matmul %29, %28, %cst_14 {dimension_numbers = #tpu.dot_dimension_numbers<[1], [0], [0], [1], [0, 0, 1, 1], [], []>} : vector<10x32xbf16>, vector<32x96xbf16>, vector<10x96xf32> -> vector<10x96xf32>
    %c0_15 = arith.constant 0 : index
    %c0_16 = arith.constant 0 : index
    %c0_17 = arith.constant 0 : index
    %31 = vector.load %arg5[%c0_15, %c0_16, %c0_17] : memref<2x1x96xf32, #tpu.memory_space<vmem>>, vector<1x1x96xf32>
    %32 = vector.shape_cast %31 : vector<1x1x96xf32> to vector<1x96xf32>
    %33 = vector.broadcast %32 : vector<1x96xf32> to vector<10x96xf32>
    %34 = arith.addf %30, %33 : vector<10x96xf32>
    %35 = vector.extract_strided_slice %34 {offsets = [0, 0], sizes = [10, 32], strides = [1, 1]} : vector<10x96xf32> to vector<10x32xf32>
    %36 = vector.extract_strided_slice %34 {offsets = [0, 32], sizes = [10, 32], strides = [1, 1]} : vector<10x96xf32> to vector<10x32xf32>
    %37 = vector.extract_strided_slice %34 {offsets = [0, 64], sizes = [10, 32], strides = [1, 1]} : vector<10x96xf32> to vector<10x32xf32>
    %38 = vector.extract_strided_slice %35 {offsets = [0, 0], sizes = [5, 32], strides = [1, 1]} : vector<10x32xf32> to vector<5x32xf32>
    %39 = vector.extract_strided_slice %36 {offsets = [0, 0], sizes = [5, 32], strides = [1, 1]} : vector<10x32xf32> to vector<5x32xf32>
    %40 = vector.extract_strided_slice %37 {offsets = [0, 0], sizes = [5, 32], strides = [1, 1]} : vector<10x32xf32> to vector<5x32xf32>
    %41 = vector.extract_strided_slice %38 {offsets = [0, 0], sizes = [5, 8], strides = [1, 1]} : vector<5x32xf32> to vector<5x8xf32>
    %42 = vector.extract_strided_slice %39 {offsets = [0, 0], sizes = [5, 8], strides = [1, 1]} : vector<5x32xf32> to vector<5x8xf32>
    %43 = arith.truncf %41 : vector<5x8xf32> to vector<5x8xbf16>
    %44 = arith.truncf %42 : vector<5x8xf32> to vector<5x8xbf16>
    %cst_18 = arith.constant dense<0.000000e+00> : vector<5x5xf32>
    %45 = tpu.matmul %43, %44, %cst_18 {dimension_numbers = #tpu.dot_dimension_numbers<[1], [1], [0], [0], [0, 0, 1, 0], [], []>} : vector<5x8xbf16>, vector<5x8xbf16>, vector<5x5xf32> -> vector<5x5xf32>
    %cst_19 = arith.constant dense<0xFF800000> : vector<5xf32>
    %46 = vector.multi_reduction <maximumf>, %45, %cst_19 [1] : vector<5x5xf32> to vector<5xf32>
    %47 = vector.shape_cast %46 : vector<5xf32> to vector<5x1xf32>
    %48 = vector.broadcast %47 : vector<5x1xf32> to vector<5x5xf32>
    %49 = arith.subf %45, %48 : vector<5x5xf32>
    %50 = math.exp %49 : vector<5x5xf32>
    %cst_20 = arith.constant dense<0.000000e+00> : vector<5xf32>
    %51 = vector.multi_reduction <add>, %50, %cst_20 [1] : vector<5x5xf32> to vector<5xf32>
    %52 = vector.shape_cast %51 : vector<5xf32> to vector<5x1xf32>
    %53 = tpu.reciprocal %52 {approx = true} : vector<5x1xf32> -> vector<5x1xf32>
    %54 = vector.broadcast %53 : vector<5x1xf32> to vector<5x5xf32>
    %55 = arith.mulf %50, %54 : vector<5x5xf32>
    %56 = vector.extract_strided_slice %40 {offsets = [0, 0], sizes = [5, 8], strides = [1, 1]} : vector<5x32xf32> to vector<5x8xf32>
    %57 = arith.truncf %55 : vector<5x5xf32> to vector<5x5xbf16>
    %58 = arith.truncf %56 : vector<5x8xf32> to vector<5x8xbf16>
    %cst_21 = arith.constant dense<0.000000e+00> : vector<5x8xf32>
    %59 = tpu.matmul %57, %58, %cst_21 {dimension_numbers = #tpu.dot_dimension_numbers<[1], [0], [0], [1], [0, 0, 1, 1], [], []>} : vector<5x5xbf16>, vector<5x8xbf16>, vector<5x8xf32> -> vector<5x8xf32>
    %60 = vector.extract_strided_slice %38 {offsets = [0, 8], sizes = [5, 8], strides = [1, 1]} : vector<5x32xf32> to vector<5x8xf32>
    %61 = vector.extract_strided_slice %39 {offsets = [0, 8], sizes = [5, 8], strides = [1, 1]} : vector<5x32xf32> to vector<5x8xf32>
    %62 = arith.truncf %60 : vector<5x8xf32> to vector<5x8xbf16>
    %63 = arith.truncf %61 : vector<5x8xf32> to vector<5x8xbf16>
    %cst_22 = arith.constant dense<0.000000e+00> : vector<5x5xf32>
    %64 = tpu.matmul %62, %63, %cst_22 {dimension_numbers = #tpu.dot_dimension_numbers<[1], [1], [0], [0], [0, 0, 1, 0], [], []>} : vector<5x8xbf16>, vector<5x8xbf16>, vector<5x5xf32> -> vector<5x5xf32>
    %cst_23 = arith.constant dense<0xFF800000> : vector<5xf32>
    %65 = vector.multi_reduction <maximumf>, %64, %cst_23 [1] : vector<5x5xf32> to vector<5xf32>
    %66 = vector.shape_cast %65 : vector<5xf32> to vector<5x1xf32>
    %67 = vector.broadcast %66 : vector<5x1xf32> to vector<5x5xf32>
    %68 = arith.subf %64, %67 : vector<5x5xf32>
    %69 = math.exp %68 : vector<5x5xf32>
    %cst_24 = arith.constant dense<0.000000e+00> : vector<5xf32>
    %70 = vector.multi_reduction <add>, %69, %cst_24 [1] : vector<5x5xf32> to vector<5xf32>
    %71 = vector.shape_cast %70 : vector<5xf32> to vector<5x1xf32>
    %72 = tpu.reciprocal %71 {approx = true} : vector<5x1xf32> -> vector<5x1xf32>
    %73 = vector.broadcast %72 : vector<5x1xf32> to vector<5x5xf32>
    %74 = arith.mulf %69, %73 : vector<5x5xf32>
    %75 = vector.extract_strided_slice %40 {offsets = [0, 8], sizes = [5, 8], strides = [1, 1]} : vector<5x32xf32> to vector<5x8xf32>
    %76 = arith.truncf %74 : vector<5x5xf32> to vector<5x5xbf16>
    %77 = arith.truncf %75 : vector<5x8xf32> to vector<5x8xbf16>
    %cst_25 = arith.constant dense<0.000000e+00> : vector<5x8xf32>
    %78 = tpu.matmul %76, %77, %cst_25 {dimension_numbers = #tpu.dot_dimension_numbers<[1], [0], [0], [1], [0, 0, 1, 1], [], []>} : vector<5x5xbf16>, vector<5x8xbf16>, vector<5x8xf32> -> vector<5x8xf32>
    %79 = vector.extract_strided_slice %38 {offsets = [0, 16], sizes = [5, 8], strides = [1, 1]} : vector<5x32xf32> to vector<5x8xf32>
    %80 = vector.extract_strided_slice %39 {offsets = [0, 16], sizes = [5, 8], strides = [1, 1]} : vector<5x32xf32> to vector<5x8xf32>
    %81 = arith.truncf %79 : vector<5x8xf32> to vector<5x8xbf16>
    %82 = arith.truncf %80 : vector<5x8xf32> to vector<5x8xbf16>
    %cst_26 = arith.constant dense<0.000000e+00> : vector<5x5xf32>
    %83 = tpu.matmul %81, %82, %cst_26 {dimension_numbers = #tpu.dot_dimension_numbers<[1], [1], [0], [0], [0, 0, 1, 0], [], []>} : vector<5x8xbf16>, vector<5x8xbf16>, vector<5x5xf32> -> vector<5x5xf32>
    %cst_27 = arith.constant dense<0xFF800000> : vector<5xf32>
    %84 = vector.multi_reduction <maximumf>, %83, %cst_27 [1] : vector<5x5xf32> to vector<5xf32>
    %85 = vector.shape_cast %84 : vector<5xf32> to vector<5x1xf32>
    %86 = vector.broadcast %85 : vector<5x1xf32> to vector<5x5xf32>
    %87 = arith.subf %83, %86 : vector<5x5xf32>
    %88 = math.exp %87 : vector<5x5xf32>
    %cst_28 = arith.constant dense<0.000000e+00> : vector<5xf32>
    %89 = vector.multi_reduction <add>, %88, %cst_28 [1] : vector<5x5xf32> to vector<5xf32>
    %90 = vector.shape_cast %89 : vector<5xf32> to vector<5x1xf32>
    %91 = tpu.reciprocal %90 {approx = true} : vector<5x1xf32> -> vector<5x1xf32>
    %92 = vector.broadcast %91 : vector<5x1xf32> to vector<5x5xf32>
    %93 = arith.mulf %88, %92 : vector<5x5xf32>
    %94 = vector.extract_strided_slice %40 {offsets = [0, 16], sizes = [5, 8], strides = [1, 1]} : vector<5x32xf32> to vector<5x8xf32>
    %95 = arith.truncf %93 : vector<5x5xf32> to vector<5x5xbf16>
    %96 = arith.truncf %94 : vector<5x8xf32> to vector<5x8xbf16>
    %cst_29 = arith.constant dense<0.000000e+00> : vector<5x8xf32>
    %97 = tpu.matmul %95, %96, %cst_29 {dimension_numbers = #tpu.dot_dimension_numbers<[1], [0], [0], [1], [0, 0, 1, 1], [], []>} : vector<5x5xbf16>, vector<5x8xbf16>, vector<5x8xf32> -> vector<5x8xf32>
    %98 = vector.extract_strided_slice %38 {offsets = [0, 24], sizes = [5, 8], strides = [1, 1]} : vector<5x32xf32> to vector<5x8xf32>
    %99 = vector.extract_strided_slice %39 {offsets = [0, 24], sizes = [5, 8], strides = [1, 1]} : vector<5x32xf32> to vector<5x8xf32>
    %100 = arith.truncf %98 : vector<5x8xf32> to vector<5x8xbf16>
    %101 = arith.truncf %99 : vector<5x8xf32> to vector<5x8xbf16>
    %cst_30 = arith.constant dense<0.000000e+00> : vector<5x5xf32>
    %102 = tpu.matmul %100, %101, %cst_30 {dimension_numbers = #tpu.dot_dimension_numbers<[1], [1], [0], [0], [0, 0, 1, 0], [], []>} : vector<5x8xbf16>, vector<5x8xbf16>, vector<5x5xf32> -> vector<5x5xf32>
    %cst_31 = arith.constant dense<0xFF800000> : vector<5xf32>
    %103 = vector.multi_reduction <maximumf>, %102, %cst_31 [1] : vector<5x5xf32> to vector<5xf32>
    %104 = vector.shape_cast %103 : vector<5xf32> to vector<5x1xf32>
    %105 = vector.broadcast %104 : vector<5x1xf32> to vector<5x5xf32>
    %106 = arith.subf %102, %105 : vector<5x5xf32>
    %107 = math.exp %106 : vector<5x5xf32>
    %cst_32 = arith.constant dense<0.000000e+00> : vector<5xf32>
    %108 = vector.multi_reduction <add>, %107, %cst_32 [1] : vector<5x5xf32> to vector<5xf32>
    %109 = vector.shape_cast %108 : vector<5xf32> to vector<5x1xf32>
    %110 = tpu.reciprocal %109 {approx = true} : vector<5x1xf32> -> vector<5x1xf32>
    %111 = vector.broadcast %110 : vector<5x1xf32> to vector<5x5xf32>
    %112 = arith.mulf %107, %111 : vector<5x5xf32>
    %113 = vector.extract_strided_slice %40 {offsets = [0, 24], sizes = [5, 8], strides = [1, 1]} : vector<5x32xf32> to vector<5x8xf32>
    %114 = arith.truncf %112 : vector<5x5xf32> to vector<5x5xbf16>
    %115 = arith.truncf %113 : vector<5x8xf32> to vector<5x8xbf16>
    %cst_33 = arith.constant dense<0.000000e+00> : vector<5x8xf32>
    %116 = tpu.matmul %114, %115, %cst_33 {dimension_numbers = #tpu.dot_dimension_numbers<[1], [0], [0], [1], [0, 0, 1, 1], [], []>} : vector<5x5xbf16>, vector<5x8xbf16>, vector<5x8xf32> -> vector<5x8xf32>
    %117 = tpu.concatenate %59, %78, %97, %116 in 1 : vector<5x8xf32>, vector<5x8xf32>, vector<5x8xf32>, vector<5x8xf32> -> vector<5x32xf32>
    %118 = vector.extract_strided_slice %35 {offsets = [5, 0], sizes = [5, 32], strides = [1, 1]} : vector<10x32xf32> to vector<5x32xf32>
    %119 = vector.extract_strided_slice %36 {offsets = [5, 0], sizes = [5, 32], strides = [1, 1]} : vector<10x32xf32> to vector<5x32xf32>
    %120 = vector.extract_strided_slice %37 {offsets = [5, 0], sizes = [5, 32], strides = [1, 1]} : vector<10x32xf32> to vector<5x32xf32>
    %121 = vector.extract_strided_slice %118 {offsets = [0, 0], sizes = [5, 8], strides = [1, 1]} : vector<5x32xf32> to vector<5x8xf32>
    %122 = vector.extract_strided_slice %119 {offsets = [0, 0], sizes = [5, 8], strides = [1, 1]} : vector<5x32xf32> to vector<5x8xf32>
    %123 = arith.truncf %121 : vector<5x8xf32> to vector<5x8xbf16>
    %124 = arith.truncf %122 : vector<5x8xf32> to vector<5x8xbf16>
    %cst_34 = arith.constant dense<0.000000e+00> : vector<5x5xf32>
    %125 = tpu.matmul %123, %124, %cst_34 {dimension_numbers = #tpu.dot_dimension_numbers<[1], [1], [0], [0], [0, 0, 1, 0], [], []>} : vector<5x8xbf16>, vector<5x8xbf16>, vector<5x5xf32> -> vector<5x5xf32>
    %cst_35 = arith.constant dense<0xFF800000> : vector<5xf32>
    %126 = vector.multi_reduction <maximumf>, %125, %cst_35 [1] : vector<5x5xf32> to vector<5xf32>
    %127 = vector.shape_cast %126 : vector<5xf32> to vector<5x1xf32>
    %128 = vector.broadcast %127 : vector<5x1xf32> to vector<5x5xf32>
    %129 = arith.subf %125, %128 : vector<5x5xf32>
    %130 = math.exp %129 : vector<5x5xf32>
    %cst_36 = arith.constant dense<0.000000e+00> : vector<5xf32>
    %131 = vector.multi_reduction <add>, %130, %cst_36 [1] : vector<5x5xf32> to vector<5xf32>
    %132 = vector.shape_cast %131 : vector<5xf32> to vector<5x1xf32>
    %133 = tpu.reciprocal %132 {approx = true} : vector<5x1xf32> -> vector<5x1xf32>
    %134 = vector.broadcast %133 : vector<5x1xf32> to vector<5x5xf32>
    %135 = arith.mulf %130, %134 : vector<5x5xf32>
    %136 = vector.extract_strided_slice %120 {offsets = [0, 0], sizes = [5, 8], strides = [1, 1]} : vector<5x32xf32> to vector<5x8xf32>
    %137 = arith.truncf %135 : vector<5x5xf32> to vector<5x5xbf16>
    %138 = arith.truncf %136 : vector<5x8xf32> to vector<5x8xbf16>
    %cst_37 = arith.constant dense<0.000000e+00> : vector<5x8xf32>
    %139 = tpu.matmul %137, %138, %cst_37 {dimension_numbers = #tpu.dot_dimension_numbers<[1], [0], [0], [1], [0, 0, 1, 1], [], []>} : vector<5x5xbf16>, vector<5x8xbf16>, vector<5x8xf32> -> vector<5x8xf32>
    %140 = vector.extract_strided_slice %118 {offsets = [0, 8], sizes = [5, 8], strides = [1, 1]} : vector<5x32xf32> to vector<5x8xf32>
    %141 = vector.extract_strided_slice %119 {offsets = [0, 8], sizes = [5, 8], strides = [1, 1]} : vector<5x32xf32> to vector<5x8xf32>
    %142 = arith.truncf %140 : vector<5x8xf32> to vector<5x8xbf16>
    %143 = arith.truncf %141 : vector<5x8xf32> to vector<5x8xbf16>
    %cst_38 = arith.constant dense<0.000000e+00> : vector<5x5xf32>
    %144 = tpu.matmul %142, %143, %cst_38 {dimension_numbers = #tpu.dot_dimension_numbers<[1], [1], [0], [0], [0, 0, 1, 0], [], []>} : vector<5x8xbf16>, vector<5x8xbf16>, vector<5x5xf32> -> vector<5x5xf32>
    %cst_39 = arith.constant dense<0xFF800000> : vector<5xf32>
    %145 = vector.multi_reduction <maximumf>, %144, %cst_39 [1] : vector<5x5xf32> to vector<5xf32>
    %146 = vector.shape_cast %145 : vector<5xf32> to vector<5x1xf32>
    %147 = vector.broadcast %146 : vector<5x1xf32> to vector<5x5xf32>
    %148 = arith.subf %144, %147 : vector<5x5xf32>
    %149 = math.exp %148 : vector<5x5xf32>
    %cst_40 = arith.constant dense<0.000000e+00> : vector<5xf32>
    %150 = vector.multi_reduction <add>, %149, %cst_40 [1] : vector<5x5xf32> to vector<5xf32>
    %151 = vector.shape_cast %150 : vector<5xf32> to vector<5x1xf32>
    %152 = tpu.reciprocal %151 {approx = true} : vector<5x1xf32> -> vector<5x1xf32>
    %153 = vector.broadcast %152 : vector<5x1xf32> to vector<5x5xf32>
    %154 = arith.mulf %149, %153 : vector<5x5xf32>
    %155 = vector.extract_strided_slice %120 {offsets = [0, 8], sizes = [5, 8], strides = [1, 1]} : vector<5x32xf32> to vector<5x8xf32>
    %156 = arith.truncf %154 : vector<5x5xf32> to vector<5x5xbf16>
    %157 = arith.truncf %155 : vector<5x8xf32> to vector<5x8xbf16>
    %cst_41 = arith.constant dense<0.000000e+00> : vector<5x8xf32>
    %158 = tpu.matmul %156, %157, %cst_41 {dimension_numbers = #tpu.dot_dimension_numbers<[1], [0], [0], [1], [0, 0, 1, 1], [], []>} : vector<5x5xbf16>, vector<5x8xbf16>, vector<5x8xf32> -> vector<5x8xf32>
    %159 = vector.extract_strided_slice %118 {offsets = [0, 16], sizes = [5, 8], strides = [1, 1]} : vector<5x32xf32> to vector<5x8xf32>
    %160 = vector.extract_strided_slice %119 {offsets = [0, 16], sizes = [5, 8], strides = [1, 1]} : vector<5x32xf32> to vector<5x8xf32>
    %161 = arith.truncf %159 : vector<5x8xf32> to vector<5x8xbf16>
    %162 = arith.truncf %160 : vector<5x8xf32> to vector<5x8xbf16>
    %cst_42 = arith.constant dense<0.000000e+00> : vector<5x5xf32>
    %163 = tpu.matmul %161, %162, %cst_42 {dimension_numbers = #tpu.dot_dimension_numbers<[1], [1], [0], [0], [0, 0, 1, 0], [], []>} : vector<5x8xbf16>, vector<5x8xbf16>, vector<5x5xf32> -> vector<5x5xf32>
    %cst_43 = arith.constant dense<0xFF800000> : vector<5xf32>
    %164 = vector.multi_reduction <maximumf>, %163, %cst_43 [1] : vector<5x5xf32> to vector<5xf32>
    %165 = vector.shape_cast %164 : vector<5xf32> to vector<5x1xf32>
    %166 = vector.broadcast %165 : vector<5x1xf32> to vector<5x5xf32>
    %167 = arith.subf %163, %166 : vector<5x5xf32>
    %168 = math.exp %167 : vector<5x5xf32>
    %cst_44 = arith.constant dense<0.000000e+00> : vector<5xf32>
    %169 = vector.multi_reduction <add>, %168, %cst_44 [1] : vector<5x5xf32> to vector<5xf32>
    %170 = vector.shape_cast %169 : vector<5xf32> to vector<5x1xf32>
    %171 = tpu.reciprocal %170 {approx = true} : vector<5x1xf32> -> vector<5x1xf32>
    %172 = vector.broadcast %171 : vector<5x1xf32> to vector<5x5xf32>
    %173 = arith.mulf %168, %172 : vector<5x5xf32>
    %174 = vector.extract_strided_slice %120 {offsets = [0, 16], sizes = [5, 8], strides = [1, 1]} : vector<5x32xf32> to vector<5x8xf32>
    %175 = arith.truncf %173 : vector<5x5xf32> to vector<5x5xbf16>
    %176 = arith.truncf %174 : vector<5x8xf32> to vector<5x8xbf16>
    %cst_45 = arith.constant dense<0.000000e+00> : vector<5x8xf32>
    %177 = tpu.matmul %175, %176, %cst_45 {dimension_numbers = #tpu.dot_dimension_numbers<[1], [0], [0], [1], [0, 0, 1, 1], [], []>} : vector<5x5xbf16>, vector<5x8xbf16>, vector<5x8xf32> -> vector<5x8xf32>
    %178 = vector.extract_strided_slice %118 {offsets = [0, 24], sizes = [5, 8], strides = [1, 1]} : vector<5x32xf32> to vector<5x8xf32>
    %179 = vector.extract_strided_slice %119 {offsets = [0, 24], sizes = [5, 8], strides = [1, 1]} : vector<5x32xf32> to vector<5x8xf32>
    %180 = arith.truncf %178 : vector<5x8xf32> to vector<5x8xbf16>
    %181 = arith.truncf %179 : vector<5x8xf32> to vector<5x8xbf16>
    %cst_46 = arith.constant dense<0.000000e+00> : vector<5x5xf32>
    %182 = tpu.matmul %180, %181, %cst_46 {dimension_numbers = #tpu.dot_dimension_numbers<[1], [1], [0], [0], [0, 0, 1, 0], [], []>} : vector<5x8xbf16>, vector<5x8xbf16>, vector<5x5xf32> -> vector<5x5xf32>
    %cst_47 = arith.constant dense<0xFF800000> : vector<5xf32>
    %183 = vector.multi_reduction <maximumf>, %182, %cst_47 [1] : vector<5x5xf32> to vector<5xf32>
    %184 = vector.shape_cast %183 : vector<5xf32> to vector<5x1xf32>
    %185 = vector.broadcast %184 : vector<5x1xf32> to vector<5x5xf32>
    %186 = arith.subf %182, %185 : vector<5x5xf32>
    %187 = math.exp %186 : vector<5x5xf32>
    %cst_48 = arith.constant dense<0.000000e+00> : vector<5xf32>
    %188 = vector.multi_reduction <add>, %187, %cst_48 [1] : vector<5x5xf32> to vector<5xf32>
    %189 = vector.shape_cast %188 : vector<5xf32> to vector<5x1xf32>
    %190 = tpu.reciprocal %189 {approx = true} : vector<5x1xf32> -> vector<5x1xf32>
    %191 = vector.broadcast %190 : vector<5x1xf32> to vector<5x5xf32>
    %192 = arith.mulf %187, %191 : vector<5x5xf32>
    %193 = vector.extract_strided_slice %120 {offsets = [0, 24], sizes = [5, 8], strides = [1, 1]} : vector<5x32xf32> to vector<5x8xf32>
    %194 = arith.truncf %192 : vector<5x5xf32> to vector<5x5xbf16>
    %195 = arith.truncf %193 : vector<5x8xf32> to vector<5x8xbf16>
    %cst_49 = arith.constant dense<0.000000e+00> : vector<5x8xf32>
    %196 = tpu.matmul %194, %195, %cst_49 {dimension_numbers = #tpu.dot_dimension_numbers<[1], [0], [0], [1], [0, 0, 1, 1], [], []>} : vector<5x5xbf16>, vector<5x8xbf16>, vector<5x8xf32> -> vector<5x8xf32>
    %197 = tpu.concatenate %139, %158, %177, %196 in 1 : vector<5x8xf32>, vector<5x8xf32>, vector<5x8xf32>, vector<5x8xf32> -> vector<5x32xf32>
    %198 = tpu.concatenate %117, %197 in 0 : vector<5x32xf32>, vector<5x32xf32> -> vector<10x32xf32>
    %c0_50 = arith.constant 0 : index
    %c0_51 = arith.constant 0 : index
    %c0_52 = arith.constant 0 : index
    %199 = vector.load %arg6[%c0_50, %c0_51, %c0_52] : memref<2x32x32xbf16, #tpu.memory_space<vmem>>, vector<1x32x32xbf16>
    %200 = vector.shape_cast %199 : vector<1x32x32xbf16> to vector<32x32xbf16>
    %201 = arith.truncf %198 : vector<10x32xf32> to vector<10x32xbf16>
    %cst_53 = arith.constant dense<0.000000e+00> : vector<10x32xf32>
    %202 = tpu.matmul %201, %200, %cst_53 {dimension_numbers = #tpu.dot_dimension_numbers<[1], [0], [0], [1], [0, 0, 1, 1], [], []>} : vector<10x32xbf16>, vector<32x32xbf16>, vector<10x32xf32> -> vector<10x32xf32>
    %203 = arith.addf %0, %202 : vector<10x32xf32>
    %c0_54 = arith.constant 0 : index
    %c0_55 = arith.constant 0 : index
    %c0_56 = arith.constant 0 : index
    %204 = vector.load %arg7[%c0_54, %c0_55, %c0_56] : memref<2x1x32xf32, #tpu.memory_space<vmem>>, vector<1x1x32xf32>
    %205 = vector.shape_cast %204 : vector<1x1x32xf32> to vector<1x32xf32>
    %206 = vector.broadcast %205 : vector<1x32xf32> to vector<10x32xf32>
    %207 = arith.addf %203, %206 : vector<10x32xf32>
    %c0_57 = arith.constant 0 : index
    %c0_58 = arith.constant 0 : index
    %c0_59 = arith.constant 0 : index
    %208 = vector.load %arg8[%c0_57, %c0_58, %c0_59] : memref<2x1x32xf32, #tpu.memory_space<vmem>>, vector<1x1x32xf32>
    %209 = vector.shape_cast %208 : vector<1x1x32xf32> to vector<1x32xf32>
    %c0_60 = arith.constant 0 : index
    %c0_61 = arith.constant 0 : index
    %c0_62 = arith.constant 0 : index
    %210 = vector.load %arg9[%c0_60, %c0_61, %c0_62] : memref<2x1x32xf32, #tpu.memory_space<vmem>>, vector<1x1x32xf32>
    %211 = vector.shape_cast %210 : vector<1x1x32xf32> to vector<1x32xf32>
    %cst_63 = arith.constant dense<0.000000e+00> : vector<10xf32>
    %212 = vector.multi_reduction <add>, %207, %cst_63 [1] : vector<10x32xf32> to vector<10xf32>
    %213 = vector.shape_cast %212 : vector<10xf32> to vector<10x1xf32>
    %cst_64 = arith.constant 3.200000e+01 : f32
    %214 = vector.broadcast %cst_64 : f32 to vector<10x1xf32>
    %215 = arith.divf %213, %214 : vector<10x1xf32>
    %216 = vector.broadcast %215 : vector<10x1xf32> to vector<10x32xf32>
    %217 = arith.subf %207, %216 : vector<10x32xf32>
    %218 = arith.mulf %217, %217 : vector<10x32xf32>
    %cst_65 = arith.constant dense<0.000000e+00> : vector<10xf32>
    %219 = vector.multi_reduction <add>, %218, %cst_65 [1] : vector<10x32xf32> to vector<10xf32>
    %220 = vector.shape_cast %219 : vector<10xf32> to vector<10x1xf32>
    %cst_66 = arith.constant 3.200000e+01 : f32
    %221 = vector.broadcast %cst_66 : f32 to vector<10x1xf32>
    %222 = arith.divf %220, %221 : vector<10x1xf32>
    %223 = vector.broadcast %215 : vector<10x1xf32> to vector<10x32xf32>
    %224 = arith.subf %207, %223 : vector<10x32xf32>
    %cst_67 = arith.constant 9.99999997E-7 : f32
    %225 = vector.broadcast %cst_67 : f32 to vector<10x1xf32>
    %226 = arith.addf %222, %225 : vector<10x1xf32>
    %227 = math.rsqrt %226 : vector<10x1xf32>
    %228 = vector.broadcast %227 : vector<10x1xf32> to vector<10x32xf32>
    %229 = arith.mulf %224, %228 : vector<10x32xf32>
    %230 = vector.broadcast %209 : vector<1x32xf32> to vector<10x32xf32>
    %231 = arith.mulf %229, %230 : vector<10x32xf32>
    %232 = vector.broadcast %211 : vector<1x32xf32> to vector<10x32xf32>
    %233 = arith.addf %231, %232 : vector<10x32xf32>
    %c0_68 = arith.constant 0 : index
    %c0_69 = arith.constant 0 : index
    %c0_70 = arith.constant 0 : index
    %234 = vector.load %arg10[%c0_68, %c0_69, %c0_70] : memref<2x32x128xbf16, #tpu.memory_space<vmem>>, vector<1x32x128xbf16>
    %235 = vector.shape_cast %234 : vector<1x32x128xbf16> to vector<32x128xbf16>
    %236 = arith.truncf %233 : vector<10x32xf32> to vector<10x32xbf16>
    %cst_71 = arith.constant dense<0.000000e+00> : vector<10x128xf32>
    %237 = tpu.matmul %236, %235, %cst_71 {dimension_numbers = #tpu.dot_dimension_numbers<[1], [0], [0], [1], [0, 0, 1, 1], [], []>} : vector<10x32xbf16>, vector<32x128xbf16>, vector<10x128xf32> -> vector<10x128xf32>
    %c0_72 = arith.constant 0 : index
    %c0_73 = arith.constant 0 : index
    %c0_74 = arith.constant 0 : index
    %238 = vector.load %arg11[%c0_72, %c0_73, %c0_74] : memref<2x1x128xf32, #tpu.memory_space<vmem>>, vector<1x1x128xf32>
    %239 = vector.shape_cast %238 : vector<1x1x128xf32> to vector<1x128xf32>
    %240 = vector.broadcast %239 : vector<1x128xf32> to vector<10x128xf32>
    %241 = arith.addf %237, %240 : vector<10x128xf32>
    %cst_75 = arith.constant 5.000000e-01 : f32
    %242 = vector.broadcast %cst_75 : f32 to vector<10x128xf32>
    %243 = arith.mulf %242, %241 : vector<10x128xf32>
    %cst_76 = arith.constant 4.471500e-02 : f32
    %244 = vector.broadcast %cst_76 : f32 to vector<10x128xf32>
    %245 = arith.mulf %244, %241 : vector<10x128xf32>
    %246 = arith.mulf %245, %241 : vector<10x128xf32>
    %247 = arith.mulf %246, %241 : vector<10x128xf32>
    %248 = arith.addf %241, %247 : vector<10x128xf32>
    %cst_77 = arith.constant 0.797884583 : f32
    %249 = vector.broadcast %cst_77 : f32 to vector<10x128xf32>
    %250 = arith.mulf %249, %248 : vector<10x128xf32>
    %251 = math.tanh %250 : vector<10x128xf32>
    %cst_78 = arith.constant 1.000000e+00 : f32
    %252 = vector.broadcast %cst_78 : f32 to vector<10x128xf32>
    %253 = arith.addf %252, %251 : vector<10x128xf32>
    %254 = arith.mulf %243, %253 : vector<10x128xf32>
    %c0_79 = arith.constant 0 : index
    %c0_80 = arith.constant 0 : index
    %c0_81 = arith.constant 0 : index
    %255 = vector.load %arg12[%c0_79, %c0_80, %c0_81] : memref<2x128x32xbf16, #tpu.memory_space<vmem>>, vector<1x128x32xbf16>
    %256 = vector.shape_cast %255 : vector<1x128x32xbf16> to vector<128x32xbf16>
    %257 = arith.truncf %254 : vector<10x128xf32> to vector<10x128xbf16>
    %cst_82 = arith.constant dense<0.000000e+00> : vector<10x32xf32>
    %258 = tpu.matmul %257, %256, %cst_82 {dimension_numbers = #tpu.dot_dimension_numbers<[1], [0], [0], [1], [0, 0, 1, 1], [], []>} : vector<10x128xbf16>, vector<128x32xbf16>, vector<10x32xf32> -> vector<10x32xf32>
    %259 = arith.addf %207, %258 : vector<10x32xf32>
    %c0_83 = arith.constant 0 : index
    %c0_84 = arith.constant 0 : index
    %c0_85 = arith.constant 0 : index
    %260 = vector.load %arg13[%c0_83, %c0_84, %c0_85] : memref<2x1x32xf32, #tpu.memory_space<vmem>>, vector<1x1x32xf32>
    %261 = vector.shape_cast %260 : vector<1x1x32xf32> to vector<1x32xf32>
    %262 = vector.broadcast %261 : vector<1x32xf32> to vector<10x32xf32>
    %263 = arith.addf %259, %262 : vector<10x32xf32>
    %c1 = arith.constant 1 : index
    %c0_86 = arith.constant 0 : index
    %c0_87 = arith.constant 0 : index
    %264 = vector.load %arg2[%c1, %c0_86, %c0_87] : memref<2x1x32xf32, #tpu.memory_space<vmem>>, vector<1x1x32xf32>
    %265 = vector.shape_cast %264 : vector<1x1x32xf32> to vector<1x32xf32>
    %c1_88 = arith.constant 1 : index
    %c0_89 = arith.constant 0 : index
    %c0_90 = arith.constant 0 : index
    %266 = vector.load %arg3[%c1_88, %c0_89, %c0_90] : memref<2x1x32xf32, #tpu.memory_space<vmem>>, vector<1x1x32xf32>
    %267 = vector.shape_cast %266 : vector<1x1x32xf32> to vector<1x32xf32>
    %cst_91 = arith.constant dense<0.000000e+00> : vector<10xf32>
    %268 = vector.multi_reduction <add>, %263, %cst_91 [1] : vector<10x32xf32> to vector<10xf32>
    %269 = vector.shape_cast %268 : vector<10xf32> to vector<10x1xf32>
    %cst_92 = arith.constant 3.200000e+01 : f32
    %270 = vector.broadcast %cst_92 : f32 to vector<10x1xf32>
    %271 = arith.divf %269, %270 : vector<10x1xf32>
    %272 = vector.broadcast %271 : vector<10x1xf32> to vector<10x32xf32>
    %273 = arith.subf %263, %272 : vector<10x32xf32>
    %274 = arith.mulf %273, %273 : vector<10x32xf32>
    %cst_93 = arith.constant dense<0.000000e+00> : vector<10xf32>
    %275 = vector.multi_reduction <add>, %274, %cst_93 [1] : vector<10x32xf32> to vector<10xf32>
    %276 = vector.shape_cast %275 : vector<10xf32> to vector<10x1xf32>
    %cst_94 = arith.constant 3.200000e+01 : f32
    %277 = vector.broadcast %cst_94 : f32 to vector<10x1xf32>
    %278 = arith.divf %276, %277 : vector<10x1xf32>
    %279 = vector.broadcast %271 : vector<10x1xf32> to vector<10x32xf32>
    %280 = arith.subf %263, %279 : vector<10x32xf32>
    %cst_95 = arith.constant 9.99999997E-7 : f32
    %281 = vector.broadcast %cst_95 : f32 to vector<10x1xf32>
    %282 = arith.addf %278, %281 : vector<10x1xf32>
    %283 = math.rsqrt %282 : vector<10x1xf32>
    %284 = vector.broadcast %283 : vector<10x1xf32> to vector<10x32xf32>
    %285 = arith.mulf %280, %284 : vector<10x32xf32>
    %286 = vector.broadcast %265 : vector<1x32xf32> to vector<10x32xf32>
    %287 = arith.mulf %285, %286 : vector<10x32xf32>
    %288 = vector.broadcast %267 : vector<1x32xf32> to vector<10x32xf32>
    %289 = arith.addf %287, %288 : vector<10x32xf32>
    %c1_96 = arith.constant 1 : index
    %c0_97 = arith.constant 0 : index
    %c0_98 = arith.constant 0 : index
    %290 = vector.load %arg4[%c1_96, %c0_97, %c0_98] : memref<2x32x96xbf16, #tpu.memory_space<vmem>>, vector<1x32x96xbf16>
    %291 = vector.shape_cast %290 : vector<1x32x96xbf16> to vector<32x96xbf16>
    %292 = arith.truncf %289 : vector<10x32xf32> to vector<10x32xbf16>
    %cst_99 = arith.constant dense<0.000000e+00> : vector<10x96xf32>
    %293 = tpu.matmul %292, %291, %cst_99 {dimension_numbers = #tpu.dot_dimension_numbers<[1], [0], [0], [1], [0, 0, 1, 1], [], []>} : vector<10x32xbf16>, vector<32x96xbf16>, vector<10x96xf32> -> vector<10x96xf32>
    %c1_100 = arith.constant 1 : index
    %c0_101 = arith.constant 0 : index
    %c0_102 = arith.constant 0 : index
    %294 = vector.load %arg5[%c1_100, %c0_101, %c0_102] : memref<2x1x96xf32, #tpu.memory_space<vmem>>, vector<1x1x96xf32>
    %295 = vector.shape_cast %294 : vector<1x1x96xf32> to vector<1x96xf32>
    %296 = vector.broadcast %295 : vector<1x96xf32> to vector<10x96xf32>
    %297 = arith.addf %293, %296 : vector<10x96xf32>
    %298 = vector.extract_strided_slice %297 {offsets = [0, 0], sizes = [10, 32], strides = [1, 1]} : vector<10x96xf32> to vector<10x32xf32>
    %299 = vector.extract_strided_slice %297 {offsets = [0, 32], sizes = [10, 32], strides = [1, 1]} : vector<10x96xf32> to vector<10x32xf32>
    %300 = vector.extract_strided_slice %297 {offsets = [0, 64], sizes = [10, 32], strides = [1, 1]} : vector<10x96xf32> to vector<10x32xf32>
    %301 = vector.extract_strided_slice %298 {offsets = [0, 0], sizes = [5, 32], strides = [1, 1]} : vector<10x32xf32> to vector<5x32xf32>
    %302 = vector.extract_strided_slice %299 {offsets = [0, 0], sizes = [5, 32], strides = [1, 1]} : vector<10x32xf32> to vector<5x32xf32>
    %303 = vector.extract_strided_slice %300 {offsets = [0, 0], sizes = [5, 32], strides = [1, 1]} : vector<10x32xf32> to vector<5x32xf32>
    %304 = vector.extract_strided_slice %301 {offsets = [0, 0], sizes = [5, 8], strides = [1, 1]} : vector<5x32xf32> to vector<5x8xf32>
    %305 = vector.extract_strided_slice %302 {offsets = [0, 0], sizes = [5, 8], strides = [1, 1]} : vector<5x32xf32> to vector<5x8xf32>
    %306 = arith.truncf %304 : vector<5x8xf32> to vector<5x8xbf16>
    %307 = arith.truncf %305 : vector<5x8xf32> to vector<5x8xbf16>
    %cst_103 = arith.constant dense<0.000000e+00> : vector<5x5xf32>
    %308 = tpu.matmul %306, %307, %cst_103 {dimension_numbers = #tpu.dot_dimension_numbers<[1], [1], [0], [0], [0, 0, 1, 0], [], []>} : vector<5x8xbf16>, vector<5x8xbf16>, vector<5x5xf32> -> vector<5x5xf32>
    %cst_104 = arith.constant dense<0xFF800000> : vector<5xf32>
    %309 = vector.multi_reduction <maximumf>, %308, %cst_104 [1] : vector<5x5xf32> to vector<5xf32>
    %310 = vector.shape_cast %309 : vector<5xf32> to vector<5x1xf32>
    %311 = vector.broadcast %310 : vector<5x1xf32> to vector<5x5xf32>
    %312 = arith.subf %308, %311 : vector<5x5xf32>
    %313 = math.exp %312 : vector<5x5xf32>
    %cst_105 = arith.constant dense<0.000000e+00> : vector<5xf32>
    %314 = vector.multi_reduction <add>, %313, %cst_105 [1] : vector<5x5xf32> to vector<5xf32>
    %315 = vector.shape_cast %314 : vector<5xf32> to vector<5x1xf32>
    %316 = tpu.reciprocal %315 {approx = true} : vector<5x1xf32> -> vector<5x1xf32>
    %317 = vector.broadcast %316 : vector<5x1xf32> to vector<5x5xf32>
    %318 = arith.mulf %313, %317 : vector<5x5xf32>
    %319 = vector.extract_strided_slice %303 {offsets = [0, 0], sizes = [5, 8], strides = [1, 1]} : vector<5x32xf32> to vector<5x8xf32>
    %320 = arith.truncf %318 : vector<5x5xf32> to vector<5x5xbf16>
    %321 = arith.truncf %319 : vector<5x8xf32> to vector<5x8xbf16>
    %cst_106 = arith.constant dense<0.000000e+00> : vector<5x8xf32>
    %322 = tpu.matmul %320, %321, %cst_106 {dimension_numbers = #tpu.dot_dimension_numbers<[1], [0], [0], [1], [0, 0, 1, 1], [], []>} : vector<5x5xbf16>, vector<5x8xbf16>, vector<5x8xf32> -> vector<5x8xf32>
    %323 = vector.extract_strided_slice %301 {offsets = [0, 8], sizes = [5, 8], strides = [1, 1]} : vector<5x32xf32> to vector<5x8xf32>
    %324 = vector.extract_strided_slice %302 {offsets = [0, 8], sizes = [5, 8], strides = [1, 1]} : vector<5x32xf32> to vector<5x8xf32>
    %325 = arith.truncf %323 : vector<5x8xf32> to vector<5x8xbf16>
    %326 = arith.truncf %324 : vector<5x8xf32> to vector<5x8xbf16>
    %cst_107 = arith.constant dense<0.000000e+00> : vector<5x5xf32>
    %327 = tpu.matmul %325, %326, %cst_107 {dimension_numbers = #tpu.dot_dimension_numbers<[1], [1], [0], [0], [0, 0, 1, 0], [], []>} : vector<5x8xbf16>, vector<5x8xbf16>, vector<5x5xf32> -> vector<5x5xf32>
    %cst_108 = arith.constant dense<0xFF800000> : vector<5xf32>
    %328 = vector.multi_reduction <maximumf>, %327, %cst_108 [1] : vector<5x5xf32> to vector<5xf32>
    %329 = vector.shape_cast %328 : vector<5xf32> to vector<5x1xf32>
    %330 = vector.broadcast %329 : vector<5x1xf32> to vector<5x5xf32>
    %331 = arith.subf %327, %330 : vector<5x5xf32>
    %332 = math.exp %331 : vector<5x5xf32>
    %cst_109 = arith.constant dense<0.000000e+00> : vector<5xf32>
    %333 = vector.multi_reduction <add>, %332, %cst_109 [1] : vector<5x5xf32> to vector<5xf32>
    %334 = vector.shape_cast %333 : vector<5xf32> to vector<5x1xf32>
    %335 = tpu.reciprocal %334 {approx = true} : vector<5x1xf32> -> vector<5x1xf32>
    %336 = vector.broadcast %335 : vector<5x1xf32> to vector<5x5xf32>
    %337 = arith.mulf %332, %336 : vector<5x5xf32>
    %338 = vector.extract_strided_slice %303 {offsets = [0, 8], sizes = [5, 8], strides = [1, 1]} : vector<5x32xf32> to vector<5x8xf32>
    %339 = arith.truncf %337 : vector<5x5xf32> to vector<5x5xbf16>
    %340 = arith.truncf %338 : vector<5x8xf32> to vector<5x8xbf16>
    %cst_110 = arith.constant dense<0.000000e+00> : vector<5x8xf32>
    %341 = tpu.matmul %339, %340, %cst_110 {dimension_numbers = #tpu.dot_dimension_numbers<[1], [0], [0], [1], [0, 0, 1, 1], [], []>} : vector<5x5xbf16>, vector<5x8xbf16>, vector<5x8xf32> -> vector<5x8xf32>
    %342 = vector.extract_strided_slice %301 {offsets = [0, 16], sizes = [5, 8], strides = [1, 1]} : vector<5x32xf32> to vector<5x8xf32>
    %343 = vector.extract_strided_slice %302 {offsets = [0, 16], sizes = [5, 8], strides = [1, 1]} : vector<5x32xf32> to vector<5x8xf32>
    %344 = arith.truncf %342 : vector<5x8xf32> to vector<5x8xbf16>
    %345 = arith.truncf %343 : vector<5x8xf32> to vector<5x8xbf16>
    %cst_111 = arith.constant dense<0.000000e+00> : vector<5x5xf32>
    %346 = tpu.matmul %344, %345, %cst_111 {dimension_numbers = #tpu.dot_dimension_numbers<[1], [1], [0], [0], [0, 0, 1, 0], [], []>} : vector<5x8xbf16>, vector<5x8xbf16>, vector<5x5xf32> -> vector<5x5xf32>
    %cst_112 = arith.constant dense<0xFF800000> : vector<5xf32>
    %347 = vector.multi_reduction <maximumf>, %346, %cst_112 [1] : vector<5x5xf32> to vector<5xf32>
    %348 = vector.shape_cast %347 : vector<5xf32> to vector<5x1xf32>
    %349 = vector.broadcast %348 : vector<5x1xf32> to vector<5x5xf32>
    %350 = arith.subf %346, %349 : vector<5x5xf32>
    %351 = math.exp %350 : vector<5x5xf32>
    %cst_113 = arith.constant dense<0.000000e+00> : vector<5xf32>
    %352 = vector.multi_reduction <add>, %351, %cst_113 [1] : vector<5x5xf32> to vector<5xf32>
    %353 = vector.shape_cast %352 : vector<5xf32> to vector<5x1xf32>
    %354 = tpu.reciprocal %353 {approx = true} : vector<5x1xf32> -> vector<5x1xf32>
    %355 = vector.broadcast %354 : vector<5x1xf32> to vector<5x5xf32>
    %356 = arith.mulf %351, %355 : vector<5x5xf32>
    %357 = vector.extract_strided_slice %303 {offsets = [0, 16], sizes = [5, 8], strides = [1, 1]} : vector<5x32xf32> to vector<5x8xf32>
    %358 = arith.truncf %356 : vector<5x5xf32> to vector<5x5xbf16>
    %359 = arith.truncf %357 : vector<5x8xf32> to vector<5x8xbf16>
    %cst_114 = arith.constant dense<0.000000e+00> : vector<5x8xf32>
    %360 = tpu.matmul %358, %359, %cst_114 {dimension_numbers = #tpu.dot_dimension_numbers<[1], [0], [0], [1], [0, 0, 1, 1], [], []>} : vector<5x5xbf16>, vector<5x8xbf16>, vector<5x8xf32> -> vector<5x8xf32>
    %361 = vector.extract_strided_slice %301 {offsets = [0, 24], sizes = [5, 8], strides = [1, 1]} : vector<5x32xf32> to vector<5x8xf32>
    %362 = vector.extract_strided_slice %302 {offsets = [0, 24], sizes = [5, 8], strides = [1, 1]} : vector<5x32xf32> to vector<5x8xf32>
    %363 = arith.truncf %361 : vector<5x8xf32> to vector<5x8xbf16>
    %364 = arith.truncf %362 : vector<5x8xf32> to vector<5x8xbf16>
    %cst_115 = arith.constant dense<0.000000e+00> : vector<5x5xf32>
    %365 = tpu.matmul %363, %364, %cst_115 {dimension_numbers = #tpu.dot_dimension_numbers<[1], [1], [0], [0], [0, 0, 1, 0], [], []>} : vector<5x8xbf16>, vector<5x8xbf16>, vector<5x5xf32> -> vector<5x5xf32>
    %cst_116 = arith.constant dense<0xFF800000> : vector<5xf32>
    %366 = vector.multi_reduction <maximumf>, %365, %cst_116 [1] : vector<5x5xf32> to vector<5xf32>
    %367 = vector.shape_cast %366 : vector<5xf32> to vector<5x1xf32>
    %368 = vector.broadcast %367 : vector<5x1xf32> to vector<5x5xf32>
    %369 = arith.subf %365, %368 : vector<5x5xf32>
    %370 = math.exp %369 : vector<5x5xf32>
    %cst_117 = arith.constant dense<0.000000e+00> : vector<5xf32>
    %371 = vector.multi_reduction <add>, %370, %cst_117 [1] : vector<5x5xf32> to vector<5xf32>
    %372 = vector.shape_cast %371 : vector<5xf32> to vector<5x1xf32>
    %373 = tpu.reciprocal %372 {approx = true} : vector<5x1xf32> -> vector<5x1xf32>
    %374 = vector.broadcast %373 : vector<5x1xf32> to vector<5x5xf32>
    %375 = arith.mulf %370, %374 : vector<5x5xf32>
    %376 = vector.extract_strided_slice %303 {offsets = [0, 24], sizes = [5, 8], strides = [1, 1]} : vector<5x32xf32> to vector<5x8xf32>
    %377 = arith.truncf %375 : vector<5x5xf32> to vector<5x5xbf16>
    %378 = arith.truncf %376 : vector<5x8xf32> to vector<5x8xbf16>
    %cst_118 = arith.constant dense<0.000000e+00> : vector<5x8xf32>
    %379 = tpu.matmul %377, %378, %cst_118 {dimension_numbers = #tpu.dot_dimension_numbers<[1], [0], [0], [1], [0, 0, 1, 1], [], []>} : vector<5x5xbf16>, vector<5x8xbf16>, vector<5x8xf32> -> vector<5x8xf32>
    %380 = tpu.concatenate %322, %341, %360, %379 in 1 : vector<5x8xf32>, vector<5x8xf32>, vector<5x8xf32>, vector<5x8xf32> -> vector<5x32xf32>
    %381 = vector.extract_strided_slice %298 {offsets = [5, 0], sizes = [5, 32], strides = [1, 1]} : vector<10x32xf32> to vector<5x32xf32>
    %382 = vector.extract_strided_slice %299 {offsets = [5, 0], sizes = [5, 32], strides = [1, 1]} : vector<10x32xf32> to vector<5x32xf32>
    %383 = vector.extract_strided_slice %300 {offsets = [5, 0], sizes = [5, 32], strides = [1, 1]} : vector<10x32xf32> to vector<5x32xf32>
    %384 = vector.extract_strided_slice %381 {offsets = [0, 0], sizes = [5, 8], strides = [1, 1]} : vector<5x32xf32> to vector<5x8xf32>
    %385 = vector.extract_strided_slice %382 {offsets = [0, 0], sizes = [5, 8], strides = [1, 1]} : vector<5x32xf32> to vector<5x8xf32>
    %386 = arith.truncf %384 : vector<5x8xf32> to vector<5x8xbf16>
    %387 = arith.truncf %385 : vector<5x8xf32> to vector<5x8xbf16>
    %cst_119 = arith.constant dense<0.000000e+00> : vector<5x5xf32>
    %388 = tpu.matmul %386, %387, %cst_119 {dimension_numbers = #tpu.dot_dimension_numbers<[1], [1], [0], [0], [0, 0, 1, 0], [], []>} : vector<5x8xbf16>, vector<5x8xbf16>, vector<5x5xf32> -> vector<5x5xf32>
    %cst_120 = arith.constant dense<0xFF800000> : vector<5xf32>
    %389 = vector.multi_reduction <maximumf>, %388, %cst_120 [1] : vector<5x5xf32> to vector<5xf32>
    %390 = vector.shape_cast %389 : vector<5xf32> to vector<5x1xf32>
    %391 = vector.broadcast %390 : vector<5x1xf32> to vector<5x5xf32>
    %392 = arith.subf %388, %391 : vector<5x5xf32>
    %393 = math.exp %392 : vector<5x5xf32>
    %cst_121 = arith.constant dense<0.000000e+00> : vector<5xf32>
    %394 = vector.multi_reduction <add>, %393, %cst_121 [1] : vector<5x5xf32> to vector<5xf32>
    %395 = vector.shape_cast %394 : vector<5xf32> to vector<5x1xf32>
    %396 = tpu.reciprocal %395 {approx = true} : vector<5x1xf32> -> vector<5x1xf32>
    %397 = vector.broadcast %396 : vector<5x1xf32> to vector<5x5xf32>
    %398 = arith.mulf %393, %397 : vector<5x5xf32>
    %399 = vector.extract_strided_slice %383 {offsets = [0, 0], sizes = [5, 8], strides = [1, 1]} : vector<5x32xf32> to vector<5x8xf32>
    %400 = arith.truncf %398 : vector<5x5xf32> to vector<5x5xbf16>
    %401 = arith.truncf %399 : vector<5x8xf32> to vector<5x8xbf16>
    %cst_122 = arith.constant dense<0.000000e+00> : vector<5x8xf32>
    %402 = tpu.matmul %400, %401, %cst_122 {dimension_numbers = #tpu.dot_dimension_numbers<[1], [0], [0], [1], [0, 0, 1, 1], [], []>} : vector<5x5xbf16>, vector<5x8xbf16>, vector<5x8xf32> -> vector<5x8xf32>
    %403 = vector.extract_strided_slice %381 {offsets = [0, 8], sizes = [5, 8], strides = [1, 1]} : vector<5x32xf32> to vector<5x8xf32>
    %404 = vector.extract_strided_slice %382 {offsets = [0, 8], sizes = [5, 8], strides = [1, 1]} : vector<5x32xf32> to vector<5x8xf32>
    %405 = arith.truncf %403 : vector<5x8xf32> to vector<5x8xbf16>
    %406 = arith.truncf %404 : vector<5x8xf32> to vector<5x8xbf16>
    %cst_123 = arith.constant dense<0.000000e+00> : vector<5x5xf32>
    %407 = tpu.matmul %405, %406, %cst_123 {dimension_numbers = #tpu.dot_dimension_numbers<[1], [1], [0], [0], [0, 0, 1, 0], [], []>} : vector<5x8xbf16>, vector<5x8xbf16>, vector<5x5xf32> -> vector<5x5xf32>
    %cst_124 = arith.constant dense<0xFF800000> : vector<5xf32>
    %408 = vector.multi_reduction <maximumf>, %407, %cst_124 [1] : vector<5x5xf32> to vector<5xf32>
    %409 = vector.shape_cast %408 : vector<5xf32> to vector<5x1xf32>
    %410 = vector.broadcast %409 : vector<5x1xf32> to vector<5x5xf32>
    %411 = arith.subf %407, %410 : vector<5x5xf32>
    %412 = math.exp %411 : vector<5x5xf32>
    %cst_125 = arith.constant dense<0.000000e+00> : vector<5xf32>
    %413 = vector.multi_reduction <add>, %412, %cst_125 [1] : vector<5x5xf32> to vector<5xf32>
    %414 = vector.shape_cast %413 : vector<5xf32> to vector<5x1xf32>
    %415 = tpu.reciprocal %414 {approx = true} : vector<5x1xf32> -> vector<5x1xf32>
    %416 = vector.broadcast %415 : vector<5x1xf32> to vector<5x5xf32>
    %417 = arith.mulf %412, %416 : vector<5x5xf32>
    %418 = vector.extract_strided_slice %383 {offsets = [0, 8], sizes = [5, 8], strides = [1, 1]} : vector<5x32xf32> to vector<5x8xf32>
    %419 = arith.truncf %417 : vector<5x5xf32> to vector<5x5xbf16>
    %420 = arith.truncf %418 : vector<5x8xf32> to vector<5x8xbf16>
    %cst_126 = arith.constant dense<0.000000e+00> : vector<5x8xf32>
    %421 = tpu.matmul %419, %420, %cst_126 {dimension_numbers = #tpu.dot_dimension_numbers<[1], [0], [0], [1], [0, 0, 1, 1], [], []>} : vector<5x5xbf16>, vector<5x8xbf16>, vector<5x8xf32> -> vector<5x8xf32>
    %422 = vector.extract_strided_slice %381 {offsets = [0, 16], sizes = [5, 8], strides = [1, 1]} : vector<5x32xf32> to vector<5x8xf32>
    %423 = vector.extract_strided_slice %382 {offsets = [0, 16], sizes = [5, 8], strides = [1, 1]} : vector<5x32xf32> to vector<5x8xf32>
    %424 = arith.truncf %422 : vector<5x8xf32> to vector<5x8xbf16>
    %425 = arith.truncf %423 : vector<5x8xf32> to vector<5x8xbf16>
    %cst_127 = arith.constant dense<0.000000e+00> : vector<5x5xf32>
    %426 = tpu.matmul %424, %425, %cst_127 {dimension_numbers = #tpu.dot_dimension_numbers<[1], [1], [0], [0], [0, 0, 1, 0], [], []>} : vector<5x8xbf16>, vector<5x8xbf16>, vector<5x5xf32> -> vector<5x5xf32>
    %cst_128 = arith.constant dense<0xFF800000> : vector<5xf32>
    %427 = vector.multi_reduction <maximumf>, %426, %cst_128 [1] : vector<5x5xf32> to vector<5xf32>
    %428 = vector.shape_cast %427 : vector<5xf32> to vector<5x1xf32>
    %429 = vector.broadcast %428 : vector<5x1xf32> to vector<5x5xf32>
    %430 = arith.subf %426, %429 : vector<5x5xf32>
    %431 = math.exp %430 : vector<5x5xf32>
    %cst_129 = arith.constant dense<0.000000e+00> : vector<5xf32>
    %432 = vector.multi_reduction <add>, %431, %cst_129 [1] : vector<5x5xf32> to vector<5xf32>
    %433 = vector.shape_cast %432 : vector<5xf32> to vector<5x1xf32>
    %434 = tpu.reciprocal %433 {approx = true} : vector<5x1xf32> -> vector<5x1xf32>
    %435 = vector.broadcast %434 : vector<5x1xf32> to vector<5x5xf32>
    %436 = arith.mulf %431, %435 : vector<5x5xf32>
    %437 = vector.extract_strided_slice %383 {offsets = [0, 16], sizes = [5, 8], strides = [1, 1]} : vector<5x32xf32> to vector<5x8xf32>
    %438 = arith.truncf %436 : vector<5x5xf32> to vector<5x5xbf16>
    %439 = arith.truncf %437 : vector<5x8xf32> to vector<5x8xbf16>
    %cst_130 = arith.constant dense<0.000000e+00> : vector<5x8xf32>
    %440 = tpu.matmul %438, %439, %cst_130 {dimension_numbers = #tpu.dot_dimension_numbers<[1], [0], [0], [1], [0, 0, 1, 1], [], []>} : vector<5x5xbf16>, vector<5x8xbf16>, vector<5x8xf32> -> vector<5x8xf32>
    %441 = vector.extract_strided_slice %381 {offsets = [0, 24], sizes = [5, 8], strides = [1, 1]} : vector<5x32xf32> to vector<5x8xf32>
    %442 = vector.extract_strided_slice %382 {offsets = [0, 24], sizes = [5, 8], strides = [1, 1]} : vector<5x32xf32> to vector<5x8xf32>
    %443 = arith.truncf %441 : vector<5x8xf32> to vector<5x8xbf16>
    %444 = arith.truncf %442 : vector<5x8xf32> to vector<5x8xbf16>
    %cst_131 = arith.constant dense<0.000000e+00> : vector<5x5xf32>
    %445 = tpu.matmul %443, %444, %cst_131 {dimension_numbers = #tpu.dot_dimension_numbers<[1], [1], [0], [0], [0, 0, 1, 0], [], []>} : vector<5x8xbf16>, vector<5x8xbf16>, vector<5x5xf32> -> vector<5x5xf32>
    %cst_132 = arith.constant dense<0xFF800000> : vector<5xf32>
    %446 = vector.multi_reduction <maximumf>, %445, %cst_132 [1] : vector<5x5xf32> to vector<5xf32>
    %447 = vector.shape_cast %446 : vector<5xf32> to vector<5x1xf32>
    %448 = vector.broadcast %447 : vector<5x1xf32> to vector<5x5xf32>
    %449 = arith.subf %445, %448 : vector<5x5xf32>
    %450 = math.exp %449 : vector<5x5xf32>
    %cst_133 = arith.constant dense<0.000000e+00> : vector<5xf32>
    %451 = vector.multi_reduction <add>, %450, %cst_133 [1] : vector<5x5xf32> to vector<5xf32>
    %452 = vector.shape_cast %451 : vector<5xf32> to vector<5x1xf32>
    %453 = tpu.reciprocal %452 {approx = true} : vector<5x1xf32> -> vector<5x1xf32>
    %454 = vector.broadcast %453 : vector<5x1xf32> to vector<5x5xf32>
    %455 = arith.mulf %450, %454 : vector<5x5xf32>
    %456 = vector.extract_strided_slice %383 {offsets = [0, 24], sizes = [5, 8], strides = [1, 1]} : vector<5x32xf32> to vector<5x8xf32>
    %457 = arith.truncf %455 : vector<5x5xf32> to vector<5x5xbf16>
    %458 = arith.truncf %456 : vector<5x8xf32> to vector<5x8xbf16>
    %cst_134 = arith.constant dense<0.000000e+00> : vector<5x8xf32>
    %459 = tpu.matmul %457, %458, %cst_134 {dimension_numbers = #tpu.dot_dimension_numbers<[1], [0], [0], [1], [0, 0, 1, 1], [], []>} : vector<5x5xbf16>, vector<5x8xbf16>, vector<5x8xf32> -> vector<5x8xf32>
    %460 = tpu.concatenate %402, %421, %440, %459 in 1 : vector<5x8xf32>, vector<5x8xf32>, vector<5x8xf32>, vector<5x8xf32> -> vector<5x32xf32>
    %461 = tpu.concatenate %380, %460 in 0 : vector<5x32xf32>, vector<5x32xf32> -> vector<10x32xf32>
    %c1_135 = arith.constant 1 : index
    %c0_136 = arith.constant 0 : index
    %c0_137 = arith.constant 0 : index
    %462 = vector.load %arg6[%c1_135, %c0_136, %c0_137] : memref<2x32x32xbf16, #tpu.memory_space<vmem>>, vector<1x32x32xbf16>
    %463 = vector.shape_cast %462 : vector<1x32x32xbf16> to vector<32x32xbf16>
    %464 = arith.truncf %461 : vector<10x32xf32> to vector<10x32xbf16>
    %cst_138 = arith.constant dense<0.000000e+00> : vector<10x32xf32>
    %465 = tpu.matmul %464, %463, %cst_138 {dimension_numbers = #tpu.dot_dimension_numbers<[1], [0], [0], [1], [0, 0, 1, 1], [], []>} : vector<10x32xbf16>, vector<32x32xbf16>, vector<10x32xf32> -> vector<10x32xf32>
    %466 = arith.addf %263, %465 : vector<10x32xf32>
    %c1_139 = arith.constant 1 : index
    %c0_140 = arith.constant 0 : index
    %c0_141 = arith.constant 0 : index
    %467 = vector.load %arg7[%c1_139, %c0_140, %c0_141] : memref<2x1x32xf32, #tpu.memory_space<vmem>>, vector<1x1x32xf32>
    %468 = vector.shape_cast %467 : vector<1x1x32xf32> to vector<1x32xf32>
    %469 = vector.broadcast %468 : vector<1x32xf32> to vector<10x32xf32>
    %470 = arith.addf %466, %469 : vector<10x32xf32>
    %c1_142 = arith.constant 1 : index
    %c0_143 = arith.constant 0 : index
    %c0_144 = arith.constant 0 : index
    %471 = vector.load %arg8[%c1_142, %c0_143, %c0_144] : memref<2x1x32xf32, #tpu.memory_space<vmem>>, vector<1x1x32xf32>
    %472 = vector.shape_cast %471 : vector<1x1x32xf32> to vector<1x32xf32>
    %c1_145 = arith.constant 1 : index
    %c0_146 = arith.constant 0 : index
    %c0_147 = arith.constant 0 : index
    %473 = vector.load %arg9[%c1_145, %c0_146, %c0_147] : memref<2x1x32xf32, #tpu.memory_space<vmem>>, vector<1x1x32xf32>
    %474 = vector.shape_cast %473 : vector<1x1x32xf32> to vector<1x32xf32>
    %cst_148 = arith.constant dense<0.000000e+00> : vector<10xf32>
    %475 = vector.multi_reduction <add>, %470, %cst_148 [1] : vector<10x32xf32> to vector<10xf32>
    %476 = vector.shape_cast %475 : vector<10xf32> to vector<10x1xf32>
    %cst_149 = arith.constant 3.200000e+01 : f32
    %477 = vector.broadcast %cst_149 : f32 to vector<10x1xf32>
    %478 = arith.divf %476, %477 : vector<10x1xf32>
    %479 = vector.broadcast %478 : vector<10x1xf32> to vector<10x32xf32>
    %480 = arith.subf %470, %479 : vector<10x32xf32>
    %481 = arith.mulf %480, %480 : vector<10x32xf32>
    %cst_150 = arith.constant dense<0.000000e+00> : vector<10xf32>
    %482 = vector.multi_reduction <add>, %481, %cst_150 [1] : vector<10x32xf32> to vector<10xf32>
    %483 = vector.shape_cast %482 : vector<10xf32> to vector<10x1xf32>
    %cst_151 = arith.constant 3.200000e+01 : f32
    %484 = vector.broadcast %cst_151 : f32 to vector<10x1xf32>
    %485 = arith.divf %483, %484 : vector<10x1xf32>
    %486 = vector.broadcast %478 : vector<10x1xf32> to vector<10x32xf32>
    %487 = arith.subf %470, %486 : vector<10x32xf32>
    %cst_152 = arith.constant 9.99999997E-7 : f32
    %488 = vector.broadcast %cst_152 : f32 to vector<10x1xf32>
    %489 = arith.addf %485, %488 : vector<10x1xf32>
    %490 = math.rsqrt %489 : vector<10x1xf32>
    %491 = vector.broadcast %490 : vector<10x1xf32> to vector<10x32xf32>
    %492 = arith.mulf %487, %491 : vector<10x32xf32>
    %493 = vector.broadcast %472 : vector<1x32xf32> to vector<10x32xf32>
    %494 = arith.mulf %492, %493 : vector<10x32xf32>
    %495 = vector.broadcast %474 : vector<1x32xf32> to vector<10x32xf32>
    %496 = arith.addf %494, %495 : vector<10x32xf32>
    %c1_153 = arith.constant 1 : index
    %c0_154 = arith.constant 0 : index
    %c0_155 = arith.constant 0 : index
    %497 = vector.load %arg10[%c1_153, %c0_154, %c0_155] : memref<2x32x128xbf16, #tpu.memory_space<vmem>>, vector<1x32x128xbf16>
    %498 = vector.shape_cast %497 : vector<1x32x128xbf16> to vector<32x128xbf16>
    %499 = arith.truncf %496 : vector<10x32xf32> to vector<10x32xbf16>
    %cst_156 = arith.constant dense<0.000000e+00> : vector<10x128xf32>
    %500 = tpu.matmul %499, %498, %cst_156 {dimension_numbers = #tpu.dot_dimension_numbers<[1], [0], [0], [1], [0, 0, 1, 1], [], []>} : vector<10x32xbf16>, vector<32x128xbf16>, vector<10x128xf32> -> vector<10x128xf32>
    %c1_157 = arith.constant 1 : index
    %c0_158 = arith.constant 0 : index
    %c0_159 = arith.constant 0 : index
    %501 = vector.load %arg11[%c1_157, %c0_158, %c0_159] : memref<2x1x128xf32, #tpu.memory_space<vmem>>, vector<1x1x128xf32>
    %502 = vector.shape_cast %501 : vector<1x1x128xf32> to vector<1x128xf32>
    %503 = vector.broadcast %502 : vector<1x128xf32> to vector<10x128xf32>
    %504 = arith.addf %500, %503 : vector<10x128xf32>
    %cst_160 = arith.constant 5.000000e-01 : f32
    %505 = vector.broadcast %cst_160 : f32 to vector<10x128xf32>
    %506 = arith.mulf %505, %504 : vector<10x128xf32>
    %cst_161 = arith.constant 4.471500e-02 : f32
    %507 = vector.broadcast %cst_161 : f32 to vector<10x128xf32>
    %508 = arith.mulf %507, %504 : vector<10x128xf32>
    %509 = arith.mulf %508, %504 : vector<10x128xf32>
    %510 = arith.mulf %509, %504 : vector<10x128xf32>
    %511 = arith.addf %504, %510 : vector<10x128xf32>
    %cst_162 = arith.constant 0.797884583 : f32
    %512 = vector.broadcast %cst_162 : f32 to vector<10x128xf32>
    %513 = arith.mulf %512, %511 : vector<10x128xf32>
    %514 = math.tanh %513 : vector<10x128xf32>
    %cst_163 = arith.constant 1.000000e+00 : f32
    %515 = vector.broadcast %cst_163 : f32 to vector<10x128xf32>
    %516 = arith.addf %515, %514 : vector<10x128xf32>
    %517 = arith.mulf %506, %516 : vector<10x128xf32>
    %c1_164 = arith.constant 1 : index
    %c0_165 = arith.constant 0 : index
    %c0_166 = arith.constant 0 : index
    %518 = vector.load %arg12[%c1_164, %c0_165, %c0_166] : memref<2x128x32xbf16, #tpu.memory_space<vmem>>, vector<1x128x32xbf16>
    %519 = vector.shape_cast %518 : vector<1x128x32xbf16> to vector<128x32xbf16>
    %520 = arith.truncf %517 : vector<10x128xf32> to vector<10x128xbf16>
    %cst_167 = arith.constant dense<0.000000e+00> : vector<10x32xf32>
    %521 = tpu.matmul %520, %519, %cst_167 {dimension_numbers = #tpu.dot_dimension_numbers<[1], [0], [0], [1], [0, 0, 1, 1], [], []>} : vector<10x128xbf16>, vector<128x32xbf16>, vector<10x32xf32> -> vector<10x32xf32>
    %522 = arith.addf %470, %521 : vector<10x32xf32>
    %c1_168 = arith.constant 1 : index
    %c0_169 = arith.constant 0 : index
    %c0_170 = arith.constant 0 : index
    %523 = vector.load %arg13[%c1_168, %c0_169, %c0_170] : memref<2x1x32xf32, #tpu.memory_space<vmem>>, vector<1x1x32xf32>
    %524 = vector.shape_cast %523 : vector<1x1x32xf32> to vector<1x32xf32>
    %525 = vector.broadcast %524 : vector<1x32xf32> to vector<10x32xf32>
    %526 = arith.addf %522, %525 : vector<10x32xf32>
    %c0_171 = arith.constant 0 : index
    %c0_172 = arith.constant 0 : index
    %527 = vector.load %arg14[%c0_171, %c0_172] : memref<1x32xf32, #tpu.memory_space<vmem>>, vector<1x32xf32>
    %c0_173 = arith.constant 0 : index
    %c0_174 = arith.constant 0 : index
    %528 = vector.load %arg15[%c0_173, %c0_174] : memref<1x32xf32, #tpu.memory_space<vmem>>, vector<1x32xf32>
    %cst_175 = arith.constant dense<0.000000e+00> : vector<10xf32>
    %529 = vector.multi_reduction <add>, %526, %cst_175 [1] : vector<10x32xf32> to vector<10xf32>
    %530 = vector.shape_cast %529 : vector<10xf32> to vector<10x1xf32>
    %cst_176 = arith.constant 3.200000e+01 : f32
    %531 = vector.broadcast %cst_176 : f32 to vector<10x1xf32>
    %532 = arith.divf %530, %531 : vector<10x1xf32>
    %533 = vector.broadcast %532 : vector<10x1xf32> to vector<10x32xf32>
    %534 = arith.subf %526, %533 : vector<10x32xf32>
    %535 = arith.mulf %534, %534 : vector<10x32xf32>
    %cst_177 = arith.constant dense<0.000000e+00> : vector<10xf32>
    %536 = vector.multi_reduction <add>, %535, %cst_177 [1] : vector<10x32xf32> to vector<10xf32>
    %537 = vector.shape_cast %536 : vector<10xf32> to vector<10x1xf32>
    %cst_178 = arith.constant 3.200000e+01 : f32
    %538 = vector.broadcast %cst_178 : f32 to vector<10x1xf32>
    %539 = arith.divf %537, %538 : vector<10x1xf32>
    %540 = vector.broadcast %532 : vector<10x1xf32> to vector<10x32xf32>
    %541 = arith.subf %526, %540 : vector<10x32xf32>
    %cst_179 = arith.constant 9.99999997E-7 : f32
    %542 = vector.broadcast %cst_179 : f32 to vector<10x1xf32>
    %543 = arith.addf %539, %542 : vector<10x1xf32>
    %544 = math.rsqrt %543 : vector<10x1xf32>
    %545 = vector.broadcast %544 : vector<10x1xf32> to vector<10x32xf32>
    %546 = arith.mulf %541, %545 : vector<10x32xf32>
    %547 = vector.broadcast %527 : vector<1x32xf32> to vector<10x32xf32>
    %548 = arith.mulf %546, %547 : vector<10x32xf32>
    %549 = vector.broadcast %528 : vector<1x32xf32> to vector<10x32xf32>
    %550 = arith.addf %548, %549 : vector<10x32xf32>
    %c0_180 = arith.constant 0 : index
    %c0_181 = arith.constant 0 : index
    %551 = vector.load %arg16[%c0_180, %c0_181] : memref<10x32xf32, #tpu.memory_space<vmem>>, vector<10x32xf32>
    tpu.vector_store %arg16[%c0_180, %c0_181], %550 {strides = array<i32>} : memref<10x32xf32, #tpu.memory_space<vmem>>, vector<10x32xf32>,
    return
  }
  func.func @transform_0(%arg0: i32) -> (i32, i32) {
    %c0_i32 = arith.constant 0 : i32
    %c0_i32_0 = arith.constant 0 : i32
    %c0_i32_1 = arith.constant 0 : i32
    return %c0_i32, %c0_i32_0 : i32, i32
  }
  func.func @transform_1(%arg0: i32) -> (i32, i32, i32) {
    %c0_i32 = arith.constant 0 : i32
    %c0_i32_0 = arith.constant 0 : i32
    %c0_i32_1 = arith.constant 0 : i32
    %c0_i32_2 = arith.constant 0 : i32
    return %c0_i32, %c0_i32_0, %c0_i32_1 : i32, i32, i32
  }
  func.func @transform_2(%arg0: i32) -> (i32, i32, i32) {
    %c0_i32 = arith.constant 0 : i32
    %c0_i32_0 = arith.constant 0 : i32
    %c0_i32_1 = arith.constant 0 : i32
    %c0_i32_2 = arith.constant 0 : i32
    return %c0_i32, %c0_i32_0, %c0_i32_1 : i32, i32, i32
  }
  func.func @transform_3(%arg0: i32) -> (i32, i32, i32) {
    %c0_i32 = arith.constant 0 : i32
    %c0_i32_0 = arith.constant 0 : i32
    %c0_i32_1 = arith.constant 0 : i32
    %c0_i32_2 = arith.constant 0 : i32
    return %c0_i32, %c0_i32_0, %c0_i32_1 : i32, i32, i32
  }
  func.func @transform_4(%arg0: i32) -> (i32, i32, i32) {
    %c0_i32 = arith.constant 0 : i32
    %c0_i32_0 = arith.constant 0 : i32
    %c0_i32_1 = arith.constant 0 : i32
    %c0_i32_2 = arith.constant 0 : i32
    return %c0_i32, %c0_i32_0, %c0_i32_1 : i32, i32, i32
  }
  func.func @transform_5(%arg0: i32) -> (i32, i32, i32) {
    %c0_i32 = arith.constant 0 : i32
    %c0_i32_0 = arith.constant 0 : i32
    %c0_i32_1 = arith.constant 0 : i32
    %c0_i32_2 = arith.constant 0 : i32
    return %c0_i32, %c0_i32_0, %c0_i32_1 : i32, i32, i32
  }
  func.func @transform_6(%arg0: i32) -> (i32, i32, i32) {
    %c0_i32 = arith.constant 0 : i32
    %c0_i32_0 = arith.constant 0 : i32
    %c0_i32_1 = arith.constant 0 : i32
    %c0_i32_2 = arith.constant 0 : i32
    return %c0_i32, %c0_i32_0, %c0_i32_1 : i32, i32, i32
  }
  func.func @transform_7(%arg0: i32) -> (i32, i32, i32) {
    %c0_i32 = arith.constant 0 : i32
    %c0_i32_0 = arith.constant 0 : i32
    %c0_i32_1 = arith.constant 0 : i32
    %c0_i32_2 = arith.constant 0 : i32
    return %c0_i32, %c0_i32_0, %c0_i32_1 : i32, i32, i32
  }
  func.func @transform_8(%arg0: i32) -> (i32, i32, i32) {
    %c0_i32 = arith.constant 0 : i32
    %c0_i32_0 = arith.constant 0 : i32
    %c0_i32_1 = arith.constant 0 : i32
    %c0_i32_2 = arith.constant 0 : i32
    return %c0_i32, %c0_i32_0, %c0_i32_1 : i32, i32, i32
  }
  func.func @transform_9(%arg0: i32) -> (i32, i32, i32) {
    %c0_i32 = arith.constant 0 : i32
    %c0_i32_0 = arith.constant 0 : i32
    %c0_i32_1 = arith.constant 0 : i32
    %c0_i32_2 = arith.constant 0 : i32
    return %c0_i32, %c0_i32_0, %c0_i32_1 : i32, i32, i32
  }
  func.func @transform_10(%arg0: i32) -> (i32, i32, i32) {
    %c0_i32 = arith.constant 0 : i32
    %c0_i32_0 = arith.constant 0 : i32
    %c0_i32_1 = arith.constant 0 : i32
    %c0_i32_2 = arith.constant 0 : i32
    return %c0_i32, %c0_i32_0, %c0_i32_1 : i32, i32, i32
  }
  func.func @transform_11(%arg0: i32) -> (i32, i32, i32) {
    %c0_i32 = arith.constant 0 : i32
    %c0_i32_0 = arith.constant 0 : i32
    %c0_i32_1 = arith.constant 0 : i32
    %c0_i32_2 = arith.constant 0 : i32
    return %c0_i32, %c0_i32_0, %c0_i32_1 : i32, i32, i32
  }
  func.func @transform_12(%arg0: i32) -> (i32, i32, i32) {
    %c0_i32 = arith.constant 0 : i32
    %c0_i32_0 = arith.constant 0 : i32
    %c0_i32_1 = arith.constant 0 : i32
    %c0_i32_2 = arith.constant 0 : i32
    return %c0_i32, %c0_i32_0, %c0_i32_1 : i32, i32, i32
  }
  func.func @transform_13(%arg0: i32) -> (i32, i32) {
    %c0_i32 = arith.constant 0 : i32
    %c0_i32_0 = arith.constant 0 : i32
    %c0_i32_1 = arith.constant 0 : i32
    return %c0_i32, %c0_i32_0 : i32, i32
  }
  func.func @transform_14(%arg0: i32) -> (i32, i32) {
    %c0_i32 = arith.constant 0 : i32
    %c0_i32_0 = arith.constant 0 : i32
    %c0_i32_1 = arith.constant 0 : i32
    return %c0_i32, %c0_i32_0 : i32, i32
  }
  func.func @transform_15(%arg0: i32) -> (i32, i32) {
    %c0_i32 = arith.constant 0 : i32
    %c0_i32_0 = arith.constant 0 : i32
    %c0_i32_1 = arith.constant 0 : i32
    return %c0_i32, %c0_i32_0 : i32, i32
  }
}

</mosaic_0001>

<bundles_post_ra>
// kernel: vit_forward.1
= control target key start
LH: loop header
LB: loop body
LE: loop exit
PB: predicated region body
PF: predicated region fallthrough
CT: control target
= control target key end

     0   :  { %vm55_vm0 = vcmask 261120   ;;  %vm59_vm1 = vcmask 254976   ;;  %v2166_v4 = vmov 32.0   ;;  %s2167_s16 = smov 120   ;;  %s2771_s17 = smov 88   ;;  %vm160_vm9 = vcmask 64512   ;;  %s2746_s0 = inlined_call_operand.vmem [shape: f32[10,32], index: 0, kind: input, shape index: {}]   ;;  %s2747_s1 = inlined_call_operand.vmem [shape: f32[2,1,32], index: 1, kind: input, shape index: {}]   ;;  %s2748_s2 = inlined_call_operand.vmem [shape: f32[2,1,32], index: 2, kind: input, shape index: {}]   ;;  %s2749_s4 = inlined_call_operand.vmem [shape: f32[2,1,96], index: 4, kind: input, shape index: {}]   ;;  %s2750_s3 = inlined_call_operand.vmem [shape: bf16[2,32,96], index: 3, kind: input, shape index: {}]   ;;  %s2751_s6 = inlined_call_operand.vmem [shape: f32[2,1,32], index: 6, kind: input, shape index: {}]   ;;  %s2752_s5 = inlined_call_operand.vmem [shape: bf16[2,32,32], index: 5, kind: input, shape index: {}]   ;;  %s2753_s7 = inlined_call_operand.vmem [shape: f32[2,1,32], index: 7, kind: input, shape index: {}]   ;;  %s2754_s8 = inlined_call_operand.vmem [shape: f32[2,1,32], index: 8, kind: input, shape index: {}]   ;;  %s2755_s10 = inlined_call_operand.vmem [shape: f32[2,1,128], index: 10, kind: input, shape index: {}]   ;;  %s2756_s9 = inlined_call_operand.vmem [shape: bf16[2,32,128], index: 9, kind: input, shape index: {}]   ;;  %s2757_s12 = inlined_call_operand.vmem [shape: f32[2,1,32], index: 12, kind: input, shape index: {}]   ;;  %s2758_s11 = inlined_call_operand.vmem [shape: bf16[2,128,32], index: 11, kind: input, shape index: {}]   ;;  %s2759_s13 = inlined_call_operand.vmem [shape: f32[1,32], index: 13, kind: input, shape index: {}]   ;;  %s2760_s14 = inlined_call_operand.vmem [shape: f32[1,32], index: 14, kind: input, shape index: {}]   ;;  %s2761_s15 = inlined_call_operand.vmem [shape: f32[10,32], index: 15, kind: output, shape index: {}]  }
   0x1   :  { %v2265_v0 = vld [vmem:[%s2746_s0] sm:$0xff]  ;;  %v2272_v2 = vld [vmem:[%s2746_s0 + $0x8] sm:$0x3]  ;;  %2072 = vrcp.f32 %v2166_v4  ;;  %s2169_s18 = smov 96   ;;  %s2773_s19 = smov 104   ;;  %vm199_vm10 = vcmask 1041408  }
   0x2   :  { %v56_v1 = vsel %vm55_vm0, %v2265_v0, 0.0  ;;  %v60_v3 = vsel %vm59_vm1, %v2272_v2, 0.0  ;;  %v1981_v21 = vld [vmem:[%s2750_s3 + $0x8] sm:$0xff]  ;;  %v1980_v23 = vld [vmem:[%s2750_s3] sm:$0xff]  ;;  %s2171_s20 = smov 64   ;;  %s2172_s21 = smov 112  }
   0x3   :  { %57 = vadd.xlane.f32.xlu0 %v56_v1  ;;  %148 = vmatpush.bf16.msra.mxu0 %v1981_v21  ;;  %v2054_v42 = vld [vmem:[%s2747_s1] ss:$0 sm:$0xff]  ;;  %s2173_s0 = smov 72   ;;  %vm200_vm11 = vcmask 1042432   ;;  %vm180_vm12 = vcmask 36864   ;;  %s2175_s22 = smov 80  }
   0x4   :  { %v2055_v47 = vld [vmem:[%s2748_s2] ss:$0 sm:$0xff]  ;;  %s2767_s23 = smov 48   ;;  %s2769_s24 = smov 56   ;;  %vm195_vm13 = vcmask 39936   ;;  %vm400_vm14 = vcmask 130048  }
   0x5   :  { %v2058_v52 = vld [vmem:[%s2749_s4] ss:$0 sm:$0xff]  ;;  %s2763_s25 = smov 40   ;;  %s2762_s26 = smov 8   ;;  %vm402_vm15 = vcmask 195584  }
   0x6   :  { %s2765_s27 = smov 16   ;;  %s2766_s28 = smov 24  }
   0x7   :  { %v2073_v5 = vpop.eup %2072  ;;  %149 = vmatpush.bf16.msra.mxu0 %v1980_v23 }
   0x8   :  { %v64_v6 = vmul.f32 32.0, %v2073_v5  ;;  %vm68_vm2 = vweird.f32 %v2073_v5 }
   0xa   :  { %v65_v7 = vsub.f32 1.0, %v64_v6  ;;  %v2174_v6 = vmov 65535  }
   0xb   :  { %61 = vadd.xlane.f32.xlu0 %v60_v3 }
   0xc   :  { %v66_v8 = vmul.f32 %v2073_v5, %v65_v7  ;;  %v201_v7 = vsel %vm199_vm10, 4294967295, %v2174_v6 }
   0xe   :  { %v67_v9 = vadd.f32 %v2073_v5, %v66_v8  ;;  %v2332_v8 = vsel %vm200_vm11, %v201_v7, 0 }
  0x10   :  { %v2276_v10 = vsel %vm68_vm2, %v2073_v5, %v67_v9  ;;  %vm653_vm2 = vcmask 1044480  }
  0x76   :  { %v58_v11 = vpop.xlane.xlu0 %57 }
  0x77   :  { %v70_v12 = vmul.f32 %v2276_v10, %v58_v11 }
  0x79   :  { %v72_v13 = vsub.f32 %v2265_v0, %v70_v12 }
  0x7b   :  { %v74_v14 = vmul.f32 %v72_v13, %v72_v13 }
  0x7d   :  { %v76_v15 = vsel %vm55_vm0, %v74_v14, 0.0 }
  0x7e   :  { %77 = vadd.xlane.f32.xlu1 %v76_v15  ;;  %v62_v16 = vpop.xlane.xlu0 %61 }
  0x7f   :  { %v71_v17 = vmul.f32 %v2276_v10, %v62_v16 }
  0x81   :  { %v73_v18 = vsub.f32 %v2272_v2, %v71_v17 }
  0x83   :  { %v75_v19 = vmul.f32 %v73_v18, %v73_v18 }
  0x85   :  { %v79_v20 = vsel %vm59_vm1, %v75_v19, 0.0 }
  0x86   :  { %80 = vadd.xlane.f32.xlu1 %v79_v20 }
  0xf1   :  { %v78_v22 = vpop.xlane.xlu1 %77 }
  0xf2   :  { %v82_v24 = vmul.f32 %v78_v22, %v2276_v10 }
  0xf4   :  { %v84_v25 = vadd.f32 1e-06, %v82_v24 }
  0xf6   :  { %2074 = vrsqrt.f32 %v84_v25  ;;  %vm92_vm4 = vweird.f32 %v84_v25 }
  0xf9   :  { %v81_v26 = vpop.xlane.xlu1 %80 }
  0xfa   :  { %v83_v27 = vmul.f32 %v81_v26, %v2276_v10 }
  0xfc   :  { %v2075_v28 = vpop.eup %2074  ;;  %v85_v29 = vadd.f32 1e-06, %v83_v27 }
  0xfd   :  { %v87_v30 = vmul.f32 %v2075_v28, %v84_v25  ;;  %vm93_vm3 = vweird.f32 %v2075_v28 }
  0xfe   :  { %2076 = vrsqrt.f32 %v85_v29  ;;  %vm94_vm5 = vmor %vm92_vm4, %vm93_vm3  ;;  %vm102_vm7 = vweird.f32 %v85_v29 }
  0xff   :  { %v88_v31 = vmul.f32 %v2075_v28, %v87_v30 }
 0x101   :  { %v89_v32 = vmul.f32 0.5, %v88_v31 }
 0x103   :  { %v90_v33 = vsub.f32 1.5, %v89_v32 }
 0x104   :  { %v2077_v34 = vpop.eup %2076 }
 0x105   :  { %v91_v35 = vmul.f32 %v2075_v28, %v90_v33  ;;  %v97_v36 = vmul.f32 %v2077_v34, %v85_v29  ;;  %vm103_vm6 = vweird.f32 %v2077_v34 }
 0x106   :  { %vm104_vm8 = vmor %vm102_vm7, %vm103_vm6 }
 0x107   :  { %v98_v37 = vmul.f32 %v2077_v34, %v97_v36  ;;  %v95_v38 = vsel %vm94_vm5, %v2075_v28, %v91_v35 }
 0x108   :  { %v106_v41 = vmul.f32 %v95_v38, %v72_v13 }
 0x109   :  { %v99_v39 = vmul.f32 0.5, %v98_v37 }
 0x10a   :  { %v111_v46 = vmul.f32 %v2054_v42, %v106_v41 }
 0x10b   :  { %v100_v40 = vsub.f32 1.5, %v99_v39 }
 0x10c   :  { %v116_v49 = vadd.f32 %v2055_v47, %v111_v46 }
 0x10d   :  { %v101_v43 = vmul.f32 %v2077_v34, %v100_v40 }
 0x10f   :  { %v105_v44 = vsel %vm104_vm8, %v2077_v34, %v101_v43 }
 0x110   :  { %v107_v45 = vmul.f32 %v105_v44, %v73_v18 }
 0x112   :  { %v112_v48 = vmul.f32 %v2054_v42, %v107_v45 }
 0x114   :  { %v117_v50 = vadd.f32 %v2055_v47, %v112_v48 }
 0x116   :  { %v122_v51 = vpack.c.bf16 %v117_v50, %v116_v49 }
 0x118   :  { %1802 = vmatmul.msk.bf16.vlgmr.msra.gmra.mxu0 %vm55_vm0, %v122_v51 }
 0x195   :  { %v151_v53 = vpop.f32.mrf.mxu0 }
 0x196   :  { %v152_v54 = vadd.f32 %v2058_v52, %v151_v53 }
 0x198   :  { %v2302_v55 = vpack.c.bf16 %v152_v54, %v152_v54 }
 0x19a   :  { %219 = vrot.lane.b32.xlu1 %v2302_v55, %s2167_s16  ;;  %221 = vrot.lane.b32.xlu0 %v2302_v55, %s2771_s17 }
 0x19b   :  { %158 = vrot.lane.b32.xlu2 %v2302_v55, %s2169_s18 }
 0x19d   :  { %v153_v56 = vpop.f32.mrf.mxu0 }
 0x19e   :  { %v154_v57 = vadd.f32 %v2058_v52, %v153_v56 }
 0x1a0   :  { %v404_v58 = vpack.c.bf16 %v154_v57, %v152_v54 }
 0x1a2   :  { %331 = vrot.lane.b32.xlu1 %v2302_v55, %s2773_s19  ;;  %193 = vrot.lane.b32.xlu0 %v2302_v55, %s2171_s20  ;;  %v406_v59 = vshrl.u32 %v404_v58, 16  ;;  %v409_v60 = vshll.u32 %v404_v58, 16 }
 0x1a4   :  { %v408_v61 = vrot.slane %v406_v59, 2  ;;  %v411_v62 = vrot.slane %v409_v60, 3 }
 0x1a6   :  { %v2318_v63 = vor.u32 %v411_v62, %v408_v61 }
 0x1aa   :  { %275 = vrot.lane.b32.xlu1 %v2302_v55, %s2172_s21  ;;  %333 = vrot.lane.b32.xlu0 %v2302_v55, %s2173_s0 }
 0x1b2   :  { %469 = vrot.lane.b32.xlu0 %v2318_v63, %s2771_s17 }
 0x1ba   :  { %467 = vrot.lane.b32.xlu0 %v2318_v63, %s2167_s16 }
 0x1c2   :  { %581 = vrot.lane.b32.xlu0 %v2318_v63, %s2173_s0 }
 0x1ca   :  { %523 = vrot.lane.b32.xlu0 %v2318_v63, %s2172_s21 }
 0x1f5   :  { %v159_v1 = vpop.permute.xlu2 %158 }
 0x1f6   :  { %v165_v3 = vsel %vm160_vm9, %v159_v1, 0 }
 0x1f7   :  { %174 = vmatpush.bf16.xpose.msra.mxu1 %v165_v3 }
 0x1fe   :  { %1803 = vmatmul.msk.bf16.vlgmr.msra.gmra.mxu1 %vm160_vm9, %v2302_v55 }
 0x20c   :  { %v222_v4 = vpop.permute.xlu0 %221  ;;  %v220_v9 = vpop.permute.xlu1 %219 }
 0x20d   :  { %v227_v5 = vsel %vm160_vm9, %v222_v4, 0 }
 0x20e   :  { %236 = vmatpush.bf16.xpose.msra.mxu3 %v227_v5 }
 0x214   :  { %v194_v11 = vpop.permute.xlu0 %193  ;;  %v332_v15 = vpop.permute.xlu1 %331 }
 0x215   :  { %v204_v12 = vand.u32 %v2332_v8, %v194_v11  ;;  %1805 = vmatmul.msk.bf16.vlgmr.msra.gmra.mxu3 %vm160_vm9, %v220_v9 }
 0x217   :  { %213 = vmatpush.bf16.msrb.mxu0 %v204_v12 }
 0x21c   :  { %v334_v13 = vpop.permute.xlu0 %333  ;;  %v276_v40 = vpop.permute.xlu1 %275 }
 0x21d   :  { %v339_v14 = vsel %vm160_vm9, %v334_v13, 0 }
 0x21e   :  { %348 = vmatpush.bf16.xpose.msrb.mxu3 %v339_v14 }
 0x224   :  { %v470_v16 = vpop.permute.xlu0 %469 }
 0x225   :  { %v475_v17 = vsel %vm160_vm9, %v470_v16, 0  ;;  %1809 = vmatmul.msk.bf16.vlgmr.msrb.gmra.mxu3 %vm160_vm9, %v332_v15 }
 0x226   :  { %484 = vmatpush.bf16.xpose.msra.mxu3 %v475_v17 }
 0x22c   :  { %v468_v18 = vpop.permute.xlu0 %467 }
 0x234   :  { %v582_v19 = vpop.permute.xlu0 %581 }
 0x235   :  { %v587_v20 = vsel %vm160_vm9, %v582_v19, 0  ;;  %1813 = vmatmul.msk.bf16.vlgmr.msra.gmra.mxu3 %vm160_vm9, %v468_v18 }
 0x236   :  { %596 = vmatpush.bf16.xpose.msrb.mxu3 %v587_v20 }
 0x23c   :  { %v524_v50 = vpop.permute.xlu0 %523 }
 0x27b   :  { %v176_v21 = vpop.f32.mrf.mxu1 }
 0x27c   :  { %v181_v22 = vsel %vm180_vm12, %v176_v21, -inf }
 0x27d   :  { %182 = vmax.xlane.f32.xlu2 %v181_v22 }
 0x283   :  { %v178_v23 = vpop.f32.mrf.mxu1 }
 0x295   :  { %277 = vrot.lane.b32.xlu2 %v2302_v55, %s2175_s22 }
 0x298   :  { %v238_v24 = vpop.f32.mrf.mxu3 }
 0x299   :  { %v242_v39 = vsel %vm180_vm12, %v238_v24, -inf }
 0x29d   :  { %525 = vrot.lane.b32.xlu2 %v2318_v63, %s2175_s22 }
 0x2a0   :  { %v240_v25 = vpop.f32.mrf.mxu3 }
 0x2a8   :  { %v350_v26 = vpop.f32.mrf.mxu3 }
 0x2a9   :  { %v354_v30 = vsel %vm180_vm12, %v350_v26, -inf }
 0x2b0   :  { %v352_v27 = vpop.f32.mrf.mxu3 }
 0x2b8   :  { %v2346_v28 = vpop.f32.mrf.mxu3 }
 0x2b9   :  { %v490_v31 = vsel %vm180_vm12, %v2346_v28, -inf }
 0x2c0   :  { %v488_v29 = vpop.f32.mrf.mxu3 }
 0x2c6   :  { %355 = vmax.xlane.f32.xlu2 %v354_v30 }
 0x2ce   :  { %491 = vmax.xlane.f32.xlu2 %v490_v31 }
 0x2f0   :  { %v183_v32 = vpop.xlane.xlu2 %182 }
 0x2f1   :  { %v184_v33 = vsub.f32 %v176_v21, %v183_v32 }
 0x2f3   :  { %v185_v34 = vmul.f32 1.442695, %v184_v33 }
 0x2f5   :  { %2078 = vpow2.f32 %v185_v34 }
 0x2f8   :  { %v278_v35 = vpop.permute.xlu2 %277 }
 0x2f9   :  { %v283_v36 = vsel %vm160_vm9, %v278_v35, 0 }
 0x2fa   :  { %292 = vmatpush.bf16.xpose.msra.mxu0 %v283_v36 }
 0x2fb   :  { %v2079_v37 = vpop.eup %2078 }
 0x2fc   :  { %v187_v38 = vsel %vm180_vm12, %v2079_v37, 0.0 }
 0x2fd   :  { %188 = vadd.xlane.f32.xlu1 %v187_v38 }
 0x300   :  { %v526_v46 = vpop.permute.xlu2 %525 }
 0x301   :  { %v531_v48 = vsel %vm160_vm9, %v526_v46, 0 }
 0x316   :  { %413 = vrot.lane.b32.xlu1 %v2318_v63, %s2169_s18 }
 0x31e   :  { %579 = vrot.lane.b32.xlu1 %v2318_v63, %s2773_s19 }
 0x339   :  { %v356_v51 = vpop.xlane.xlu2 %355 }
 0x33a   :  { %v357_v54 = vsub.f32 %v350_v26, %v356_v51 }
 0x33c   :  { %v358_v57 = vmul.f32 1.442695, %v357_v54 }
 0x341   :  { %v492_v19 = vpop.xlane.xlu2 %491 }
 0x342   :  { %v493_v20 = vsub.f32 %v2346_v28, %v492_v19 }
 0x344   :  { %v494_v21 = vmul.f32 1.442695, %v493_v20 }
 0x348   :  { %243 = vmax.xlane.f32.xlu1 %v242_v39 }
 0x361   :  { %310 = vrot.lane.b32.xlu1 %v2302_v55, %s2767_s23 }
 0x369   :  { %502 = vrot.lane.b32.xlu1 %v2318_v63, %s2769_s24 }
 0x370   :  { %v189_v41 = vpop.xlane.xlu1 %188 }
 0x371   :  { %2080 = vrcp.f32 %v189_v41 }
 0x377   :  { %v2081_v42 = vpop.eup %2080 }
 0x378   :  { %v191_v43 = vmul.f32 %v2081_v42, %v2079_v37 }
 0x37a   :  { %v192_v44 = vpack.c.bf16 %v191_v43, %v191_v43 }
 0x37c   :  { %1804 = vmatmul.msk.bf16.vlgmr.msrb.gmra.mxu0 %vm195_vm13, %v192_v44 }
 0x388   :  { %v414_v45 = vpop.permute.xlu1 %413 }
 0x389   :  { %v419_v47 = vsel %vm160_vm9, %v414_v45, 0 }
 0x38a   :  { %428 = vmatpush.bf16.xpose.msrb.mxu0 %v419_v47 }
 0x38c   :  { %1807 = vmatmul.msk.bf16.vlgmr.msra.gmra.mxu0 %vm160_vm9, %v276_v40 }
 0x390   :  { %v580_v49 = vpop.permute.xlu1 %579 }
 0x391   :  { %1817 = vmatmul.msk.bf16.vlgmr.msrb.gmra.mxu3 %vm160_vm9, %v580_v49 }
 0x392   :  { %540 = vmatpush.bf16.xpose.msra.mxu0 %v531_v48 }
 0x39c   :  { %1811 = vmatmul.msk.bf16.vlgmr.msrb.gmra.mxu0 %vm160_vm9, %v2318_v63 }
 0x3ac   :  { %1815 = vmatmul.msk.bf16.vlgmr.msra.gmra.mxu0 %vm160_vm9, %v524_v50 }
 0x3bb   :  { %v244_v52 = vpop.xlane.xlu1 %243 }
 0x3bc   :  { %v245_v53 = vsub.f32 %v238_v24, %v244_v52 }
 0x3be   :  { %v246_v56 = vmul.f32 1.442695, %v245_v53 }
 0x3c0   :  { %2082 = vpow2.f32 %v246_v56 }
 0x3c1   :  { %2084 = vpow2.f32 %v358_v57 }
 0x3c2   :  { %2086 = vpow2.f32 %v494_v21 }
 0x3c6   :  { %v2370_v58 = vpop.eup %2082 }
 0x3c7   :  { %v248_v59 = vsel %vm180_vm12, %v2370_v58, 0.0  ;;  %v2374_v60 = vpop.eup %2084 }
 0x3c8   :  { %249 = vadd.xlane.f32.xlu2 %v248_v59  ;;  %v360_v61 = vsel %vm180_vm12, %v2374_v60, 0.0  ;;  %v2087_v22 = vpop.eup %2086 }
 0x3c9   :  { %v496_v23 = vsel %vm180_vm12, %v2087_v22, 0.0 }
 0x3d0   :  { %361 = vadd.xlane.f32.xlu2 %v360_v61 }
 0x3d3   :  { %v311_v62 = vpop.permute.xlu1 %310 }
 0x3d4   :  { %v316_v1 = vand.u32 %v311_v62, %v2332_v8 }
 0x3d6   :  { %325 = vmatpush.bf16.msrb.mxu1 %v316_v1 }
 0x3db   :  { %v503_v24 = vpop.permute.xlu1 %502 }
 0x3dc   :  { %v508_v48 = vand.u32 %v503_v24, %v2332_v8 }
 0x3e8   :  { %366 = vrot.lane.b32.xlu2 %v2302_v55, %s2763_s25 }
 0x3f9   :  { %v2381_v3 = vpop.f32.mrf.mxu0 }
 0x401   :  { %v217_v4 = vpop.f32.mrf.mxu0 }
 0x409   :  { %v294_v5 = vpop.f32.mrf.mxu0 }
 0x40a   :  { %v298_v14 = vsel %vm180_vm12, %v294_v5, -inf }
 0x411   :  { %v296_v6 = vpop.f32.mrf.mxu0 }
 0x414   :  { %v2383_v7 = vpop.f32.mrf.mxu3 }
 0x415   :  { %v602_v9 = vsel %vm180_vm12, %v2383_v7, -inf }
 0x416   :  { %603 = vmax.xlane.f32.xlu0 %v602_v9 }
 0x419   :  { %v430_v11 = vpop.f32.mrf.mxu0 }
 0x41a   :  { %v434_v12 = vsel %vm180_vm12, %v430_v11, -inf }
 0x41b   :  { %435 = vmax.xlane.f32.xlu1 %v434_v12 }
 0x41c   :  { %v600_v13 = vpop.f32.mrf.mxu3 }
 0x41e   :  { %299 = vmax.xlane.f32.xlu0 %v298_v14 }
 0x421   :  { %v432_v15 = vpop.f32.mrf.mxu0 }
 0x429   :  { %v542_v16 = vpop.f32.mrf.mxu0 }
 0x42a   :  { %v546_v17 = vsel %vm180_vm12, %v542_v16, -inf }
 0x42b   :  { %547 = vmax.xlane.f32.xlu1 %v546_v17 }
 0x431   :  { %v544_v18 = vpop.f32.mrf.mxu0 }
 0x432   :  { %254 = vrot.lane.b32.xlu0 %v2302_v55, %s2769_s24 }
 0x43b   :  { %v250_v27 = vpop.xlane.xlu2 %249 }
 0x443   :  { %v362_v34 = vpop.xlane.xlu2 %361 }
 0x44b   :  { %v367_v41 = vpop.permute.xlu2 %366 }
 0x44c   :  { %v372_v45 = vand.u32 %v367_v41, %v2332_v8  ;;  %v1983_v41 = vld [vmem:[%s2752_s5 + $0x8] sm:$0xff] }
 0x44d   :  { %681 = vmatpush.bf16.msrb.mxu0 %v1983_v41 }
 0x45c   :  { %497 = vadd.xlane.f32.xlu0 %v496_v23 }
 0x489   :  { %v604_v25 = vpop.xlane.xlu0 %603 }
 0x48a   :  { %v605_v53 = vsub.f32 %v2383_v7, %v604_v25 }
 0x48c   :  { %v606_v56 = vmul.f32 1.442695, %v605_v53 }
 0x48e   :  { %v436_v26 = vpop.xlane.xlu1 %435 }
 0x48f   :  { %v437_v29 = vsub.f32 %v430_v11, %v436_v26 }
 0x491   :  { %v438_v30 = vmul.f32 1.442695, %v437_v29  ;;  %v300_v31 = vpop.xlane.xlu0 %299 }
 0x492   :  { %v301_v32 = vsub.f32 %v294_v5, %v300_v31 }
 0x493   :  { %2088 = vpow2.f32 %v438_v30 }
 0x494   :  { %v302_v33 = vmul.f32 1.442695, %v301_v32 }
 0x496   :  { %2090 = vpow2.f32 %v302_v33 }
 0x497   :  { %2092 = vrcp.f32 %v250_v27 }
 0x499   :  { %v2089_v55 = vpop.eup %2088 }
 0x49a   :  { %v440_v28 = vsel %vm180_vm12, %v2089_v55, 0.0 }
 0x49b   :  { %441 = vadd.xlane.f32.xlu2 %v440_v28 }
 0x49c   :  { %v2091_v35 = vpop.eup %2090 }
 0x49d   :  { %v304_v36 = vsel %vm180_vm12, %v2091_v35, 0.0  ;;  %v2093_v39 = vpop.eup %2092 }
 0x49e   :  { %305 = vadd.xlane.f32.xlu1 %v304_v36  ;;  %v548_v37 = vpop.xlane.xlu1 %547  ;;  %v252_v43 = vmul.f32 %v2093_v39, %v2370_v58 }
 0x49f   :  { %v549_v38 = vsub.f32 %v542_v16, %v548_v37 }
 0x4a0   :  { %v253_v46 = vpack.c.bf16 %v252_v43, %v252_v43 }
 0x4a1   :  { %v550_v40 = vmul.f32 1.442695, %v549_v38 }
 0x4a3   :  { %2094 = vpow2.f32 %v550_v40 }
 0x4a4   :  { %v255_v42 = vpop.permute.xlu0 %254  ;;  %2096 = vrcp.f32 %v362_v34 }
 0x4a5   :  { %v260_v44 = vand.u32 %v255_v42, %v2332_v8  ;;  %v1982_v42 = vld [vmem:[%s2752_s5] sm:$0xff] }
 0x4a6   :  { %682 = vmatpush.bf16.msrb.mxu0 %v1982_v42  ;;  %v2061_v42 = vld [vmem:[%s2754_s8] ss:$0 sm:$0xff] }
 0x4a7   :  { %269 = vmatpush.bf16.msra.mxu2 %v260_v44 }
 0x4a9   :  { %v2095_v47 = vpop.eup %2094 }
 0x4aa   :  { %1806 = vmatmul.msk.bf16.vlgmr.msra.gmra.mxu2 %vm195_vm13, %v253_v46  ;;  %v552_v49 = vsel %vm180_vm12, %v2095_v47, 0.0  ;;  %v2097_v50 = vpop.eup %2096 }
 0x4ab   :  { %381 = vmatpush.bf16.msrb.mxu2 %v372_v45  ;;  %553 = vadd.xlane.f32.xlu0 %v552_v49  ;;  %v364_v51 = vmul.f32 %v2097_v50, %v2374_v60 }
 0x4ad   :  { %v365_v52 = vpack.c.bf16 %v364_v51, %v364_v51 }
 0x4af   :  { %517 = vmatpush.bf16.msra.mxu2 %v508_v48 }
 0x4b3   :  { %558 = vrot.lane.b32.xlu2 %v2318_v63, %s2767_s23 }
 0x4b7   :  { %446 = vrot.lane.b32.xlu1 %v2318_v63, %s2171_s20 }
 0x4ba   :  { %1810 = vmatmul.msk.bf16.vlgmr.msrb.gmra.mxu2 %vm195_vm13, %v365_v52 }
 0x4bf   :  { %614 = vrot.lane.b32.xlu0 %v2318_v63, %s2763_s25 }
 0x4cf   :  { %v498_v54 = vpop.xlane.xlu0 %497 }
 0x4d0   :  { %2098 = vrcp.f32 %v498_v54 }
 0x4d1   :  { %2100 = vpow2.f32 %v606_v56 }
 0x4d6   :  { %v2099_v57 = vpop.eup %2098 }
 0x4d7   :  { %v500_v58 = vmul.f32 %v2099_v57, %v2087_v22  ;;  %v2101_v60 = vpop.eup %2100 }
 0x4d8   :  { %v608_v61 = vsel %vm180_vm12, %v2101_v60, 0.0 }
 0x4d9   :  { %v501_v59 = vpack.c.bf16 %v500_v58, %v500_v58 }
 0x4db   :  { %1814 = vmatmul.msk.bf16.vlgmr.msra.gmra.mxu2 %vm195_vm13, %v501_v59 }
 0x4e1   :  { %609 = vadd.xlane.f32.xlu1 %v608_v61 }
 0x50e   :  { %v442_v5 = vpop.xlane.xlu2 %441 }
 0x511   :  { %v306_v62 = vpop.xlane.xlu1 %305 }
 0x512   :  { %2102 = vrcp.f32 %v306_v62  ;;  %v2059_v62 = vld [vmem:[%s2751_s6] ss:$0 sm:$0xff] }
 0x513   :  { %2104 = vrcp.f32 %v442_v5 }
 0x516   :  { %v559_v7 = vpop.permute.xlu2 %558 }
 0x517   :  { %v564_v14 = vand.u32 %v559_v7, %v2332_v8 }
 0x518   :  { %v2103_v1 = vpop.eup %2102 }
 0x519   :  { %v308_v4 = vmul.f32 %v2103_v1, %v2091_v35  ;;  %v2105_v6 = vpop.eup %2104 }
 0x51a   :  { %v444_v9 = vmul.f32 %v2105_v6, %v2089_v55 }
 0x51b   :  { %v309_v63 = vpack.c.bf16 %v308_v4, %v308_v4 }
 0x51c   :  { %v445_v15 = vpack.c.bf16 %v444_v9, %v444_v9 }
 0x51d   :  { %1808 = vmatmul.msk.bf16.vlgmr.msrb.gmra.mxu1 %vm195_vm13, %v309_v63 }
 0x51e   :  { %v554_v11 = vpop.xlane.xlu0 %553 }
 0x51f   :  { %2106 = vrcp.f32 %v554_v11 }
 0x525   :  { %v2107_v20 = vpop.eup %2106 }
 0x526   :  { %v556_v21 = vmul.f32 %v2107_v20, %v2095_v47 }
 0x528   :  { %v557_v22 = vpack.c.bf16 %v556_v21, %v556_v21 }
 0x529   :  { %v447_v12 = vpop.permute.xlu1 %446 }
 0x52a   :  { %v452_v13 = vand.u32 %v447_v12, %v2332_v8 }
 0x52c   :  { %461 = vmatpush.bf16.msra.mxu1 %v452_v13 }
 0x52d   :  { %v271_v16 = vpop.f32.mrf.mxu2 }
 0x52f   :  { %1812 = vmatmul.msk.bf16.vlgmr.msra.gmra.mxu1 %vm195_vm13, %v445_v15 }
 0x530   :  { %573 = vmatpush.bf16.msrb.mxu1 %v564_v14 }
 0x531   :  { %v615_v17 = vpop.permute.xlu0 %614 }
 0x532   :  { %v620_v18 = vand.u32 %v615_v17, %v2332_v8 }
 0x534   :  { %629 = vmatpush.bf16.msrb.mxu2 %v620_v18 }
 0x535   :  { %v273_v19 = vpop.f32.mrf.mxu2 }
 0x536   :  { %v1985_v19 = vld [vmem:[%s2756_s9 + $0x8] sm:$0xff] }
 0x537   :  { %783 = vmatpush.bf16.msra.mxu1 %v1985_v19 }
 0x53d   :  { %v383_v23 = vpop.f32.mrf.mxu2 }
 0x53f   :  { %1816 = vmatmul.msk.bf16.vlgmr.msrb.gmra.mxu1 %vm195_vm13, %v557_v22 }
 0x545   :  { %v385_v24 = vpop.f32.mrf.mxu2 }
 0x554   :  { %v610_v25 = vpop.xlane.xlu1 %609 }
 0x555   :  { %2108 = vrcp.f32 %v610_v25 }
 0x55b   :  { %v2109_v26 = vpop.eup %2108 }
 0x55c   :  { %v612_v27 = vmul.f32 %v2109_v26, %v2101_v60 }
 0x55e   :  { %v613_v29 = vpack.c.bf16 %v612_v27, %v612_v27  ;;  %v519_v30 = vpop.f32.mrf.mxu2 }
 0x55f   :  { %v2024_v31 = vpack.i.bf16 %v271_v16, %v519_v30 }
 0x560   :  { %1818 = vmatmul.msk.bf16.vlgmr.msrb.gmra.mxu2 %vm195_vm13, %v613_v29 }
 0x561   :  { %2025 = vrot.lane.b32.xlu0 %v2024_v31, %s2762_s26 }
 0x566   :  { %v521_v32 = vpop.f32.mrf.mxu2 }
 0x59a   :  { %v327_v33 = vpop.f32.mrf.mxu1 }
 0x5a2   :  { %v329_v55 = vpop.f32.mrf.mxu1 }
 0x5ac   :  { %v463_v34 = vpop.f32.mrf.mxu1 }
 0x5b4   :  { %v465_v28 = vpop.f32.mrf.mxu1 }
 0x5bc   :  { %v575_v35 = vpop.f32.mrf.mxu1 }
 0x5bd   :  { %v2029_v36 = vpack.i.bf16 %v327_v33, %v575_v35 }
 0x5bf   :  { %2030 = vrot.lane.b32.xlu1 %v2029_v36, %s2765_s27 }
 0x5c4   :  { %v577_v37 = vpop.f32.mrf.mxu1 }
 0x5d3   :  { %v2026_v43 = vpop.permute.xlu0 %2025 }
 0x5d4   :  { %v2027_v45 = vunpack.i.l.bf16 %v2026_v43  ;;  %v2028_v47 = vunpack.i.h.bf16 %v2026_v43 }
 0x5d6   :  { %v647_v50 = vsel %vm160_vm9, %v463_v34, %v2027_v45  ;;  %v399_v54 = vsel %vm160_vm9, %v2381_v3, %v2028_v47 }
 0x5e3   :  { %v631_v38 = vpop.f32.mrf.mxu2 }
 0x5e4   :  { %v2034_v39 = vpack.i.bf16 %v383_v23, %v631_v38  ;;  %v1984_v23 = vld [vmem:[%s2756_s9] sm:$0xff] }
 0x5e5   :  { %784 = vmatpush.bf16.msra.mxu1 %v1984_v23  ;;  %v2060_v38 = vld [vmem:[%s2753_s7] ss:$0 sm:$0xff] }
 0x5e6   :  { %2035 = vrot.lane.b32.xlu0 %v2034_v39, %s2766_s28 }
 0x5eb   :  { %v633_v40 = vpop.f32.mrf.mxu2 }
 0x631   :  { %v2031_v44 = vpop.permute.xlu1 %2030 }
 0x632   :  { %v2032_v46 = vunpack.i.l.bf16 %v2031_v44  ;;  %v2033_v48 = vunpack.i.h.bf16 %v2031_v44 }
 0x634   :  { %v648_v53 = vsel %vm400_vm14, %v647_v50, %v2032_v46  ;;  %v401_v57 = vsel %vm400_vm14, %v399_v54, %v2033_v48  ;;  %v1992_v50 = vld [vmem:[%s2758_s11 + $0x30] sm:$0xff] }
 0x635   :  { %v1988_v54 = vld [vmem:[%s2758_s11 + $0x10] sm:$0xff] }
 0x658   :  { %v2036_v49 = vpop.permute.xlu0 %2035 }
 0x659   :  { %v2038_v51 = vunpack.i.h.bf16 %v2036_v49  ;;  %v2037_v52 = vunpack.i.l.bf16 %v2036_v49  ;;  %v1993_v49 = vld [vmem:[%s2758_s11 + $0x38] sm:$0xff] }
 0x65a   :  { %874 = vmatpush.bf16.msra.mxu3 %v1993_v49 }
 0x65b   :  { %v649_v56 = vsel %vm402_vm15, %v648_v53, %v2037_v52  ;;  %v403_v59 = vsel %vm402_vm15, %v401_v57, %v2038_v51  ;;  %v1991_v51 = vld [vmem:[%s2758_s11 + $0x28] sm:$0xff]  ;;  %v1990_v52 = vld [vmem:[%s2758_s11 + $0x20] sm:$0xff]  ;;  %v1989_v53 = vld [vmem:[%s2758_s11 + $0x18] sm:$0xff] }
 0x65c   :  { %v651_v58 = vrot.slane %v649_v56, 3  ;;  %v1987_v56 = vld [vmem:[%s2758_s11 + $0x8] sm:$0xff]  ;;  %v1986_v57 = vld [vmem:[%s2758_s11] sm:$0xff] }
 0x65e   :  { %v654_v60 = vsel %vm653_vm2, %v403_v59, %v651_v58  ;;  %875 = vmatpush.bf16.msra.mxu3 %v1992_v50 }
 0x65f   :  { %v659_v61 = vpack.c.bf16 %v651_v58, %v654_v60  ;;  %v2062_v58 = vld [vmem:[%s2755_s10] ss:$0 sm:$0xff] }
 0x661   :  { %1827 = vmatmul.msk.bf16.vlgmr.msrb.gmra.mxu0 %vm55_vm0, %v659_v61 }
 0x662   :  { %876 = vmatpush.bf16.msra.mxu3 %v1991_v51 }
 0x666   :  { %877 = vmatpush.bf16.msra.mxu3 %v1990_v52 }
 0x66a   :  { %878 = vmatpush.bf16.msra.mxu3 %v1989_v53 }
 0x66e   :  { %879 = vmatpush.bf16.msra.mxu3 %v1988_v54 }
 0x672   :  { %880 = vmatpush.bf16.msra.mxu3 %v1987_v56 }
 0x676   :  { %881 = vmatpush.bf16.msra.mxu3 %v1986_v57 }
 0x6de   :  { %v684_v1 = vpop.f32.mrf.mxu0 }
 0x6df   :  { %v689_v3 = vadd.f32 %v684_v1, %v2265_v0 }
 0x6e1   :  { %v2442_v4 = vadd.f32 %v2059_v62, %v689_v3 }
 0x6e3   :  { %v699_v63 = vsel %vm55_vm0, %v2442_v4, 0.0 }
 0x6e4   :  { %700 = vadd.xlane.f32.xlu2 %v699_v63 }
 0x6e6   :  { %v686_v5 = vpop.f32.mrf.mxu0 }
 0x6e7   :  { %v690_v6 = vadd.f32 %v686_v5, %v2272_v2 }
 0x6e9   :  { %v2447_v7 = vadd.f32 %v2059_v62, %v690_v6 }
 0x6eb   :  { %v702_v9 = vsel %vm59_vm1, %v2447_v7, 0.0 }
 0x6ec   :  { %703 = vadd.xlane.f32.xlu0 %v702_v9 }
 0x757   :  { %v701_v11 = vpop.xlane.xlu2 %700 }
 0x758   :  { %v705_v12 = vmul.f32 %v701_v11, %v2276_v10 }
 0x75a   :  { %v707_v0 = vsub.f32 %v2442_v4, %v705_v12 }
 0x75c   :  { %v709_v13 = vmul.f32 %v707_v0, %v707_v0 }
 0x75e   :  { %v711_v14 = vsel %vm55_vm0, %v709_v13, 0.0 }
 0x75f   :  { %712 = vadd.xlane.f32.xlu1 %v711_v14  ;;  %v704_v15 = vpop.xlane.xlu0 %703 }
 0x760   :  { %v706_v16 = vmul.f32 %v704_v15, %v2276_v10 }
 0x762   :  { %v708_v2 = vsub.f32 %v2447_v7, %v706_v16 }
 0x764   :  { %v710_v17 = vmul.f32 %v708_v2, %v708_v2 }
 0x766   :  { %v714_v18 = vsel %vm59_vm1, %v710_v17, 0.0 }
 0x767   :  { %715 = vadd.xlane.f32.xlu2 %v714_v18 }
 0x7d2   :  { %v713_v20 = vpop.xlane.xlu1 %712 }
 0x7d3   :  { %v717_v21 = vmul.f32 %v713_v20, %v2276_v10 }
 0x7d5   :  { %v719_v22 = vadd.f32 1e-06, %v717_v21 }
 0x7d7   :  { %2110 = vrsqrt.f32 %v719_v22  ;;  %vm727_vm4 = vweird.f32 %v719_v22 }
 0x7da   :  { %v716_v24 = vpop.xlane.xlu2 %715 }
 0x7db   :  { %v718_v25 = vmul.f32 %v716_v24, %v2276_v10 }
 0x7dd   :  { %v2111_v26 = vpop.eup %2110  ;;  %v720_v27 = vadd.f32 1e-06, %v718_v25 }
 0x7de   :  { %v722_v29 = vmul.f32 %v2111_v26, %v719_v22  ;;  %vm728_vm3 = vweird.f32 %v2111_v26  ;;  %v2063_v22 = vld [vmem:[%s2757_s12] ss:$0 sm:$0xff] }
 0x7df   :  { %2112 = vrsqrt.f32 %v720_v27  ;;  %vm729_vm5 = vmor %vm727_vm4, %vm728_vm3  ;;  %vm737_vm7 = vweird.f32 %v720_v27 }
 0x7e0   :  { %v723_v30 = vmul.f32 %v2111_v26, %v722_v29 }
 0x7e2   :  { %v724_v31 = vmul.f32 0.5, %v723_v30 }
 0x7e4   :  { %v725_v32 = vsub.f32 1.5, %v724_v31 }
 0x7e5   :  { %v2113_v33 = vpop.eup %2112 }
 0x7e6   :  { %v726_v55 = vmul.f32 %v2111_v26, %v725_v32  ;;  %v732_v34 = vmul.f32 %v2113_v33, %v720_v27  ;;  %vm738_vm6 = vweird.f32 %v2113_v33 }
 0x7e7   :  { %vm739_vm8 = vmor %vm737_vm7, %vm738_vm6 }
 0x7e8   :  { %v733_v28 = vmul.f32 %v2113_v33, %v732_v34  ;;  %v730_v35 = vsel %vm729_vm5, %v2111_v26, %v726_v55 }
 0x7e9   :  { %v741_v39 = vmul.f32 %v730_v35, %v707_v0 }
 0x7ea   :  { %v734_v36 = vmul.f32 0.5, %v733_v28 }
 0x7eb   :  { %v746_v43 = vmul.f32 %v2060_v38, %v741_v39 }
 0x7ec   :  { %v735_v37 = vsub.f32 1.5, %v734_v36 }
 0x7ed   :  { %v751_v46 = vadd.f32 %v2061_v42, %v746_v43 }
 0x7ee   :  { %v736_v40 = vmul.f32 %v2113_v33, %v735_v37 }
 0x7f0   :  { %v740_v41 = vsel %vm739_vm8, %v2113_v33, %v736_v40 }
 0x7f1   :  { %v742_v44 = vmul.f32 %v740_v41, %v708_v2 }
 0x7f3   :  { %v747_v45 = vmul.f32 %v2060_v38, %v742_v44  ;;  %v1995_v38 = vld [vmem:[%s2750_s3 + $0x18] sm:$0xff] }
 0x7f4   :  { %986 = vmatpush.bf16.msra.mxu2 %v1995_v38 }
 0x7f5   :  { %v752_v47 = vadd.f32 %v2061_v42, %v747_v45  ;;  %v1994_v42 = vld [vmem:[%s2750_s3 + $0x10] sm:$0xff] }
 0x7f7   :  { %v757_v48 = vpack.c.bf16 %v752_v47, %v751_v46 }
 0x7f8   :  { %987 = vmatpush.bf16.msra.mxu2 %v1994_v42 }
 0x7f9   :  { %1836 = vmatmul.msk.bf16.vlgmr.msra.gmra.mxu1 %vm55_vm0, %v757_v48 }
 0x876   :  { %v786_v59 = vpop.f32.mrf.mxu1 }
 0x877   :  { %v787_v60 = vadd.f32 %v2062_v58, %v786_v59  ;;  %v2056_v59 = vld [vmem:[%s2747_s1 + $0x1] ss:$0 sm:$0xff]  ;;  %s2775_s1 = smov 104  }
 0x879   :  { %v793_v61 = vmul.f32 0.044715, %v787_v60  ;;  %v791_v2 = vmul.f32 0.5, %v787_v60 }
 0x87b   :  { %v795_v62 = vmul.f32 %v793_v61, %v787_v60 }
 0x87d   :  { %v797_v1 = vmul.f32 %v795_v62, %v787_v60 }
 0x87e   :  { %v788_v3 = vpop.f32.mrf.mxu1 }
 0x87f   :  { %v799_v63 = vadd.f32 %v797_v1, %v787_v60  ;;  %v789_v5 = vadd.f32 %v2062_v58, %v788_v3  ;;  %v2057_v1 = vld [vmem:[%s2748_s2 + $0x1] ss:$0 sm:$0xff]  ;;  %s2776_s2 = smov 88  }
 0x881   :  { %v794_v6 = vmul.f32 0.044715, %v789_v5  ;;  %v801_v9 = vmul.f32 0.7978846, %v799_v63  ;;  %v792_v17 = vmul.f32 0.5, %v789_v5 }
 0x883   :  { %v796_v11 = vmul.f32 %v794_v6, %v789_v5  ;;  %2114 = vtanh.f32 %v801_v9 }
 0x885   :  { %v798_v12 = vmul.f32 %v796_v11, %v789_v5 }
 0x887   :  { %v800_v0 = vadd.f32 %v798_v12, %v789_v5  ;;  %v2064_v12 = vld [vmem:[%s2749_s4 + $0x1] ss:$0 sm:$0xff]  ;;  %s2777_s4 = smov 56  }
 0x889   :  { %v802_v13 = vmul.f32 0.7978846, %v800_v0  ;;  %v2115_v14 = vpop.eup %2114 }
 0x88a   :  { %v805_v15 = vadd.f32 1.0, %v2115_v14 }
 0x88b   :  { %2116 = vtanh.f32 %v802_v13 }
 0x88c   :  { %v807_v19 = vmul.f32 %v805_v15, %v791_v2 }
 0x891   :  { %v2117_v16 = vpop.eup %2116 }
 0x892   :  { %v806_v18 = vadd.f32 1.0, %v2117_v16 }
 0x894   :  { %v808_v20 = vmul.f32 %v806_v18, %v792_v17 }
 0x896   :  { %v825_v21 = vpack.c.bf16 %v808_v20, %v807_v19 }
 0x898   :  { %882 = vmatmul.bf16.vlgmr.msra.gmra.mxu3 %v825_v21 }
 0x91b   :  { %v883_v23 = vpop.f32.mrf.mxu3 }
 0x91c   :  { %v888_v24 = vadd.f32 %v883_v23, %v2442_v4 }
 0x91e   :  { %v2503_v25 = vadd.f32 %v2063_v22, %v888_v24 }
 0x920   :  { %v900_v26 = vsel %vm55_vm0, %v2503_v25, 0.0 }
 0x921   :  { %901 = vadd.xlane.f32.xlu0 %v900_v26 }
 0x923   :  { %v885_v27 = vpop.f32.mrf.mxu3 }
 0x924   :  { %v889_v29 = vadd.f32 %v885_v27, %v2447_v7 }
 0x926   :  { %v2508_v30 = vadd.f32 %v2063_v22, %v889_v29 }
 0x928   :  { %v903_v31 = vsel %vm59_vm1, %v2508_v30, 0.0 }
 0x929   :  { %904 = vadd.xlane.f32.xlu2 %v903_v31 }
 0x994   :  { %v902_v32 = vpop.xlane.xlu0 %901 }
 0x995   :  { %v906_v33 = vmul.f32 %v902_v32, %v2276_v10 }
 0x997   :  { %v908_v4 = vsub.f32 %v2503_v25, %v906_v33 }
 0x999   :  { %v910_v55 = vmul.f32 %v908_v4, %v908_v4 }
 0x99b   :  { %v912_v34 = vsel %vm55_vm0, %v910_v55, 0.0 }
 0x99c   :  { %913 = vadd.xlane.f32.xlu0 %v912_v34  ;;  %v905_v28 = vpop.xlane.xlu2 %904 }
 0x99d   :  { %v907_v35 = vmul.f32 %v905_v28, %v2276_v10 }
 0x99f   :  { %v909_v7 = vsub.f32 %v2508_v30, %v907_v35 }
 0x9a1   :  { %v911_v36 = vmul.f32 %v909_v7, %v909_v7 }
 0x9a3   :  { %v915_v37 = vsel %vm59_vm1, %v911_v36, 0.0 }
 0x9a4   :  { %916 = vadd.xlane.f32.xlu2 %v915_v37 }
 0xa0f   :  { %v914_v39 = vpop.xlane.xlu0 %913 }
 0xa10   :  { %v918_v40 = vmul.f32 %v914_v39, %v2276_v10 }
 0xa12   :  { %v920_v41 = vadd.f32 1e-06, %v918_v40 }
 0xa14   :  { %2118 = vrsqrt.f32 %v920_v41  ;;  %vm928_vm11 = vweird.f32 %v920_v41 }
 0xa17   :  { %v917_v43 = vpop.xlane.xlu2 %916 }
 0xa18   :  { %v919_v44 = vmul.f32 %v917_v43, %v2276_v10 }
 0xa1a   :  { %v2119_v45 = vpop.eup %2118  ;;  %v921_v46 = vadd.f32 1e-06, %v919_v44 }
 0xa1b   :  { %v923_v47 = vmul.f32 %v2119_v45, %v920_v41  ;;  %vm929_vm10 = vweird.f32 %v2119_v45 }
 0xa1c   :  { %2120 = vrsqrt.f32 %v921_v46  ;;  %vm930_vm3 = vmor %vm928_vm11, %vm929_vm10  ;;  %vm938_vm5 = vweird.f32 %v921_v46 }
 0xa1d   :  { %v924_v48 = vmul.f32 %v2119_v45, %v923_v47 }
 0xa1f   :  { %v925_v49 = vmul.f32 0.5, %v924_v48 }
 0xa21   :  { %v926_v50 = vsub.f32 1.5, %v925_v49 }
 0xa22   :  { %v2121_v51 = vpop.eup %2120 }
 0xa23   :  { %v927_v52 = vmul.f32 %v2119_v45, %v926_v50  ;;  %v933_v53 = vmul.f32 %v2121_v51, %v921_v46  ;;  %vm939_vm4 = vweird.f32 %v2121_v51 }
 0xa24   :  { %vm940_vm6 = vmor %vm938_vm5, %vm939_vm4 }
 0xa25   :  { %v934_v54 = vmul.f32 %v2121_v51, %v933_v53  ;;  %v931_v56 = vsel %vm930_vm3, %v2119_v45, %v927_v52 }
 0xa26   :  { %v942_v60 = vmul.f32 %v931_v56, %v908_v4 }
 0xa27   :  { %v935_v57 = vmul.f32 0.5, %v934_v54 }
 0xa28   :  { %v947_v3 = vmul.f32 %v2056_v59, %v942_v60 }
 0xa29   :  { %v936_v58 = vsub.f32 1.5, %v935_v57 }
 0xa2a   :  { %v952_v6 = vadd.f32 %v2057_v1, %v947_v3 }
 0xa2b   :  { %v937_v61 = vmul.f32 %v2121_v51, %v936_v58 }
 0xa2d   :  { %v941_v62 = vsel %vm940_vm6, %v2121_v51, %v937_v61 }
 0xa2e   :  { %v943_v63 = vmul.f32 %v941_v62, %v909_v7 }
 0xa30   :  { %v948_v5 = vmul.f32 %v2056_v59, %v943_v63 }
 0xa32   :  { %v953_v9 = vadd.f32 %v2057_v1, %v948_v5 }
 0xa34   :  { %v959_v11 = vpack.c.bf16 %v953_v9, %v952_v6 }
 0xa36   :  { %1884 = vmatmul.msk.bf16.vlgmr.msra.gmra.mxu2 %vm55_vm0, %v959_v11 }
 0xab9   :  { %v989_v0 = vpop.f32.mrf.mxu2 }
 0xaba   :  { %v990_v13 = vadd.f32 %v2064_v12, %v989_v0 }
 0xabc   :  { %v2536_v14 = vpack.c.bf16 %v990_v13, %v990_v13 }
 0xabe   :  { %1029 = vrot.lane.b32.xlu2 %v2536_v14, %s2171_s20  ;;  %996 = vrot.lane.b32.xlu1 %v2536_v14, %s2169_s18 }
 0xac1   :  { %v991_v15 = vpop.f32.mrf.mxu2 }
 0xac2   :  { %v992_v16 = vadd.f32 %v2064_v12, %v991_v15 }
 0xac4   :  { %v1233_v2 = vpack.c.bf16 %v992_v16, %v990_v13 }
 0xac6   :  { %1106 = vrot.lane.b32.xlu2 %v2536_v14, %s2172_s21  ;;  %1050 = vrot.lane.b32.xlu1 %v2536_v14, %s2167_s16  ;;  %v1235_v17 = vshrl.u32 %v1233_v2, 16  ;;  %v1238_v18 = vshll.u32 %v1233_v2, 16 }
 0xac8   :  { %v1237_v19 = vrot.slane %v1235_v17, 2  ;;  %v1240_v20 = vrot.slane %v1238_v18, 3 }
 0xaca   :  { %v2548_v21 = vor.u32 %v1240_v20, %v1237_v19 }
 0xace   :  { %1164 = vrot.lane.b32.xlu1 %v2536_v14, %s2173_s0 }
 0xad6   :  { %1242 = vrot.lane.b32.xlu1 %v2548_v21, %s2169_s18  ;;  %s2779_s18 = smov 40  }
 0xade   :  { %1354 = vrot.lane.b32.xlu1 %v2548_v21, %s2175_s22 }
 0xae6   :  { %1408 = vrot.lane.b32.xlu1 %v2548_v21, %s2775_s1 }
 0xb18   :  { %v1030_v22 = vpop.permute.xlu2 %1029 }
 0xb19   :  { %v1035_v23 = vand.u32 %v1030_v22, %v2332_v8 }
 0xb1b   :  { %1044 = vmatpush.bf16.msrb.mxu1 %v1035_v23 }
 0xb20   :  { %v1107_v41 = vpop.permute.xlu2 %1106 }
 0xb30   :  { %v997_v24 = vpop.permute.xlu1 %996 }
 0xb31   :  { %v1002_v26 = vsel %vm160_vm9, %v997_v24, 0 }
 0xb32   :  { %1011 = vmatpush.bf16.xpose.msra.mxu0 %v1002_v26 }
 0xb38   :  { %v1051_v55 = vpop.permute.xlu1 %1050 }
 0xb39   :  { %1885 = vmatmul.msk.bf16.vlgmr.msra.gmra.mxu0 %vm160_vm9, %v2536_v14 }
 0xb40   :  { %v1165_v35 = vpop.permute.xlu1 %1164 }
 0xb41   :  { %v1170_v37 = vsel %vm160_vm9, %v1165_v35, 0 }
 0xb48   :  { %v1243_v46 = vpop.permute.xlu1 %1242 }
 0xb49   :  { %v1248_v49 = vsel %vm160_vm9, %v1243_v46, 0 }
 0xb50   :  { %v1355_v53 = vpop.permute.xlu1 %1354 }
 0xb51   :  { %v1360_v54 = vsel %vm160_vm9, %v1355_v53, 0 }
 0xb58   :  { %v1409_v57 = vpop.permute.xlu1 %1408 }
 0xbb6   :  { %v1013_v27 = vpop.f32.mrf.mxu0 }
 0xbb7   :  { %v1017_v29 = vsel %vm180_vm12, %v1013_v27, -inf }
 0xbb8   :  { %1018 = vmax.xlane.f32.xlu0 %v1017_v29 }
 0xbbe   :  { %v1015_v31 = vpop.f32.mrf.mxu0 }
 0xbcc   :  { %1052 = vrot.lane.b32.xlu0 %v2536_v14, %s2776_s2 }
 0xbd4   :  { %1108 = vrot.lane.b32.xlu0 %v2536_v14, %s2175_s22 }
 0xbdc   :  { %1162 = vrot.lane.b32.xlu0 %v2536_v14, %s2775_s1 }
 0xbe4   :  { %1296 = vrot.lane.b32.xlu0 %v2548_v21, %s2167_s16  ;;  %s2778_s16 = smov 48  }
 0xbec   :  { %1352 = vrot.lane.b32.xlu0 %v2548_v21, %s2172_s21  ;;  %s2781_s21 = smov 24  }
 0xc2b   :  { %v1019_v32 = vpop.xlane.xlu0 %1018 }
 0xc2c   :  { %v1020_v33 = vsub.f32 %v1013_v27, %v1019_v32 }
 0xc2e   :  { %v1021_v4 = vmul.f32 1.442695, %v1020_v33 }
 0xc30   :  { %2122 = vpow2.f32 %v1021_v4 }
 0xc36   :  { %v2123_v34 = vpop.eup %2122 }
 0xc37   :  { %v1023_v28 = vsel %vm180_vm12, %v2123_v34, 0.0 }
 0xc38   :  { %1024 = vadd.xlane.f32.xlu2 %v1023_v28 }
 0xc3e   :  { %v1053_v7 = vpop.permute.xlu0 %1052 }
 0xc3f   :  { %v1058_v36 = vsel %vm160_vm9, %v1053_v7, 0 }
 0xc40   :  { %1067 = vmatpush.bf16.xpose.msrb.mxu2 %v1058_v36 }
 0xc46   :  { %v1109_v38 = vpop.permute.xlu0 %1108 }
 0xc47   :  { %v1114_v39 = vsel %vm160_vm9, %v1109_v38, 0  ;;  %1887 = vmatmul.msk.bf16.vlgmr.msrb.gmra.mxu2 %vm160_vm9, %v1051_v55 }
 0xc48   :  { %1179 = vmatpush.bf16.xpose.msra.mxu2 %v1170_v37  ;;  %1123 = vmatpush.bf16.xpose.msra.mxu1 %v1114_v39 }
 0xc4e   :  { %v1163_v40 = vpop.permute.xlu0 %1162 }
 0xc50   :  { %1298 = vrot.lane.b32.xlu2 %v2548_v21, %s2776_s2 }
 0xc56   :  { %v1297_v50 = vpop.permute.xlu0 %1296 }
 0xc57   :  { %1891 = vmatmul.msk.bf16.vlgmr.msra.gmra.mxu2 %vm160_vm9, %v1163_v40 }
 0xc58   :  { %1410 = vrot.lane.b32.xlu2 %v2548_v21, %s2173_s0  ;;  %s2782_s0 = smov 16  }
 0xc5e   :  { %v1353_v1 = vpop.permute.xlu0 %1352 }
 0xcab   :  { %v1025_v42 = vpop.xlane.xlu2 %1024 }
 0xcac   :  { %2124 = vrcp.f32 %v1025_v42 }
 0xcb2   :  { %v2125_v43 = vpop.eup %2124 }
 0xcb3   :  { %v1027_v44 = vmul.f32 %v2125_v43, %v2123_v34  ;;  %v1299_v45 = vpop.permute.xlu2 %1298 }
 0xcb4   :  { %v1304_v47 = vsel %vm160_vm9, %v1299_v45, 0 }
 0xcb5   :  { %v1028_v48 = vpack.c.bf16 %v1027_v44, %v1027_v44  ;;  %1313 = vmatpush.bf16.xpose.msrb.mxu2 %v1304_v47 }
 0xcb7   :  { %1886 = vmatmul.msk.bf16.vlgmr.msrb.gmra.mxu1 %vm195_vm13, %v1028_v48 }
 0xcb8   :  { %1257 = vmatpush.bf16.xpose.msrb.mxu1 %v1248_v49 }
 0xcbb   :  { %v1411_v51 = vpop.permute.xlu2 %1410 }
 0xcbc   :  { %v1416_v52 = vsel %vm160_vm9, %v1411_v51, 0  ;;  %1895 = vmatmul.msk.bf16.vlgmr.msrb.gmra.mxu2 %vm160_vm9, %v1297_v50 }
 0xcbd   :  { %1425 = vmatpush.bf16.xpose.msra.mxu2 %v1416_v52 }
 0xcc7   :  { %1889 = vmatmul.msk.bf16.vlgmr.msra.gmra.mxu1 %vm160_vm9, %v1107_v41 }
 0xcc8   :  { %1369 = vmatpush.bf16.xpose.msra.mxu1 %v1360_v54 }
 0xcca   :  { %v1069_v56 = vpop.f32.mrf.mxu2 }
 0xccb   :  { %v1073_v58 = vsel %vm180_vm12, %v1069_v56, -inf }
 0xccc   :  { %1074 = vmax.xlane.f32.xlu2 %v1073_v58  ;;  %1899 = vmatmul.msk.bf16.vlgmr.msra.gmra.mxu2 %vm160_vm9, %v1409_v57 }
 0xcd2   :  { %v1071_v59 = vpop.f32.mrf.mxu2 }
 0xcd7   :  { %1893 = vmatmul.msk.bf16.vlgmr.msrb.gmra.mxu1 %vm160_vm9, %v2548_v21 }
 0xcda   :  { %v1181_v60 = vpop.f32.mrf.mxu2 }
 0xcdb   :  { %v1185_v61 = vsel %vm180_vm12, %v1181_v60, -inf }
 0xcdc   :  { %1186 = vmax.xlane.f32.xlu1 %v1185_v61 }
 0xce2   :  { %v1183_v62 = vpop.f32.mrf.mxu2 }
 0xce7   :  { %1897 = vmatmul.msk.bf16.vlgmr.msra.gmra.mxu1 %vm160_vm9, %v1353_v1 }
 0xcf5   :  { %1085 = vrot.lane.b32.xlu1 %v2536_v14, %s2777_s4 }
 0xd34   :  { %v2596_v3 = vpop.f32.mrf.mxu1 }
 0xd3c   :  { %v1048_v63 = vpop.f32.mrf.mxu1 }
 0xd3f   :  { %v1075_v5 = vpop.xlane.xlu2 %1074  ;;  %v1315_v6 = vpop.f32.mrf.mxu2 }
 0xd40   :  { %v1076_v9 = vsub.f32 %v1069_v56, %v1075_v5  ;;  %v1319_v11 = vsel %vm180_vm12, %v1315_v6, -inf }
 0xd41   :  { %1320 = vmax.xlane.f32.xlu0 %v1319_v11 }
 0xd42   :  { %v1077_v12 = vmul.f32 1.442695, %v1076_v9 }
 0xd44   :  { %2126 = vpow2.f32 %v1077_v12  ;;  %v1125_v0 = vpop.f32.mrf.mxu1 }
 0xd45   :  { %v1129_v23 = vsel %vm180_vm12, %v1125_v0, -inf }
 0xd47   :  { %v1317_v13 = vpop.f32.mrf.mxu2 }
 0xd4a   :  { %v2127_v15 = vpop.eup %2126 }
 0xd4b   :  { %v1079_v16 = vsel %vm180_vm12, %v2127_v15, 0.0 }
 0xd4c   :  { %v1127_v2 = vpop.f32.mrf.mxu1  ;;  %1080 = vadd.xlane.f32.xlu0 %v1079_v16 }
 0xd4f   :  { %v1427_v17 = vpop.f32.mrf.mxu2  ;;  %v1187_v18 = vpop.xlane.xlu1 %1186 }
 0xd50   :  { %v1188_v19 = vsub.f32 %v1181_v60, %v1187_v18  ;;  %v1431_v20 = vsel %vm180_vm12, %v1427_v17, -inf }
 0xd51   :  { %1432 = vmax.xlane.f32.xlu2 %v1431_v20 }
 0xd52   :  { %v1189_v22 = vmul.f32 1.442695, %v1188_v19 }
 0xd54   :  { %2128 = vpow2.f32 %v1189_v22  ;;  %1130 = vmax.xlane.f32.xlu0 %v1129_v23  ;;  %v2602_v24 = vpop.f32.mrf.mxu1 }
 0xd55   :  { %v1263_v28 = vsel %vm180_vm12, %v2602_v24, -inf }
 0xd57   :  { %v1429_v26 = vpop.f32.mrf.mxu2 }
 0xd5a   :  { %v2129_v27 = vpop.eup %2128 }
 0xd5b   :  { %v1191_v29 = vsel %vm180_vm12, %v2129_v27, 0.0 }
 0xd5c   :  { %v1261_v31 = vpop.f32.mrf.mxu1  ;;  %1192 = vadd.xlane.f32.xlu2 %v1191_v29 }
 0xd64   :  { %v1371_v32 = vpop.f32.mrf.mxu1 }
 0xd65   :  { %v1375_v33 = vsel %vm180_vm12, %v1371_v32, -inf }
 0xd66   :  { %1376 = vmax.xlane.f32.xlu1 %v1375_v33 }
 0xd67   :  { %v1086_v4 = vpop.permute.xlu1 %1085 }
 0xd68   :  { %v1091_v55 = vand.u32 %v1086_v4, %v2332_v8  ;;  %1141 = vrot.lane.b32.xlu0 %v2536_v14, %s2778_s16 }
 0xd6a   :  { %1100 = vmatpush.bf16.msrb.mxu0 %v1091_v55 }
 0xd6c   :  { %v1373_v34 = vpop.f32.mrf.mxu1 }
 0xd74   :  { %1197 = vrot.lane.b32.xlu2 %v2536_v14, %s2779_s18 }
 0xd7f   :  { %1275 = vrot.lane.b32.xlu1 %v2548_v21, %s2171_s20  ;;  %s2780_s20 = smov 8  }
 0xd9d   :  { %1264 = vmax.xlane.f32.xlu2 %v1263_v28 }
 0xdb4   :  { %v1321_v35 = vpop.xlane.xlu0 %1320 }
 0xdb5   :  { %v1322_v7 = vsub.f32 %v1315_v6, %v1321_v35 }
 0xdb7   :  { %v1323_v36 = vmul.f32 1.442695, %v1322_v7 }
 0xdb9   :  { %2130 = vpow2.f32 %v1323_v36 }
 0xdbf   :  { %v2131_v37 = vpop.eup %2130  ;;  %v1081_v38 = vpop.xlane.xlu0 %1080 }
 0xdc0   :  { %2132 = vrcp.f32 %v1081_v38  ;;  %v1325_v39 = vsel %vm180_vm12, %v2131_v37, 0.0 }
 0xdc1   :  { %1326 = vadd.xlane.f32.xlu1 %v1325_v39 }
 0xdc4   :  { %v1433_v40 = vpop.xlane.xlu2 %1432 }
 0xdc5   :  { %v1434_v41 = vsub.f32 %v1427_v17, %v1433_v40 }
 0xdc6   :  { %v2133_v14 = vpop.eup %2132 }
 0xdc7   :  { %v1083_v42 = vmul.f32 %v2133_v14, %v2127_v15  ;;  %v1435_v43 = vmul.f32 1.442695, %v1434_v41  ;;  %v1131_v44 = vpop.xlane.xlu0 %1130 }
 0xdc8   :  { %v1132_v45 = vsub.f32 %v1125_v0, %v1131_v44 }
 0xdc9   :  { %v1084_v46 = vpack.c.bf16 %v1083_v42, %v1083_v42  ;;  %2134 = vpow2.f32 %v1435_v43 }
 0xdca   :  { %v1133_v47 = vmul.f32 1.442695, %v1132_v45 }
 0xdcb   :  { %1888 = vmatmul.msk.bf16.vlgmr.msrb.gmra.mxu0 %vm195_vm13, %v1084_v46 }
 0xdcc   :  { %2136 = vpow2.f32 %v1133_v47 }
 0xdcf   :  { %v2135_v48 = vpop.eup %2134  ;;  %v1193_v49 = vpop.xlane.xlu2 %1192 }
 0xdd0   :  { %2138 = vrcp.f32 %v1193_v49  ;;  %v1437_v50 = vsel %vm180_vm12, %v2135_v48, 0.0 }
 0xdd1   :  { %1438 = vadd.xlane.f32.xlu1 %v1437_v50 }
 0xdd2   :  { %v2137_v51 = vpop.eup %2136 }
 0xdd3   :  { %v1135_v52 = vsel %vm180_vm12, %v2137_v51, 0.0 }
 0xdd4   :  { %1136 = vadd.xlane.f32.xlu2 %v1135_v52 }
 0xdd6   :  { %v2139_v53 = vpop.eup %2138 }
 0xdd7   :  { %v1195_v54 = vmul.f32 %v2139_v53, %v2129_v27  ;;  %v1198_v56 = vpop.permute.xlu2 %1197 }
 0xdd8   :  { %v1203_v57 = vand.u32 %v1198_v56, %v2332_v8  ;;  %v1997_v56 = vld [vmem:[%s2752_s5 + $0x18] sm:$0xff] }
 0xdd9   :  { %v1196_v59 = vpack.c.bf16 %v1195_v54, %v1195_v54  ;;  %v1377_v61 = vpop.xlane.xlu1 %1376  ;;  %1510 = vmatpush.bf16.msrb.mxu1 %v1997_v56  ;;  %v2067_v56 = vld [vmem:[%s2754_s8 + $0x1] ss:$0 sm:$0xff] }
 0xdda   :  { %v1142_v58 = vpop.permute.xlu0 %1141  ;;  %1212 = vmatpush.bf16.msra.mxu0 %v1203_v57  ;;  %v1378_v63 = vsub.f32 %v1371_v32, %v1377_v61  ;;  %v1996_v57 = vld [vmem:[%s2752_s5 + $0x10] sm:$0xff] }
 0xddb   :  { %v1147_v60 = vand.u32 %v1142_v58, %v2332_v8 }
 0xddc   :  { %v1379_v5 = vmul.f32 1.442695, %v1378_v63 }
 0xddd   :  { %1156 = vmatpush.bf16.msrb.mxu3 %v1147_v60  ;;  %1892 = vmatmul.msk.bf16.vlgmr.msra.gmra.mxu0 %vm195_vm13, %v1196_v59 }
 0xdde   :  { %2140 = vpow2.f32 %v1379_v5  ;;  %1511 = vmatpush.bf16.msrb.mxu1 %v1996_v57 }
 0xde4   :  { %v2141_v9 = vpop.eup %2140 }
 0xde5   :  { %v1381_v0 = vsel %vm180_vm12, %v2141_v9, 0.0 }
 0xdea   :  { %1443 = vrot.lane.b32.xlu1 %v2548_v21, %s2779_s18 }
 0xdec   :  { %1331 = vrot.lane.b32.xlu2 %v2548_v21, %s2777_s4 }
 0xdf1   :  { %v1276_v62 = vpop.permute.xlu1 %1275 }
 0xdf2   :  { %v1281_v1 = vand.u32 %v1276_v62, %v2332_v8 }
 0xdf4   :  { %1290 = vmatpush.bf16.msra.mxu3 %v1281_v1 }
 0xe10   :  { %v1265_v6 = vpop.xlane.xlu2 %1264 }
 0xe11   :  { %v1266_v11 = vsub.f32 %v2602_v24, %v1265_v6 }
 0xe13   :  { %v1267_v12 = vmul.f32 1.442695, %v1266_v11 }
 0xe15   :  { %2142 = vpow2.f32 %v1267_v12  ;;  %1382 = vadd.xlane.f32.xlu2 %v1381_v0 }
 0xe1b   :  { %v2143_v13 = vpop.eup %2142 }
 0xe1c   :  { %v1269_v15 = vsel %vm180_vm12, %v2143_v13, 0.0 }
 0xe1d   :  { %1270 = vadd.xlane.f32.xlu0 %v1269_v15 }
 0xe31   :  { %1387 = vrot.lane.b32.xlu0 %v2548_v21, %s2778_s16 }
 0xe34   :  { %v1327_v16 = vpop.xlane.xlu1 %1326 }
 0xe35   :  { %2144 = vrcp.f32 %v1327_v16 }
 0xe3b   :  { %v2145_v18 = vpop.eup %2144 }
 0xe3c   :  { %v1329_v20 = vmul.f32 %v2145_v18, %v2131_v37 }
 0xe3e   :  { %v1330_v29 = vpack.c.bf16 %v1329_v20, %v1329_v20 }
 0xe44   :  { %v1439_v31 = vpop.xlane.xlu1 %1438 }
 0xe47   :  { %v1137_v2 = vpop.xlane.xlu2 %1136 }
 0xe48   :  { %2146 = vrcp.f32 %v1137_v2  ;;  %v1102_v17 = vpop.f32.mrf.mxu0 }
 0xe49   :  { %2148 = vrcp.f32 %v1439_v31 }
 0xe4e   :  { %v2147_v19 = vpop.eup %2146 }
 0xe4f   :  { %v1139_v22 = vmul.f32 %v2147_v19, %v2137_v51  ;;  %v1332_v23 = vpop.permute.xlu2 %1331  ;;  %v2149_v32 = vpop.eup %2148 }
 0xe50   :  { %v1337_v24 = vand.u32 %v1332_v23, %v2332_v8  ;;  %v1104_v26 = vpop.f32.mrf.mxu0  ;;  %v1441_v55 = vmul.f32 %v2149_v32, %v2135_v48 }
 0xe51   :  { %v1140_v27 = vpack.c.bf16 %v1139_v22, %v1139_v22 }
 0xe52   :  { %1346 = vmatpush.bf16.msrb.mxu0 %v1337_v24  ;;  %v1442_v28 = vpack.c.bf16 %v1441_v55, %v1441_v55 }
 0xe53   :  { %1890 = vmatmul.msk.bf16.vlgmr.msrb.gmra.mxu3 %vm195_vm13, %v1140_v27 }
 0xe55   :  { %1896 = vmatmul.msk.bf16.vlgmr.msrb.gmra.mxu0 %vm195_vm13, %v1330_v29 }
 0xe5a   :  { %v1214_v21 = vpop.f32.mrf.mxu0 }
 0xe5c   :  { %v1444_v33 = vpop.permute.xlu1 %1443 }
 0xe5d   :  { %v1449_v4 = vand.u32 %v1444_v33, %v2332_v8 }
 0xe5f   :  { %1458 = vmatpush.bf16.msra.mxu0 %v1449_v4 }
 0xe62   :  { %v1216_v34 = vpop.f32.mrf.mxu0 }
 0xe65   :  { %1900 = vmatmul.msk.bf16.vlgmr.msra.gmra.mxu0 %vm195_vm13, %v1442_v28  ;;  %v1999_v28 = vld [vmem:[%s2756_s9 + $0x18] sm:$0xff] }
 0xe88   :  { %v1383_v37 = vpop.xlane.xlu2 %1382 }
 0xe90   :  { %v1271_v35 = vpop.xlane.xlu0 %1270 }
 0xe91   :  { %2150 = vrcp.f32 %v1271_v35 }
 0xe92   :  { %2152 = vrcp.f32 %v1383_v37  ;;  %v1998_v37 = vld [vmem:[%s2756_s9 + $0x10] sm:$0xff] }
 0xe97   :  { %v2151_v7 = vpop.eup %2150 }
 0xe98   :  { %v1273_v36 = vmul.f32 %v2151_v7, %v2143_v13  ;;  %v2153_v39 = vpop.eup %2152 }
 0xe99   :  { %v1385_v14 = vmul.f32 %v2153_v39, %v2141_v9 }
 0xe9a   :  { %v1274_v38 = vpack.c.bf16 %v1273_v36, %v1273_v36 }
 0xe9b   :  { %v1386_v42 = vpack.c.bf16 %v1385_v14, %v1385_v14 }
 0xe9c   :  { %1894 = vmatmul.msk.bf16.vlgmr.msra.gmra.mxu3 %vm195_vm13, %v1274_v38 }
 0xea3   :  { %v1388_v40 = vpop.permute.xlu0 %1387 }
 0xea4   :  { %v1393_v41 = vand.u32 %v1388_v40, %v2332_v8 }
 0xea6   :  { %1402 = vmatpush.bf16.msrb.mxu3 %v1393_v41 }
 0xeaa   :  { %1617 = vmatpush.bf16.msra.mxu3 %v1999_v28 }
 0xeac   :  { %1898 = vmatmul.msk.bf16.vlgmr.msrb.gmra.mxu3 %vm195_vm13, %v1386_v42 }
 0xeae   :  { %1618 = vmatpush.bf16.msra.mxu3 %v1998_v37 }
 0xed2   :  { %v1348_v43 = vpop.f32.mrf.mxu0 }
 0xed3   :  { %v2039_v44 = vpack.i.bf16 %v1102_v17, %v1348_v43 }
 0xed5   :  { %2040 = vrot.lane.b32.xlu0 %v2039_v44, %s2780_s20 }
 0xed6   :  { %v1158_v45 = vpop.f32.mrf.mxu3 }
 0xeda   :  { %v1350_v46 = vpop.f32.mrf.mxu0 }
 0xede   :  { %v1160_v47 = vpop.f32.mrf.mxu3 }
 0xee2   :  { %v1460_v48 = vpop.f32.mrf.mxu0 }
 0xee3   :  { %v2049_v49 = vpack.i.bf16 %v1214_v21, %v1460_v48 }
 0xee5   :  { %2050 = vrot.lane.b32.xlu0 %v2049_v49, %s2781_s21 }
 0xeea   :  { %v1462_v50 = vpop.f32.mrf.mxu0 }
 0xf1f   :  { %v1292_v51 = vpop.f32.mrf.mxu3 }
 0xf27   :  { %v1294_v52 = vpop.f32.mrf.mxu3 }
 0xf28   :  { %v2066_v52 = vld [vmem:[%s2753_s7 + $0x1] ss:$0 sm:$0xff] }
 0xf2f   :  { %v1404_v8 = vpop.f32.mrf.mxu3 }
 0xf30   :  { %v2044_v53 = vpack.i.bf16 %v1158_v45, %v1404_v8 }
 0xf32   :  { %2045 = vrot.lane.b32.xlu2 %v2044_v53, %s2782_s0 }
 0xf37   :  { %v1406_v54 = vpop.f32.mrf.mxu3 }
 0xf47   :  { %v2041_v58 = vpop.permute.xlu0 %2040 }
 0xf48   :  { %v2043_v59 = vunpack.i.h.bf16 %v2041_v58  ;;  %v2042_v60 = vunpack.i.l.bf16 %v2041_v58 }
 0xf4a   :  { %v1230_v5 = vsel %vm160_vm9, %v2596_v3, %v2043_v59  ;;  %v1476_v6 = vsel %vm160_vm9, %v1292_v51, %v2042_v60  ;;  %v2065_v3 = vld [vmem:[%s2751_s6 + $0x1] ss:$0 sm:$0xff] }
 0xf57   :  { %v2051_v61 = vpop.permute.xlu0 %2050 }
 0xf58   :  { %v2052_v9 = vunpack.i.l.bf16 %v2051_v61  ;;  %v2053_v0 = vunpack.i.h.bf16 %v2051_v61 }
 0xf8c   :  { %v2046_v62 = vpop.permute.xlu2 %2045 }
 0xf8d   :  { %v2048_v1 = vunpack.i.h.bf16 %v2046_v62  ;;  %v2047_v63 = vunpack.i.l.bf16 %v2046_v62 }
 0xf8f   :  { %v1231_v11 = vsel %vm400_vm14, %v1230_v5, %v2048_v1  ;;  %v1477_v12 = vsel %vm400_vm14, %v1476_v6, %v2047_v63  ;;  %v2007_v1 = vld [vmem:[%s2758_s11 + $0x78] sm:$0xff]  ;;  %v2006_v63 = vld [vmem:[%s2758_s11 + $0x70] sm:$0xff]  ;;  %v2005_v5 = vld [vmem:[%s2758_s11 + $0x68] sm:$0xff] }
 0xf90   :  { %v1478_v13 = vsel %vm402_vm15, %v1477_v12, %v2052_v9  ;;  %v1232_v16 = vsel %vm402_vm15, %v1231_v11, %v2053_v0  ;;  %1709 = vmatpush.bf16.msrb.mxu2 %v2007_v1  ;;  %v2004_v6 = vld [vmem:[%s2758_s11 + $0x60] sm:$0xff]  ;;  %v2003_v9 = vld [vmem:[%s2758_s11 + $0x58] sm:$0xff]  ;;  %v2002_v11 = vld [vmem:[%s2758_s11 + $0x50] sm:$0xff] }
 0xf91   :  { %v1480_v15 = vrot.slane %v1478_v13, 3  ;;  %v2001_v12 = vld [vmem:[%s2758_s11 + $0x48] sm:$0xff]  ;;  %v2000_v0 = vld [vmem:[%s2758_s11 + $0x40] sm:$0xff] }
 0xf92   :  { %v2068_v13 = vld [vmem:[%s2755_s10 + $0x1] ss:$0 sm:$0xff] }
 0xf93   :  { %v1482_v2 = vsel %vm653_vm2, %v1232_v16, %v1480_v15 }
 0xf94   :  { %v1488_v17 = vpack.c.bf16 %v1480_v15, %v1482_v2  ;;  %1710 = vmatpush.bf16.msrb.mxu2 %v2006_v63 }
 0xf96   :  { %1913 = vmatmul.msk.bf16.vlgmr.msrb.gmra.mxu1 %vm55_vm0, %v1488_v17 }
 0xf98   :  { %1711 = vmatpush.bf16.msrb.mxu2 %v2005_v5  ;;  %v2070_v5 = vld [vmem:[%s2759_s13] ss:$0 sm:$0xff] }
 0xf9c   :  { %1712 = vmatpush.bf16.msrb.mxu2 %v2004_v6 }
 0xfa0   :  { %1713 = vmatpush.bf16.msrb.mxu2 %v2003_v9 }
 0xfa4   :  { %1714 = vmatpush.bf16.msrb.mxu2 %v2002_v11 }
 0xfa8   :  { %1715 = vmatpush.bf16.msrb.mxu2 %v2001_v12 }
 0xfac   :  { %1716 = vmatpush.bf16.msrb.mxu2 %v2000_v0 }
0x1013   :  { %v1513_v18 = vpop.f32.mrf.mxu1 }
0x1014   :  { %v1518_v19 = vadd.f32 %v1513_v18, %v2503_v25 }
0x1016   :  { %v2662_v20 = vadd.f32 %v2065_v3, %v1518_v19 }
0x1018   :  { %v1531_v22 = vsel %vm55_vm0, %v2662_v20, 0.0 }
0x1019   :  { %1532 = vadd.xlane.f32.xlu0 %v1531_v22 }
0x101b   :  { %v1515_v23 = vpop.f32.mrf.mxu1 }
0x101c   :  { %v1519_v24 = vadd.f32 %v1515_v23, %v2508_v30 }
0x101e   :  { %v2667_v26 = vadd.f32 %v2065_v3, %v1519_v24 }
0x1020   :  { %v1534_v27 = vsel %vm59_vm1, %v2667_v26, 0.0 }
0x1021   :  { %1535 = vadd.xlane.f32.xlu1 %v1534_v27 }
0x108c   :  { %v1533_v29 = vpop.xlane.xlu0 %1532 }
0x108d   :  { %v1537_v31 = vmul.f32 %v1533_v29, %v2276_v10 }
0x108f   :  { %v1539_v25 = vsub.f32 %v2662_v20, %v1537_v31 }
0x1091   :  { %v1541_v21 = vmul.f32 %v1539_v25, %v1539_v25 }
0x1093   :  { %v1543_v32 = vsel %vm55_vm0, %v1541_v21, 0.0 }
0x1094   :  { %1544 = vadd.xlane.f32.xlu2 %v1543_v32  ;;  %v1536_v33 = vpop.xlane.xlu1 %1535 }
0x1095   :  { %v1538_v4 = vmul.f32 %v1536_v33, %v2276_v10 }
0x1097   :  { %v1540_v30 = vsub.f32 %v2667_v26, %v1538_v4 }
0x1099   :  { %v1542_v55 = vmul.f32 %v1540_v30, %v1540_v30 }
0x109b   :  { %v1546_v34 = vsel %vm59_vm1, %v1542_v55, 0.0 }
0x109c   :  { %1547 = vadd.xlane.f32.xlu0 %v1546_v34 }
0x1107   :  { %v1545_v35 = vpop.xlane.xlu2 %1544 }
0x1108   :  { %v1549_v7 = vmul.f32 %v1545_v35, %v2276_v10 }
0x110a   :  { %v1551_v36 = vadd.f32 1e-06, %v1549_v7  ;;  %v2069_v7 = vld [vmem:[%s2757_s12 + $0x1] ss:$0 sm:$0xff] }
0x110c   :  { %2154 = vrsqrt.f32 %v1551_v36  ;;  %vm1559_vm12 = vweird.f32 %v1551_v36 }
0x110f   :  { %v1548_v38 = vpop.xlane.xlu0 %1547 }
0x1110   :  { %v1550_v39 = vmul.f32 %v1548_v38, %v2276_v10 }
0x1112   :  { %v2155_v40 = vpop.eup %2154  ;;  %v1552_v41 = vadd.f32 1e-06, %v1550_v39 }
0x1113   :  { %v1554_v14 = vmul.f32 %v2155_v40, %v1551_v36  ;;  %vm1560_vm9 = vweird.f32 %v2155_v40 }
0x1114   :  { %2156 = vrsqrt.f32 %v1552_v41  ;;  %vm1561_vm13 = vmor %vm1559_vm12, %vm1560_vm9  ;;  %vm1569_vm15 = vweird.f32 %v1552_v41 }
0x1115   :  { %v1555_v42 = vmul.f32 %v2155_v40, %v1554_v14 }
0x1117   :  { %v1556_v43 = vmul.f32 0.5, %v1555_v42 }
0x1119   :  { %v1557_v44 = vsub.f32 1.5, %v1556_v43 }
0x111a   :  { %v2157_v45 = vpop.eup %2156 }
0x111b   :  { %v1558_v46 = vmul.f32 %v2155_v40, %v1557_v44  ;;  %v1564_v47 = vmul.f32 %v2157_v45, %v1552_v41  ;;  %vm1570_vm14 = vweird.f32 %v2157_v45 }
0x111c   :  { %vm1571_vm2 = vmor %vm1569_vm15, %vm1570_vm14 }
0x111d   :  { %v1565_v48 = vmul.f32 %v2157_v45, %v1564_v47  ;;  %v1562_v49 = vsel %vm1561_vm13, %v2155_v40, %v1558_v46 }
0x111e   :  { %v1573_v8 = vmul.f32 %v1562_v49, %v1539_v25 }
0x111f   :  { %v1566_v50 = vmul.f32 0.5, %v1565_v48 }
0x1120   :  { %v1578_v57 = vmul.f32 %v2066_v52, %v1573_v8 }
0x1121   :  { %v1567_v51 = vsub.f32 1.5, %v1566_v50 }
0x1122   :  { %v1583_v60 = vadd.f32 %v2067_v56, %v1578_v57 }
0x1123   :  { %v1568_v53 = vmul.f32 %v2157_v45, %v1567_v51 }
0x1125   :  { %v1572_v54 = vsel %vm1571_vm2, %v2157_v45, %v1568_v53 }
0x1126   :  { %v1574_v58 = vmul.f32 %v1572_v54, %v1540_v30 }
0x1128   :  { %v1579_v59 = vmul.f32 %v2066_v52, %v1574_v58 }
0x112a   :  { %v1584_v61 = vadd.f32 %v2067_v56, %v1579_v59 }
0x112c   :  { %v1590_v62 = vpack.c.bf16 %v1584_v61, %v1583_v60 }
0x112e   :  { %1930 = vmatmul.msk.bf16.vlgmr.msra.gmra.mxu3 %vm55_vm0, %v1590_v62 }
0x11b1   :  { %v1620_v15 = vpop.f32.mrf.mxu3 }
0x11b2   :  { %v1621_v16 = vadd.f32 %v2068_v13, %v1620_v15 }
0x11b4   :  { %v1627_v2 = vmul.f32 0.044715, %v1621_v16  ;;  %v1625_v4 = vmul.f32 0.5, %v1621_v16 }
0x11b6   :  { %v1629_v17 = vmul.f32 %v1627_v2, %v1621_v16 }
0x11b8   :  { %v1631_v3 = vmul.f32 %v1629_v17, %v1621_v16 }
0x11b9   :  { %v1622_v18 = vpop.f32.mrf.mxu3 }
0x11ba   :  { %v1633_v19 = vadd.f32 %v1631_v3, %v1621_v16  ;;  %v1623_v22 = vadd.f32 %v2068_v13, %v1622_v18 }
0x11bc   :  { %v1628_v23 = vmul.f32 0.044715, %v1623_v22  ;;  %v1635_v24 = vmul.f32 0.7978846, %v1633_v19  ;;  %v1626_v30 = vmul.f32 0.5, %v1623_v22 }
0x11be   :  { %v1630_v27 = vmul.f32 %v1628_v23, %v1623_v22  ;;  %2158 = vtanh.f32 %v1635_v24 }
0x11c0   :  { %v1632_v29 = vmul.f32 %v1630_v27, %v1623_v22 }
0x11c2   :  { %v1634_v31 = vadd.f32 %v1632_v29, %v1623_v22 }
0x11c4   :  { %v1636_v25 = vmul.f32 0.7978846, %v1634_v31  ;;  %v2159_v21 = vpop.eup %2158 }
0x11c5   :  { %v1639_v32 = vadd.f32 1.0, %v2159_v21 }
0x11c6   :  { %2160 = vtanh.f32 %v1636_v25 }
0x11c7   :  { %v1641_v34 = vmul.f32 %v1639_v32, %v1625_v4 }
0x11cc   :  { %v2161_v33 = vpop.eup %2160 }
0x11cd   :  { %v1640_v55 = vadd.f32 1.0, %v2161_v33 }
0x11cf   :  { %v1642_v28 = vmul.f32 %v1640_v55, %v1626_v30 }
0x11d1   :  { %v1660_v35 = vpack.c.bf16 %v1642_v28, %v1641_v34 }
0x11d3   :  { %1717 = vmatmul.bf16.vlgmr.msrb.gmra.mxu2 %v1660_v35 }
0x1256   :  { %v1718_v36 = vpop.f32.mrf.mxu2 }
0x1257   :  { %v1723_v37 = vadd.f32 %v1718_v36, %v2662_v20 }
0x1259   :  { %v1730_v38 = vadd.f32 %v2069_v7, %v1723_v37 }
0x125b   :  { %v1734_v39 = vsel %vm55_vm0, %v1730_v38, 0.0 }
0x125c   :  { %1735 = vadd.xlane.f32.xlu1 %v1734_v39 }
0x125e   :  { %v1720_v40 = vpop.f32.mrf.mxu2 }
0x125f   :  { %v1724_v41 = vadd.f32 %v1720_v40, %v2667_v26 }
0x1261   :  { %v1731_v14 = vadd.f32 %v2069_v7, %v1724_v41 }
0x1263   :  { %v1737_v42 = vsel %vm59_vm1, %v1731_v14, 0.0 }
0x1264   :  { %1738 = vadd.xlane.f32.xlu0 %v1737_v42 }
0x12cf   :  { %v1736_v43 = vpop.xlane.xlu1 %1735 }
0x12d0   :  { %v1740_v44 = vmul.f32 %v1736_v43, %v2276_v10 }
0x12d2   :  { %v1742_v45 = vsub.f32 %v1730_v38, %v1740_v44 }
0x12d4   :  { %v1744_v46 = vmul.f32 %v1742_v45, %v1742_v45 }
0x12d6   :  { %v1746_v47 = vsel %vm55_vm0, %v1744_v46, 0.0 }
0x12d7   :  { %1747 = vadd.xlane.f32.xlu2 %v1746_v47  ;;  %v1739_v20 = vpop.xlane.xlu0 %1738 }
0x12d8   :  { %v1741_v48 = vmul.f32 %v1739_v20, %v2276_v10 }
0x12da   :  { %v1743_v49 = vsub.f32 %v1731_v14, %v1741_v48 }
0x12dc   :  { %v1745_v50 = vmul.f32 %v1743_v49, %v1743_v49 }
0x12de   :  { %v1749_v51 = vsel %vm59_vm1, %v1745_v50, 0.0 }
0x12df   :  { %1750 = vadd.xlane.f32.xlu1 %v1749_v51 }
0x134a   :  { %v1748_v26 = vpop.xlane.xlu2 %1747 }
0x134b   :  { %v1752_v52 = vmul.f32 %v1748_v26, %v2276_v10 }
0x134d   :  { %v1754_v8 = vadd.f32 1e-06, %v1752_v52 }
0x134f   :  { %2162 = vrsqrt.f32 %v1754_v8  ;;  %vm1762_vm8 = vweird.f32 %v1754_v8 }
0x1352   :  { %v1751_v53 = vpop.xlane.xlu1 %1750 }
0x1353   :  { %v1753_v54 = vmul.f32 %v1751_v53, %v2276_v10  ;;  %v2071_v10 = vld [vmem:[%s2760_s14] ss:$0 sm:$0xff] }
0x1355   :  { %v2163_v56 = vpop.eup %2162  ;;  %v1755_v57 = vadd.f32 1e-06, %v1753_v54 }
0x1356   :  { %v1757_v58 = vmul.f32 %v2163_v56, %v1754_v8  ;;  %vm1763_vm7 = vweird.f32 %v2163_v56 }
0x1357   :  { %2164 = vrsqrt.f32 %v1755_v57  ;;  %vm1764_vm10 = vmor %vm1762_vm8, %vm1763_vm7  ;;  %vm1772_vm3 = vweird.f32 %v1755_v57 }
0x1358   :  { %v1758_v59 = vmul.f32 %v2163_v56, %v1757_v58 }
0x135a   :  { %v1759_v60 = vmul.f32 0.5, %v1758_v59 }
0x135c   :  { %v1760_v61 = vsub.f32 1.5, %v1759_v60 }
0x135d   :  { %v2165_v62 = vpop.eup %2164 }
0x135e   :  { %v1761_v1 = vmul.f32 %v2163_v56, %v1760_v61  ;;  %v1767_v63 = vmul.f32 %v2165_v62, %v1755_v57  ;;  %vm1773_vm11 = vweird.f32 %v2165_v62 }
0x135f   :  { %vm1774_vm4 = vmor %vm1772_vm3, %vm1773_vm11 }
0x1360   :  { %v1765_v6 = vsel %vm1764_vm10, %v2163_v56, %v1761_v1  ;;  %v1768_v9 = vmul.f32 %v2165_v62, %v1767_v63 }
0x1361   :  { %v1776_v11 = vmul.f32 %v1765_v6, %v1742_v45 }
0x1362   :  { %v1769_v12 = vmul.f32 0.5, %v1768_v9 }
0x1363   :  { %v1781_v0 = vmul.f32 %v2070_v5, %v1776_v11 }
0x1364   :  { %v1770_v13 = vsub.f32 1.5, %v1769_v12 }
0x1365   :  { %v1786_v15 = vadd.f32 %v2071_v10, %v1781_v0 }
0x1366   :  { %v1771_v16 = vmul.f32 %v2165_v62, %v1770_v13 }
0x1367   :  { %1788 = vst.msk [vmem:[%s2761_s15] sm:$0xff] %vm55_vm0, %v1786_v15 }
0x1368   :  { %v1775_v2 = vsel %vm1774_vm4, %v2165_v62, %v1771_v16 }
0x1369   :  { %v1777_v17 = vmul.f32 %v1775_v2, %v1743_v49 }
0x136b   :  { %v1782_v3 = vmul.f32 %v2070_v5, %v1777_v17 }
0x136d   :  { %v1787_v18 = vadd.f32 %v2071_v10, %v1782_v3 }
0x136f   :  { %1789 = vst.msk [vmem:[%s2761_s15 + $0x8] sm:$0x3] %vm59_vm1, %v1787_v18 }

</bundles_post_ra>
